<compile_context>
chip_gen: v5e
topology: v5e:2x2
jax: 0.10.0
libtpu: 0.0.40
codegen_flags: <defaults>
</compile_context>

<pallas_src>
import functools

import jax
import jax.numpy as jnp
from jax import lax
from jax.experimental import pallas as pl
from jax.experimental.pallas import tpu as pltpu

_LANE = 128
_BN_EPS = 1e-5


def _round_up(n, m):
    return ((n + m - 1) // m) * m


def _largest_divisor_leq(n, cap):
    cap = max(1, min(n, cap))
    for d in range(cap, 0, -1):
        if n % d == 0:
            return d
    return 1


# ---------------------------------------------------------------------------
# Single fused kernel: trunk (stem + residual blocks) + both heads.
# ---------------------------------------------------------------------------
def _network_kernel(x_ref, w_ref, b_ref, wh_ref, bh_ref, out_ref, act_ref, res_ref,
                    *, num_blocks, H, W, P):
    TB = x_ref.shape[0]
    Wp = x_ref.shape[2]          # sublane-padded width (>= W + 2, multiple of 8)
    Cp = x_ref.shape[3]          # lane-padded channel count
    HW = H * W

    def conv3x3(src_ref, layer):
        """3x3 'same' conv (BN folded): K-stacked MXU dots + f32 shift-adds.

        The three dy row-slabs are aligned offset slices of the bf16 halo
        buffer; concatenating them along channels gives K = 3*Cp per dot
        (3 dots per layer).  The dx shift is applied to the f32 result with
        three sublane-sliced adds.
        """
        xk = jnp.concatenate(
            [src_ref[:, dy:dy + H, :, :] for dy in range(3)], axis=-1,
        ).reshape(TB * H * Wp, 3 * Cp)                         # bf16, layout-preserving
        acc = None
        for dx in range(3):
            p = jnp.dot(xk, w_ref[layer, dx],
                        preferred_element_type=jnp.float32)    # (TB*H*Wp, Cp) f32
            p = p.reshape(TB, H, Wp, Cp)[:, :, dx:dx + W, :]
            acc = p if acc is None else acc + p
        return acc + b_ref[layer]                              # folded BN bias (1, Cp)

    def write_act(y_f32):
        # Interior of the halo scratch; the zero border / right pad are never
        # touched, so every layer sees a correct zero halo.
        act_ref[:, 1:H + 1, 1:W + 1, :] = y_f32.astype(jnp.bfloat16)

    # Zero the halo scratch once per grid step (cheap bf16 fill, no load/cast).
    act_ref[...] = jnp.zeros_like(act_ref)

    # Stem: ConvBN + ReLU, taps read straight from the bf16 input block.
    y = jnp.maximum(conv3x3(x_ref, 0), 0.0)                    # (TB, H, W, Cp) f32
    res_ref[...] = y                                           # f32 residual / pool path
    write_act(y)

    # Residual tower: fori_loop with dynamic per-layer weight indexing.
    def block_body(i, carry):
        layer = 1 + 2 * i
        h = jnp.maximum(conv3x3(act_ref, layer), 0.0)
        write_act(h)
        yb = jnp.maximum(conv3x3(act_ref, layer + 1) + res_ref[...], 0.0)
        res_ref[...] = yb
        write_act(yb)
        return carry

    lax.fori_loop(0, num_blocks, block_body, 0)

    # Heads: global average pool (f32) + fused lane-dense (policy|value) linear.
    pooled = jnp.sum(res_ref[...], axis=(1, 2)) * (1.0 / HW)            # (TB, Cp)
    z = jnp.dot(pooled.astype(jnp.bfloat16), wh_ref[...],
                preferred_element_type=jnp.float32) + bh_ref[...]       # (TB, Pp)

    lane = lax.broadcasted_iota(jnp.int32, z.shape, 1)
    zm = jnp.where(lane < P, z, -1e30)                  # mask pad + value lanes
    m = jnp.max(zm, axis=-1, keepdims=True)
    e = jnp.exp(zm - m)
    probs = e / jnp.sum(e, axis=-1, keepdims=True)      # exact normalization
    v = jnp.tanh(z)
    out_ref[:, 0, :] = jnp.where(lane < P, probs,
                                 jnp.where(lane == P, v, 0.0)).astype(out_ref.dtype)


# ---------------------------------------------------------------------------
# VMEM-aware batch-tile picking
# ---------------------------------------------------------------------------
def _vmem_capacity_bytes():
    try:
        return int(pltpu.get_tpu_info().vmem_capacity_bytes)
    except Exception:
        return 64 * 1024 * 1024          # conservative (v7x-sized) fallback


def _pick_batch_tile(B, H, W, Wp, Cp, Pp, L, vmem_limit):
    budget = int(vmem_limit * 0.85)
    # Grid-invariant operands (resident for the whole call; pipeline keeps
    # two buffers even though the constant index_map means a single DMA).
    fixed = 2 * (L * 3 * (3 * Cp) * Cp * 2       # conv weights, bf16
                 + L * Cp * 4                    # conv biases, f32
                 + Cp * Pp * 2 + Pp * 4)         # head weights / bias
    # Per-batch-element working set.
    per_b = ((H + 2) * Wp * Cp * 2 * 2           # input block, bf16, double-buffered
             + (H + 2) * Wp * Cp * 2             # bf16 halo activation scratch
             + H * W * Cp * 4                    # f32 residual / pooling scratch
             + H * Wp * Cp * (3 * 2 + 4)         # xk (bf16, 3*Cp wide) + dot result (f32)
             + H * W * Cp * 4 * 2                # f32 conv accumulator + relu temp
             + Pp * 4 * 2)                       # output block
    cap_b = max(1, (budget - fixed) // max(per_b, 1))
    tb = _largest_divisor_leq(B, cap_b)
    # Prefer >= 2 grid steps so the "parallel" batch axis can shard across
    # v7x's two TensorCores (negligible cost on single-core v5e / v6e).
    if tb == B and B > 1:
        tb = _largest_divisor_leq(B, B // 2)
    return tb


# ---------------------------------------------------------------------------
# Wrapper: parameter packing + pallas_call
# ---------------------------------------------------------------------------
def network_forward(x_nchw, params):
    x = jnp.transpose(x_nchw, (0, 2, 3, 1)).astype(jnp.float32)   # NCHW -> NHWC
    B, H, W, Cin = x.shape
    F = params["stem"]["w"].shape[-1]
    P = params["wp"].shape[1]
    num_blocks = len(params["blocks"])

    Cp = _round_up(max(Cin, F), _LANE)          # lane-dense channel width
    Pp = _round_up(P + 1, _LANE)                # lane-dense head width (policy|value|pad)
    Wp = _round_up(W + 2, 8)                    # sublane-aligned padded width
    L = 1 + 2 * num_blocks

    # ---- conv weights: fold BN scale, pad channels, K-stack the 3 dy taps.
    #      Packed layout: (L, dx, dy*Cp + cin, cout), bf16.
    def pack_conv(p, cin):
        w = p["w"] * p["scale"][None, None, None, :]            # (3,3,cin,cout), BN folded
        w = jnp.pad(w, ((0, 0), (0, 0), (0, Cp - cin), (0, Cp - F)))
        w = jnp.transpose(w, (1, 0, 2, 3)).reshape(3, 3 * Cp, Cp)
        b = jnp.pad(p["bias"], (0, Cp - F))
        return w, b.reshape(1, Cp)

    convs = [pack_conv(params["stem"], Cin)]
    for blk in params["blocks"]:
        convs.append(pack_conv(blk["cb1"], F))
        convs.append(pack_conv(blk["cb2"], F))
    w_all = jnp.stack([c[0] for c in convs]).astype(jnp.bfloat16)   # (L, 3, 3Cp, Cp)
    b_all = jnp.stack([c[1] for c in convs])                        # (L, 1, Cp) f32

    # ---- heads packed into one lane-dense matmul: [policy | value | zeros]
    wh = jnp.zeros((Cp, Pp), jnp.float32)
    wh = wh.at[:F, :P].set(params["wp"])
    wh = wh.at[:F, P].set(params["wv"][:, 0])
    wh = wh.astype(jnp.bfloat16)
    bh = jnp.zeros((1, Pp), jnp.float32)
    bh = bh.at[0, :P].set(params["bp"])
    bh = bh.at[0, P].set(params["bv"][0])

    # ---- halo + sublane + channel padded bf16 input
    xp = jnp.pad(x, ((0, 0), (1, 1), (1, Wp - W - 1), (0, Cp - Cin))).astype(jnp.bfloat16)

    vmem_cap = _vmem_capacity_bytes()
    vmem_limit = min(int(vmem_cap * 0.75), 100 * 1024 * 1024)
    TB = _pick_batch_tile(B, H, W, Wp, Cp, Pp, L, vmem_limit)
    grid = (B // TB,)

    kernel = functools.partial(_network_kernel,
                               num_blocks=num_blocks, H=H, W=W, P=P)
    heads = pl.pallas_call(
        kernel,
        out_shape=jax.ShapeDtypeStruct((B, 1, Pp), jnp.float32),
        grid_spec=pltpu.PrefetchScalarGridSpec(
            num_scalar_prefetch=0,
            grid=grid,
            in_specs=[
                pl.BlockSpec((TB, H + 2, Wp, Cp), lambda b: (b, 0, 0, 0)),
                # Grid-invariant weights: constant index_map => DMA'd once.
                pl.BlockSpec((L, 3, 3 * Cp, Cp), lambda b: (0, 0, 0, 0)),
                pl.BlockSpec((L, 1, Cp), lambda b: (0, 0, 0)),
                pl.BlockSpec((Cp, Pp), lambda b: (0, 0)),
                pl.BlockSpec((1, Pp), lambda b: (0, 0)),
            ],
            out_specs=pl.BlockSpec((TB, 1, Pp), lambda b: (b, 0, 0)),
            scratch_shapes=[
                pltpu.VMEM((TB, H + 2, Wp, Cp), jnp.bfloat16),   # halo activations
                pltpu.VMEM((TB, H, W, Cp), jnp.float32),         # residual / pool path
            ],
        ),
        compiler_params=pltpu.CompilerParams(
            dimension_semantics=("parallel",),
            vmem_limit_bytes=vmem_limit,
        ),
    )(xp, w_all, b_all, wh, bh)

    return heads[:, 0, :P], heads[:, 0, P:P + 1]


# ---------------------------------------------------------------------------
# Parameter init (deterministic, synthetic)
# ---------------------------------------------------------------------------
def _convbn_params(key, cin, cout):
    kw, kg, kb = jax.random.split(key, 3)
    w = jax.random.normal(kw, (3, 3, cin, cout), jnp.float32) * 0.1   # (kh, kw, in, out)
    gamma = 1.0 + 0.1 * jax.random.normal(kg, (cout,), jnp.float32)
    beta = 0.1 * jax.random.normal(kb, (cout,), jnp.float32)
    # eval-mode BN with running_mean=0, running_var=1, folded:
    scale = gamma / jnp.sqrt(1.0 + _BN_EPS)
    bias = beta
    return {"w": w, "scale": scale, "bias": bias}


def init_params(key, num_channels, num_filters, num_residual_blocks, policy_output_size):
    keys = jax.random.split(key, 1 + 2 * num_residual_blocks + 4)
    it = iter(keys)
    params = {"stem": _convbn_params(next(it), num_channels, num_filters), "blocks": []}
    for _ in range(num_residual_blocks):
        params["blocks"].append({
            "cb1": _convbn_params(next(it), num_filters, num_filters),
            "cb2": _convbn_params(next(it), num_filters, num_filters),
        })
    params["wp"] = jax.random.normal(next(it), (num_filters, policy_output_size), jnp.float32) * 0.1
    params["bp"] = 0.1 * jax.random.normal(next(it), (policy_output_size,), jnp.float32)
    params["wv"] = jax.random.normal(next(it), (num_filters, 1), jnp.float32) * 0.1
    params["bv"] = 0.1 * jax.random.normal(next(it), (1,), jnp.float32)
    return params


# ---------------------------------------------------------------------------
# Pure-JAX reference (numerical sanity check only)
# ---------------------------------------------------------------------------
def _reference_forward(x_nchw, params):
    x = jnp.transpose(x_nchw, (0, 2, 3, 1)).astype(jnp.float32)

    def conv_bn(x, p, relu, residual=None):
        y = lax.conv_general_dilated(
            x, p["w"], window_strides=(1, 1), padding="SAME",
            dimension_numbers=("NHWC", "HWIO", "NHWC"))
        y = y * p["scale"] + p["bias"]
        if residual is not None:
            y = y + residual
        return jnp.maximum(y, 0.0) if relu else y

    x = conv_bn(x, params["stem"], True)
    for blk in params["blocks"]:
        h = conv_bn(x, blk["cb1"], True)
        x = conv_bn(h, blk["cb2"], True, residual=x)
    pooled = jnp.mean(x, axis=(1, 2))
    policy = jax.nn.softmax(pooled @ params["wp"] + params["bp"], axis=-1)
    value = jnp.tanh(pooled @ params["wv"] + params["bv"])
    return policy, value


if __name__ == "__main__":
    B, C, H, W = 2, 4, 8, 8
    num_filters = 16
    num_residual_blocks = 2
    policy_output_size = 10

    key = jax.random.PRNGKey(0)
    k_x, k_p = jax.random.split(key)
    x = jax.random.normal(k_x, (B, C, H, W), jnp.float32)
    params = init_params(k_p, C, num_filters, num_residual_blocks, policy_output_size)

    policy, value = jax.jit(network_forward)(x, params)
    policy, value = jax.block_until_ready((policy, value))

    pol_ref, val_ref = _reference_forward(x, params)

    assert policy.shape == (B, policy_output_size)
    assert value.shape == (B, 1)
    assert bool(jnp.all(jnp.isfinite(policy))) and bool(jnp.all(jnp.isfinite(value)))
    assert bool(jnp.allclose(jnp.sum(policy, axis=1), 1.0, atol=5e-3))
    # bf16 MXU operands => loose tolerance vs the f32 reference.
    assert float(jnp.max(jnp.abs(policy - pol_ref))) < 3e-2
    assert float(jnp.max(jnp.abs(value - val_ref))) < 3e-2
    print("KERNEL_OK")
</pallas_src>

<mosaic_0001>
module attributes {stable_mosaic.version = 11 : i64} {
  func.func @_network_kernel(%arg0: i32, %arg1: memref<1x10x16x128xbf16, #tpu.memory_space<vmem>>, %arg2: memref<5x3x384x128xbf16, #tpu.memory_space<vmem>>, %arg3: memref<5x1x128xf32, #tpu.memory_space<vmem>>, %arg4: memref<128x128xbf16, #tpu.memory_space<vmem>>, %arg5: memref<1x128xf32, #tpu.memory_space<vmem>>, %arg6: memref<1x1x128xf32, #tpu.memory_space<vmem>>, %arg7: memref<1x10x16x128xbf16, #tpu.memory_space<vmem>>, %arg8: memref<1x8x8x128xf32, #tpu.memory_space<vmem>>) attributes {dimension_semantics = [#tpu.dimension_semantics<parallel>], iteration_bounds = array<i64: 2>, scalar_prefetch = 0 : i64, scratch_operands = 2 : i64, tpu.core_type = #tpu.core_type<tc>, window_params = [{transform_indices = @transform_0, window_bounds = array<i64: 1, 10, 16, 128>}, {pipeline_mode = #tpu.pipeline_mode<synchronous>, transform_indices = @transform_1, window_bounds = array<i64: 5, 3, 384, 128>}, {pipeline_mode = #tpu.pipeline_mode<synchronous>, transform_indices = @transform_2, window_bounds = array<i64: 5, 1, 128>}, {pipeline_mode = #tpu.pipeline_mode<synchronous>, transform_indices = @transform_3, window_bounds = array<i64: 128, 128>}, {pipeline_mode = #tpu.pipeline_mode<synchronous>, transform_indices = @transform_4, window_bounds = array<i64: 1, 128>}, {transform_indices = @transform_5, window_bounds = array<i64: 1, 1, 128>}]} {
    %cst = arith.constant 0.000000e+00 : bf16
    %0 = vector.broadcast %cst : bf16 to vector<1x10x16x128xbf16>
    %c0 = arith.constant 0 : index
    %c0_0 = arith.constant 0 : index
    %c0_1 = arith.constant 0 : index
    %c0_2 = arith.constant 0 : index
    %1 = vector.load %arg7[%c0, %c0_0, %c0_1, %c0_2] : memref<1x10x16x128xbf16, #tpu.memory_space<vmem>>, vector<1x10x16x128xbf16>
    tpu.vector_store %arg7[%c0, %c0_0, %c0_1, %c0_2], %0 {strides = array<i32>} : memref<1x10x16x128xbf16, #tpu.memory_space<vmem>>, vector<1x10x16x128xbf16>,
    %c0_3 = arith.constant 0 : index
    %c0_4 = arith.constant 0 : index
    %c0_5 = arith.constant 0 : index
    %c0_6 = arith.constant 0 : index
    %2 = vector.load %arg1[%c0_3, %c0_4, %c0_5, %c0_6] : memref<1x10x16x128xbf16, #tpu.memory_space<vmem>>, vector<1x8x16x128xbf16>
    %c0_7 = arith.constant 0 : index
    %c1 = arith.constant 1 : index
    %c0_8 = arith.constant 0 : index
    %c0_9 = arith.constant 0 : index
    %3 = vector.load %arg1[%c0_7, %c1, %c0_8, %c0_9] : memref<1x10x16x128xbf16, #tpu.memory_space<vmem>>, vector<1x8x16x128xbf16>
    %c0_10 = arith.constant 0 : index
    %c2 = arith.constant 2 : index
    %c0_11 = arith.constant 0 : index
    %c0_12 = arith.constant 0 : index
    %4 = vector.load %arg1[%c0_10, %c2, %c0_11, %c0_12] : memref<1x10x16x128xbf16, #tpu.memory_space<vmem>>, vector<1x8x16x128xbf16>
    %5 = tpu.concatenate %2, %3, %4 in 3 : vector<1x8x16x128xbf16>, vector<1x8x16x128xbf16>, vector<1x8x16x128xbf16> -> vector<1x8x16x384xbf16>
    %6 = vector.shape_cast %5 : vector<1x8x16x384xbf16> to vector<128x384xbf16>
    %c0_13 = arith.constant 0 : index
    %c0_14 = arith.constant 0 : index
    %c0_15 = arith.constant 0 : index
    %c0_16 = arith.constant 0 : index
    %7 = vector.load %arg2[%c0_13, %c0_14, %c0_15, %c0_16] : memref<5x3x384x128xbf16, #tpu.memory_space<vmem>>, vector<1x1x384x128xbf16>
    %8 = vector.shape_cast %7 : vector<1x1x384x128xbf16> to vector<384x128xbf16>
    %cst_17 = arith.constant dense<0.000000e+00> : vector<128x128xf32>
    %9 = tpu.matmul %6, %8, %cst_17 {dimension_numbers = #tpu.dot_dimension_numbers<[1], [0], [0], [1], [0, 0, 1, 1], [], []>} : vector<128x384xbf16>, vector<384x128xbf16>, vector<128x128xf32> -> vector<128x128xf32>
    %10 = vector.shape_cast %9 : vector<128x128xf32> to vector<1x8x16x128xf32>
    %11 = vector.extract_strided_slice %10 {offsets = [0, 0, 0, 0], sizes = [1, 8, 8, 128], strides = [1, 1, 1, 1]} : vector<1x8x16x128xf32> to vector<1x8x8x128xf32>
    %c0_18 = arith.constant 0 : index
    %c1_19 = arith.constant 1 : index
    %c0_20 = arith.constant 0 : index
    %c0_21 = arith.constant 0 : index
    %12 = vector.load %arg2[%c0_18, %c1_19, %c0_20, %c0_21] : memref<5x3x384x128xbf16, #tpu.memory_space<vmem>>, vector<1x1x384x128xbf16>
    %13 = vector.shape_cast %12 : vector<1x1x384x128xbf16> to vector<384x128xbf16>
    %cst_22 = arith.constant dense<0.000000e+00> : vector<128x128xf32>
    %14 = tpu.matmul %6, %13, %cst_22 {dimension_numbers = #tpu.dot_dimension_numbers<[1], [0], [0], [1], [0, 0, 1, 1], [], []>} : vector<128x384xbf16>, vector<384x128xbf16>, vector<128x128xf32> -> vector<128x128xf32>
    %15 = vector.shape_cast %14 : vector<128x128xf32> to vector<1x8x16x128xf32>
    %16 = vector.extract_strided_slice %15 {offsets = [0, 0, 1, 0], sizes = [1, 8, 8, 128], strides = [1, 1, 1, 1]} : vector<1x8x16x128xf32> to vector<1x8x8x128xf32>
    %17 = arith.addf %11, %16 : vector<1x8x8x128xf32>
    %c0_23 = arith.constant 0 : index
    %c2_24 = arith.constant 2 : index
    %c0_25 = arith.constant 0 : index
    %c0_26 = arith.constant 0 : index
    %18 = vector.load %arg2[%c0_23, %c2_24, %c0_25, %c0_26] : memref<5x3x384x128xbf16, #tpu.memory_space<vmem>>, vector<1x1x384x128xbf16>
    %19 = vector.shape_cast %18 : vector<1x1x384x128xbf16> to vector<384x128xbf16>
    %cst_27 = arith.constant dense<0.000000e+00> : vector<128x128xf32>
    %20 = tpu.matmul %6, %19, %cst_27 {dimension_numbers = #tpu.dot_dimension_numbers<[1], [0], [0], [1], [0, 0, 1, 1], [], []>} : vector<128x384xbf16>, vector<384x128xbf16>, vector<128x128xf32> -> vector<128x128xf32>
    %21 = vector.shape_cast %20 : vector<128x128xf32> to vector<1x8x16x128xf32>
    %22 = vector.extract_strided_slice %21 {offsets = [0, 0, 2, 0], sizes = [1, 8, 8, 128], strides = [1, 1, 1, 1]} : vector<1x8x16x128xf32> to vector<1x8x8x128xf32>
    %23 = arith.addf %17, %22 : vector<1x8x8x128xf32>
    %c0_28 = arith.constant 0 : index
    %c0_29 = arith.constant 0 : index
    %c0_30 = arith.constant 0 : index
    %24 = vector.load %arg3[%c0_28, %c0_29, %c0_30] : memref<5x1x128xf32, #tpu.memory_space<vmem>>, vector<1x1x128xf32>
    %25 = vector.shape_cast %24 : vector<1x1x128xf32> to vector<1x128xf32>
    %26 = vector.shape_cast %25 : vector<1x128xf32> to vector<1x1x1x128xf32>
    %27 = vector.broadcast %26 : vector<1x1x1x128xf32> to vector<1x8x8x128xf32>
    %28 = arith.addf %23, %27 : vector<1x8x8x128xf32>
    %cst_31 = arith.constant 0.000000e+00 : f32
    %29 = vector.broadcast %cst_31 : f32 to vector<1x8x8x128xf32>
    %30 = arith.maximumf %28, %29 : vector<1x8x8x128xf32>
    %c0_32 = arith.constant 0 : index
    %c0_33 = arith.constant 0 : index
    %c0_34 = arith.constant 0 : index
    %c0_35 = arith.constant 0 : index
    %31 = vector.load %arg8[%c0_32, %c0_33, %c0_34, %c0_35] : memref<1x8x8x128xf32, #tpu.memory_space<vmem>>, vector<1x8x8x128xf32>
    tpu.vector_store %arg8[%c0_32, %c0_33, %c0_34, %c0_35], %30 {strides = array<i32>} : memref<1x8x8x128xf32, #tpu.memory_space<vmem>>, vector<1x8x8x128xf32>,
    %32 = arith.truncf %30 : vector<1x8x8x128xf32> to vector<1x8x8x128xbf16>
    %c0_36 = arith.constant 0 : index
    %c1_37 = arith.constant 1 : index
    %c1_38 = arith.constant 1 : index
    %c0_39 = arith.constant 0 : index
    %33 = vector.load %arg7[%c0_36, %c1_37, %c1_38, %c0_39] : memref<1x10x16x128xbf16, #tpu.memory_space<vmem>>, vector<1x8x8x128xbf16>
    tpu.vector_store %arg7[%c0_36, %c1_37, %c1_38, %c0_39], %32 {strides = array<i32>} : memref<1x10x16x128xbf16, #tpu.memory_space<vmem>>, vector<1x8x8x128xbf16>,
    %c0_i32 = arith.constant 0 : i32
    %c2_i32 = arith.constant 2 : i32
    %34 = arith.addi %c0_i32, %c2_i32 : i32
    %c1_i32 = arith.constant 1 : i32
    scf.for %arg9 = %c0_i32 to %34 step %c1_i32  : i32 {
      %c2_i32_61 = arith.constant 2 : i32
      %69 = arith.muli %c2_i32_61, %arg9 : i32
      %c1_i32_62 = arith.constant 1 : i32
      %70 = arith.addi %c1_i32_62, %69 : i32
      %c0_63 = arith.constant 0 : index
      %c0_64 = arith.constant 0 : index
      %c0_65 = arith.constant 0 : index
      %c0_66 = arith.constant 0 : index
      %71 = vector.load %arg7[%c0_63, %c0_64, %c0_65, %c0_66] : memref<1x10x16x128xbf16, #tpu.memory_space<vmem>>, vector<1x8x16x128xbf16>
      %c0_67 = arith.constant 0 : index
      %c1_68 = arith.constant 1 : index
      %c0_69 = arith.constant 0 : index
      %c0_70 = arith.constant 0 : index
      %72 = vector.load %arg7[%c0_67, %c1_68, %c0_69, %c0_70] : memref<1x10x16x128xbf16, #tpu.memory_space<vmem>>, vector<1x8x16x128xbf16>
      %c0_71 = arith.constant 0 : index
      %c2_72 = arith.constant 2 : index
      %c0_73 = arith.constant 0 : index
      %c0_74 = arith.constant 0 : index
      %73 = vector.load %arg7[%c0_71, %c2_72, %c0_73, %c0_74] : memref<1x10x16x128xbf16, #tpu.memory_space<vmem>>, vector<1x8x16x128xbf16>
      %74 = tpu.concatenate %71, %72, %73 in 3 : vector<1x8x16x128xbf16>, vector<1x8x16x128xbf16>, vector<1x8x16x128xbf16> -> vector<1x8x16x384xbf16>
      %75 = vector.shape_cast %74 : vector<1x8x16x384xbf16> to vector<128x384xbf16>
      %76 = arith.index_cast %70 : i32 to index
      %c0_75 = arith.constant 0 : index
      %c0_76 = arith.constant 0 : index
      %c0_77 = arith.constant 0 : index
      %77 = vector.load %arg2[%76, %c0_75, %c0_76, %c0_77] : memref<5x3x384x128xbf16, #tpu.memory_space<vmem>>, vector<1x1x384x128xbf16>
      %78 = vector.shape_cast %77 : vector<1x1x384x128xbf16> to vector<384x128xbf16>
      %cst_78 = arith.constant dense<0.000000e+00> : vector<128x128xf32>
      %79 = tpu.matmul %75, %78, %cst_78 {dimension_numbers = #tpu.dot_dimension_numbers<[1], [0], [0], [1], [0, 0, 1, 1], [], []>} : vector<128x384xbf16>, vector<384x128xbf16>, vector<128x128xf32> -> vector<128x128xf32>
      %80 = vector.shape_cast %79 : vector<128x128xf32> to vector<1x8x16x128xf32>
      %81 = vector.extract_strided_slice %80 {offsets = [0, 0, 0, 0], sizes = [1, 8, 8, 128], strides = [1, 1, 1, 1]} : vector<1x8x16x128xf32> to vector<1x8x8x128xf32>
      %82 = arith.index_cast %70 : i32 to index
      %c1_79 = arith.constant 1 : index
      %c0_80 = arith.constant 0 : index
      %c0_81 = arith.constant 0 : index
      %83 = vector.load %arg2[%82, %c1_79, %c0_80, %c0_81] : memref<5x3x384x128xbf16, #tpu.memory_space<vmem>>, vector<1x1x384x128xbf16>
      %84 = vector.shape_cast %83 : vector<1x1x384x128xbf16> to vector<384x128xbf16>
      %cst_82 = arith.constant dense<0.000000e+00> : vector<128x128xf32>
      %85 = tpu.matmul %75, %84, %cst_82 {dimension_numbers = #tpu.dot_dimension_numbers<[1], [0], [0], [1], [0, 0, 1, 1], [], []>} : vector<128x384xbf16>, vector<384x128xbf16>, vector<128x128xf32> -> vector<128x128xf32>
      %86 = vector.shape_cast %85 : vector<128x128xf32> to vector<1x8x16x128xf32>
      %87 = vector.extract_strided_slice %86 {offsets = [0, 0, 1, 0], sizes = [1, 8, 8, 128], strides = [1, 1, 1, 1]} : vector<1x8x16x128xf32> to vector<1x8x8x128xf32>
      %88 = arith.addf %81, %87 : vector<1x8x8x128xf32>
      %89 = arith.index_cast %70 : i32 to index
      %c2_83 = arith.constant 2 : index
      %c0_84 = arith.constant 0 : index
      %c0_85 = arith.constant 0 : index
      %90 = vector.load %arg2[%89, %c2_83, %c0_84, %c0_85] : memref<5x3x384x128xbf16, #tpu.memory_space<vmem>>, vector<1x1x384x128xbf16>
      %91 = vector.shape_cast %90 : vector<1x1x384x128xbf16> to vector<384x128xbf16>
      %cst_86 = arith.constant dense<0.000000e+00> : vector<128x128xf32>
      %92 = tpu.matmul %75, %91, %cst_86 {dimension_numbers = #tpu.dot_dimension_numbers<[1], [0], [0], [1], [0, 0, 1, 1], [], []>} : vector<128x384xbf16>, vector<384x128xbf16>, vector<128x128xf32> -> vector<128x128xf32>
      %93 = vector.shape_cast %92 : vector<128x128xf32> to vector<1x8x16x128xf32>
      %94 = vector.extract_strided_slice %93 {offsets = [0, 0, 2, 0], sizes = [1, 8, 8, 128], strides = [1, 1, 1, 1]} : vector<1x8x16x128xf32> to vector<1x8x8x128xf32>
      %95 = arith.addf %88, %94 : vector<1x8x8x128xf32>
      %96 = arith.index_cast %70 : i32 to index
      %c0_87 = arith.constant 0 : index
      %c0_88 = arith.constant 0 : index
      %97 = vector.load %arg3[%96, %c0_87, %c0_88] : memref<5x1x128xf32, #tpu.memory_space<vmem>>, vector<1x1x128xf32>
      %98 = vector.shape_cast %97 : vector<1x1x128xf32> to vector<1x128xf32>
      %99 = vector.shape_cast %98 : vector<1x128xf32> to vector<1x1x1x128xf32>
      %100 = vector.broadcast %99 : vector<1x1x1x128xf32> to vector<1x8x8x128xf32>
      %101 = arith.addf %95, %100 : vector<1x8x8x128xf32>
      %cst_89 = arith.constant 0.000000e+00 : f32
      %102 = vector.broadcast %cst_89 : f32 to vector<1x8x8x128xf32>
      %103 = arith.maximumf %101, %102 : vector<1x8x8x128xf32>
      %104 = arith.truncf %103 : vector<1x8x8x128xf32> to vector<1x8x8x128xbf16>
      %c0_90 = arith.constant 0 : index
      %c1_91 = arith.constant 1 : index
      %c1_92 = arith.constant 1 : index
      %c0_93 = arith.constant 0 : index
      %105 = vector.load %arg7[%c0_90, %c1_91, %c1_92, %c0_93] : memref<1x10x16x128xbf16, #tpu.memory_space<vmem>>, vector<1x8x8x128xbf16>
      tpu.vector_store %arg7[%c0_90, %c1_91, %c1_92, %c0_93], %104 {strides = array<i32>} : memref<1x10x16x128xbf16, #tpu.memory_space<vmem>>, vector<1x8x8x128xbf16>,
      %c1_i32_94 = arith.constant 1 : i32
      %106 = arith.addi %70, %c1_i32_94 : i32
      %c0_95 = arith.constant 0 : index
      %c0_96 = arith.constant 0 : index
      %c0_97 = arith.constant 0 : index
      %c0_98 = arith.constant 0 : index
      %107 = vector.load %arg7[%c0_95, %c0_96, %c0_97, %c0_98] : memref<1x10x16x128xbf16, #tpu.memory_space<vmem>>, vector<1x8x16x128xbf16>
      %c0_99 = arith.constant 0 : index
      %c1_100 = arith.constant 1 : index
      %c0_101 = arith.constant 0 : index
      %c0_102 = arith.constant 0 : index
      %108 = vector.load %arg7[%c0_99, %c1_100, %c0_101, %c0_102] : memref<1x10x16x128xbf16, #tpu.memory_space<vmem>>, vector<1x8x16x128xbf16>
      %c0_103 = arith.constant 0 : index
      %c2_104 = arith.constant 2 : index
      %c0_105 = arith.constant 0 : index
      %c0_106 = arith.constant 0 : index
      %109 = vector.load %arg7[%c0_103, %c2_104, %c0_105, %c0_106] : memref<1x10x16x128xbf16, #tpu.memory_space<vmem>>, vector<1x8x16x128xbf16>
      %110 = tpu.concatenate %107, %108, %109 in 3 : vector<1x8x16x128xbf16>, vector<1x8x16x128xbf16>, vector<1x8x16x128xbf16> -> vector<1x8x16x384xbf16>
      %111 = vector.shape_cast %110 : vector<1x8x16x384xbf16> to vector<128x384xbf16>
      %112 = arith.index_cast %106 : i32 to index
      %c0_107 = arith.constant 0 : index
      %c0_108 = arith.constant 0 : index
      %c0_109 = arith.constant 0 : index
      %113 = vector.load %arg2[%112, %c0_107, %c0_108, %c0_109] : memref<5x3x384x128xbf16, #tpu.memory_space<vmem>>, vector<1x1x384x128xbf16>
      %114 = vector.shape_cast %113 : vector<1x1x384x128xbf16> to vector<384x128xbf16>
      %cst_110 = arith.constant dense<0.000000e+00> : vector<128x128xf32>
      %115 = tpu.matmul %111, %114, %cst_110 {dimension_numbers = #tpu.dot_dimension_numbers<[1], [0], [0], [1], [0, 0, 1, 1], [], []>} : vector<128x384xbf16>, vector<384x128xbf16>, vector<128x128xf32> -> vector<128x128xf32>
      %116 = vector.shape_cast %115 : vector<128x128xf32> to vector<1x8x16x128xf32>
      %117 = vector.extract_strided_slice %116 {offsets = [0, 0, 0, 0], sizes = [1, 8, 8, 128], strides = [1, 1, 1, 1]} : vector<1x8x16x128xf32> to vector<1x8x8x128xf32>
      %118 = arith.index_cast %106 : i32 to index
      %c1_111 = arith.constant 1 : index
      %c0_112 = arith.constant 0 : index
      %c0_113 = arith.constant 0 : index
      %119 = vector.load %arg2[%118, %c1_111, %c0_112, %c0_113] : memref<5x3x384x128xbf16, #tpu.memory_space<vmem>>, vector<1x1x384x128xbf16>
      %120 = vector.shape_cast %119 : vector<1x1x384x128xbf16> to vector<384x128xbf16>
      %cst_114 = arith.constant dense<0.000000e+00> : vector<128x128xf32>
      %121 = tpu.matmul %111, %120, %cst_114 {dimension_numbers = #tpu.dot_dimension_numbers<[1], [0], [0], [1], [0, 0, 1, 1], [], []>} : vector<128x384xbf16>, vector<384x128xbf16>, vector<128x128xf32> -> vector<128x128xf32>
      %122 = vector.shape_cast %121 : vector<128x128xf32> to vector<1x8x16x128xf32>
      %123 = vector.extract_strided_slice %122 {offsets = [0, 0, 1, 0], sizes = [1, 8, 8, 128], strides = [1, 1, 1, 1]} : vector<1x8x16x128xf32> to vector<1x8x8x128xf32>
      %124 = arith.addf %117, %123 : vector<1x8x8x128xf32>
      %125 = arith.index_cast %106 : i32 to index
      %c2_115 = arith.constant 2 : index
      %c0_116 = arith.constant 0 : index
      %c0_117 = arith.constant 0 : index
      %126 = vector.load %arg2[%125, %c2_115, %c0_116, %c0_117] : memref<5x3x384x128xbf16, #tpu.memory_space<vmem>>, vector<1x1x384x128xbf16>
      %127 = vector.shape_cast %126 : vector<1x1x384x128xbf16> to vector<384x128xbf16>
      %cst_118 = arith.constant dense<0.000000e+00> : vector<128x128xf32>
      %128 = tpu.matmul %111, %127, %cst_118 {dimension_numbers = #tpu.dot_dimension_numbers<[1], [0], [0], [1], [0, 0, 1, 1], [], []>} : vector<128x384xbf16>, vector<384x128xbf16>, vector<128x128xf32> -> vector<128x128xf32>
      %129 = vector.shape_cast %128 : vector<128x128xf32> to vector<1x8x16x128xf32>
      %130 = vector.extract_strided_slice %129 {offsets = [0, 0, 2, 0], sizes = [1, 8, 8, 128], strides = [1, 1, 1, 1]} : vector<1x8x16x128xf32> to vector<1x8x8x128xf32>
      %131 = arith.addf %124, %130 : vector<1x8x8x128xf32>
      %132 = arith.index_cast %106 : i32 to index
      %c0_119 = arith.constant 0 : index
      %c0_120 = arith.constant 0 : index
      %133 = vector.load %arg3[%132, %c0_119, %c0_120] : memref<5x1x128xf32, #tpu.memory_space<vmem>>, vector<1x1x128xf32>
      %134 = vector.shape_cast %133 : vector<1x1x128xf32> to vector<1x128xf32>
      %135 = vector.shape_cast %134 : vector<1x128xf32> to vector<1x1x1x128xf32>
      %136 = vector.broadcast %135 : vector<1x1x1x128xf32> to vector<1x8x8x128xf32>
      %137 = arith.addf %131, %136 : vector<1x8x8x128xf32>
      %c0_121 = arith.constant 0 : index
      %c0_122 = arith.constant 0 : index
      %c0_123 = arith.constant 0 : index
      %c0_124 = arith.constant 0 : index
      %138 = vector.load %arg8[%c0_121, %c0_122, %c0_123, %c0_124] : memref<1x8x8x128xf32, #tpu.memory_space<vmem>>, vector<1x8x8x128xf32>
      %139 = arith.addf %137, %138 : vector<1x8x8x128xf32>
      %cst_125 = arith.constant 0.000000e+00 : f32
      %140 = vector.broadcast %cst_125 : f32 to vector<1x8x8x128xf32>
      %141 = arith.maximumf %139, %140 : vector<1x8x8x128xf32>
      %c0_126 = arith.constant 0 : index
      %c0_127 = arith.constant 0 : index
      %c0_128 = arith.constant 0 : index
      %c0_129 = arith.constant 0 : index
      %142 = vector.load %arg8[%c0_126, %c0_127, %c0_128, %c0_129] : memref<1x8x8x128xf32, #tpu.memory_space<vmem>>, vector<1x8x8x128xf32>
      tpu.vector_store %arg8[%c0_126, %c0_127, %c0_128, %c0_129], %141 {strides = array<i32>} : memref<1x8x8x128xf32, #tpu.memory_space<vmem>>, vector<1x8x8x128xf32>,
      %143 = arith.truncf %141 : vector<1x8x8x128xf32> to vector<1x8x8x128xbf16>
      %c0_130 = arith.constant 0 : index
      %c1_131 = arith.constant 1 : index
      %c1_132 = arith.constant 1 : index
      %c0_133 = arith.constant 0 : index
      %144 = vector.load %arg7[%c0_130, %c1_131, %c1_132, %c0_133] : memref<1x10x16x128xbf16, #tpu.memory_space<vmem>>, vector<1x8x8x128xbf16>
      tpu.vector_store %arg7[%c0_130, %c1_131, %c1_132, %c0_133], %143 {strides = array<i32>} : memref<1x10x16x128xbf16, #tpu.memory_space<vmem>>, vector<1x8x8x128xbf16>,
    }
    %c2_i32_40 = arith.constant 2 : i32
    %c0_41 = arith.constant 0 : index
    %c0_42 = arith.constant 0 : index
    %c0_43 = arith.constant 0 : index
    %c0_44 = arith.constant 0 : index
    %35 = vector.load %arg8[%c0_41, %c0_42, %c0_43, %c0_44] : memref<1x8x8x128xf32, #tpu.memory_space<vmem>>, vector<1x8x8x128xf32>
    %cst_45 = arith.constant dense<0.000000e+00> : vector<1x128xf32>
    %36 = vector.multi_reduction <add>, %35, %cst_45 [1, 2] : vector<1x8x8x128xf32> to vector<1x128xf32>
    %cst_46 = arith.constant 1.562500e-02 : f32
    %37 = vector.broadcast %cst_46 : f32 to vector<1x128xf32>
    %38 = arith.mulf %36, %37 : vector<1x128xf32>
    %39 = arith.truncf %38 : vector<1x128xf32> to vector<1x128xbf16>
    %c0_47 = arith.constant 0 : index
    %c0_48 = arith.constant 0 : index
    %40 = vector.load %arg4[%c0_47, %c0_48] : memref<128x128xbf16, #tpu.memory_space<vmem>>, vector<128x128xbf16>
    %cst_49 = arith.constant dense<0.000000e+00> : vector<1x128xf32>
    %41 = tpu.matmul %39, %40, %cst_49 {dimension_numbers = #tpu.dot_dimension_numbers<[1], [0], [0], [1], [0, 0, 1, 1], [], []>} : vector<1x128xbf16>, vector<128x128xbf16>, vector<1x128xf32> -> vector<1x128xf32>
    %c0_50 = arith.constant 0 : index
    %c0_51 = arith.constant 0 : index
    %42 = vector.load %arg5[%c0_50, %c0_51] : memref<1x128xf32, #tpu.memory_space<vmem>>, vector<1x128xf32>
    %43 = arith.addf %41, %42 : vector<1x128xf32>
    %44 = tpu.iota {dimensions = array<i32: 1>} : vector<1x128xi32>
    %c10_i32 = arith.constant 10 : i32
    %45 = vector.broadcast %c10_i32 : i32 to vector<1x128xi32>
    %46 = arith.cmpi slt, %44, %45 : vector<1x128xi32>
    %cst_52 = arith.constant -1.000000e+30 : f32
    %47 = vector.broadcast %cst_52 : f32 to vector<1x128xf32>
    %48 = arith.select %46, %43, %47 : vector<1x128xi1>, vector<1x128xf32>
    %cst_53 = arith.constant dense<0xFF800000> : vector<1xf32>
    %49 = vector.multi_reduction <maximumf>, %48, %cst_53 [1] : vector<1x128xf32> to vector<1xf32>
    %50 = vector.shape_cast %49 : vector<1xf32> to vector<1x1xf32>
    %51 = vector.broadcast %50 : vector<1x1xf32> to vector<1x128xf32>
    %52 = arith.subf %48, %51 : vector<1x128xf32>
    %53 = math.exp %52 : vector<1x128xf32>
    %cst_54 = arith.constant dense<0.000000e+00> : vector<1xf32>
    %54 = vector.multi_reduction <add>, %53, %cst_54 [1] : vector<1x128xf32> to vector<1xf32>
    %55 = vector.shape_cast %54 : vector<1xf32> to vector<1x1xf32>
    %56 = vector.broadcast %55 : vector<1x1xf32> to vector<1x128xf32>
    %57 = arith.divf %53, %56 : vector<1x128xf32>
    %58 = math.tanh %43 : vector<1x128xf32>
    %c10_i32_55 = arith.constant 10 : i32
    %59 = vector.broadcast %c10_i32_55 : i32 to vector<1x128xi32>
    %60 = arith.cmpi slt, %44, %59 : vector<1x128xi32>
    %c10_i32_56 = arith.constant 10 : i32
    %61 = vector.broadcast %c10_i32_56 : i32 to vector<1x128xi32>
    %62 = arith.cmpi eq, %44, %61 : vector<1x128xi32>
    %cst_57 = arith.constant 0.000000e+00 : f32
    %63 = vector.broadcast %cst_57 : f32 to vector<1x128xf32>
    %64 = arith.select %62, %58, %63 : vector<1x128xi1>, vector<1x128xf32>
    %65 = arith.select %60, %57, %64 : vector<1x128xi1>, vector<1x128xf32>
    %c0_58 = arith.constant 0 : index
    %c0_59 = arith.constant 0 : index
    %c0_60 = arith.constant 0 : index
    %66 = vector.load %arg6[%c0_58, %c0_59, %c0_60] : memref<1x1x128xf32, #tpu.memory_space<vmem>>, vector<1x1x128xf32>
    %67 = vector.shape_cast %66 : vector<1x1x128xf32> to vector<1x128xf32>
    %68 = vector.shape_cast %65 : vector<1x128xf32> to vector<1x1x128xf32>
    tpu.vector_store %arg6[%c0_58, %c0_59, %c0_60], %68 {strides = array<i32>} : memref<1x1x128xf32, #tpu.memory_space<vmem>>, vector<1x1x128xf32>,
    return
  }
  func.func @transform_0(%arg0: i32) -> (i32, i32, i32, i32) {
    %c0_i32 = arith.constant 0 : i32
    %c0_i32_0 = arith.constant 0 : i32
    %c0_i32_1 = arith.constant 0 : i32
    %c0_i32_2 = arith.constant 0 : i32
    return %arg0, %c0_i32, %c0_i32_0, %c0_i32_1 : i32, i32, i32, i32
  }
  func.func @transform_1(%arg0: i32) -> (i32, i32, i32, i32) {
    %c0_i32 = arith.constant 0 : i32
    %c0_i32_0 = arith.constant 0 : i32
    %c0_i32_1 = arith.constant 0 : i32
    %c0_i32_2 = arith.constant 0 : i32
    %c0_i32_3 = arith.constant 0 : i32
    return %c0_i32, %c0_i32_0, %c0_i32_1, %c0_i32_2 : i32, i32, i32, i32
  }
  func.func @transform_2(%arg0: i32) -> (i32, i32, i32) {
    %c0_i32 = arith.constant 0 : i32
    %c0_i32_0 = arith.constant 0 : i32
    %c0_i32_1 = arith.constant 0 : i32
    %c0_i32_2 = arith.constant 0 : i32
    return %c0_i32, %c0_i32_0, %c0_i32_1 : i32, i32, i32
  }
  func.func @transform_3(%arg0: i32) -> (i32, i32) {
    %c0_i32 = arith.constant 0 : i32
    %c0_i32_0 = arith.constant 0 : i32
    %c0_i32_1 = arith.constant 0 : i32
    return %c0_i32, %c0_i32_0 : i32, i32
  }
  func.func @transform_4(%arg0: i32) -> (i32, i32) {
    %c0_i32 = arith.constant 0 : i32
    %c0_i32_0 = arith.constant 0 : i32
    %c0_i32_1 = arith.constant 0 : i32
    return %c0_i32, %c0_i32_0 : i32, i32
  }
  func.func @transform_5(%arg0: i32) -> (i32, i32, i32) {
    %c0_i32 = arith.constant 0 : i32
    %c0_i32_0 = arith.constant 0 : i32
    %c0_i32_1 = arith.constant 0 : i32
    return %arg0, %c0_i32, %c0_i32_0 : i32, i32, i32
  }
}

</mosaic_0001>

<bundles_post_ra>
// kernel: network_forward.1
= control target key start
LH: loop header
LB: loop body
LE: loop exit
PB: predicated region body
PF: predicated region fallthrough
CT: control target
= control target key end

     0   :  { %s6934_s18 = smov 0   ;;  %s8164_s0 = inlined_call_operand.vmem [shape: bf16[2,10,16,128], index: 0, kind: input, shape index: {}]   ;;  %s8165_s1 = inlined_call_operand.vmem [shape: bf16[5,3,384,128], index: 1, kind: input, shape index: {}]   ;;  %s8166_s2 = inlined_call_operand.vmem [shape: f32[5,1,128], index: 2, kind: input, shape index: {}]   ;;  %s8167_s3 = inlined_call_operand.vmem [shape: bf16[128,128], index: 3, kind: input, shape index: {}]   ;;  %s8168_s4 = inlined_call_operand.vmem [shape: f32[1,128], index: 4, kind: input, shape index: {}]   ;;  %s8169_s5 = inlined_call_operand.vmem [shape: f32[2,1,128], index: 5, kind: output, shape index: {}]  }
   0x1 LB: > { %s4896_s19 = sadd.s32 4294967295, %s6897_s18   ;;  %p4900_p0 = scmp.ge.s32.totalorder %s6897_s18, 1  ;;  %s6897_s18 = sphi %s6934_s18, %s15_s18  }
   0x2   : > { %p187_p1 = scmp.lt.s32.totalorder %s6897_s18, 3 }
   0x4   : > { %p188_p2 = pnand %p4900_p0, %p187_p1 }
   0x5   : > { %p213_p3 = scmp.lt.s32.totalorder (!%p188_p2), %s4896_s19, 1  ;;  %s7468_s23 = smov (!%p188_p2), 0  }
   0x6   : > { %191 = sbr.rel (%p188_p2) target bundleno = 1799 (0x707), region = 40 }
   0xb   : > { %v6555_v0 = vld [vmem:[%s8165_s1 + $0x38] sm:$0xff]  ;;  %v6554_v1 = vld [vmem:[%s8165_s1 + $0x30] sm:$0xff]  ;;  %s8175_s19 = smov (!%p213_p3, %s4896_s19), 1  ;;  %v6553_v2 = vld [vmem:[%s8165_s1 + $0x28] sm:$0xff]  ;;  %vm1107_vm0 = vcmask 1046528   ;;  %vm1504_vm1 = vcmask 1045504  }
   0xc   : > { %628 = vmatpush.bf16.msra.mxu0 %v6555_v0  ;;  %6820 = vmatpush.bf16.msra.mxu1 %v6555_v0  ;;  %s220_s26 = scalar_lea.vmem %s8169_s5, %s8175_s19  ;;  %v6552_v3 = vld [vmem:[%s8165_s1 + $0x20] sm:$0xff]  ;;  %v6551_v4 = vld [vmem:[%s8165_s1 + $0x18] sm:$0xff]  ;;  %v6550_v5 = vld [vmem:[%s8165_s1 + $0x10] sm:$0xff]  ;;  %s6860_s12 = smul.u32 80, %s8175_s19  ;;  %vm1662_vm2 = vcmask 1043456   ;;  %vm1668_vm4 = vcmask 1040384  }
   0xd   : > { %6821 = vmatpush.bf16.msra.mxu2 %v6555_v0  ;;  %6822 = vmatpush.bf16.msra.mxu3 %v6555_v0  ;;  %v6549_v6 = vld [vmem:[%s8165_s1 + $0x8] sm:$0xff]  ;;  %v6548_v7 = vld [vmem:[%s8165_s1] sm:$0xff]  ;;  %v6571_v8 = vld [vmem:[%s8165_s1 + $0xb8] sm:$0xff]  ;;  %vm1663_vm3 = vsmask.f32 7938 }
   0xe   : > { %s6976_s17 = scalar_lea.vmem %s8164_s0, %s6860_s12  ;;  %v6579_v9 = vld [vmem:[%s8165_s1 + $0xf8] sm:$0xff]  ;;  %v6570_v16 = vld [vmem:[%s8165_s1 + $0xb0] sm:$0xff]  ;;  %v6569_v20 = vld [vmem:[%s8165_s1 + $0xa8] sm:$0xff]  ;;  %vm1669_vm5 = vsmask.f32 256 }
   0xf   : > { %v6985_v10 = vld [vmem:[%s6976_s17] sm:$0xff]  ;;  %v6988_v11 = vld [vmem:[%s6976_s17 + $0x10] sm:$0xff]  ;;  %v6563_v14 = vld [vmem:[%s8165_s1 + $0x78] sm:$0xff] }
  0x10   : > { %629 = vmatpush.bf16.msra.mxu0 %v6554_v1  ;;  %6823 = vmatpush.bf16.msra.mxu1 %v6554_v1  ;;  %v6991_v12 = vld [vmem:[%s6976_s17 + $0x20] sm:$0xff]  ;;  %v6994_v13 = vld [vmem:[%s6976_s17 + $0x30] sm:$0xff]  ;;  %v6587_v15 = vld [vmem:[%s8165_s1 + $0x138] sm:$0xff] }
  0x11   : > { %6824 = vmatpush.bf16.msra.mxu2 %v6554_v1  ;;  %6825 = vmatpush.bf16.msra.mxu3 %v6554_v1  ;;  %v6578_v17 = vld [vmem:[%s8165_s1 + $0xf0] sm:$0xff]  ;;  %v6577_v21 = vld [vmem:[%s8165_s1 + $0xe8] sm:$0xff]  ;;  %v6568_v24 = vld [vmem:[%s8165_s1 + $0xa0] sm:$0xff] }
  0x12   : > { %v6562_v18 = vld [vmem:[%s8165_s1 + $0x70] sm:$0xff]  ;;  %v6561_v22 = vld [vmem:[%s8165_s1 + $0x68] sm:$0xff]  ;;  %v6576_v25 = vld [vmem:[%s8165_s1 + $0xe0] sm:$0xff] }
  0x13   : > { %v6586_v19 = vld [vmem:[%s8165_s1 + $0x130] sm:$0xff]  ;;  %v6585_v23 = vld [vmem:[%s8165_s1 + $0x128] sm:$0xff]  ;;  %v6560_v26 = vld [vmem:[%s8165_s1 + $0x60] sm:$0xff] }
  0x14   : > { %630 = vmatpush.bf16.msra.mxu0 %v6553_v2  ;;  %6826 = vmatpush.bf16.msra.mxu1 %v6553_v2  ;;  %v6584_v27 = vld [vmem:[%s8165_s1 + $0x120] sm:$0xff]  ;;  %v6567_v28 = vld [vmem:[%s8165_s1 + $0x98] sm:$0xff]  ;;  %v7049_v30 = vld [vmem:[%s6976_s17 + $0x8] sm:$0xff] }
  0x15   : > { %6827 = vmatpush.bf16.msra.mxu2 %v6553_v2  ;;  %6828 = vmatpush.bf16.msra.mxu3 %v6553_v2  ;;  %v6575_v29 = vld [vmem:[%s8165_s1 + $0xd8] sm:$0xff]  ;;  %v7055_v32 = vld [vmem:[%s6976_s17 + $0x28] sm:$0xff]  ;;  %v6566_v36 = vld [vmem:[%s8165_s1 + $0x90] sm:$0xff] }
  0x16   : > { %v7052_v31 = vld [vmem:[%s6976_s17 + $0x18] sm:$0xff]  ;;  %v6574_v37 = vld [vmem:[%s8165_s1 + $0xd0] sm:$0xff]  ;;  %v6565_v40 = vld [vmem:[%s8165_s1 + $0x88] sm:$0xff] }
  0x17   : > { %v7058_v33 = vld [vmem:[%s6976_s17 + $0x38] sm:$0xff]  ;;  %v6558_v38 = vld [vmem:[%s8165_s1 + $0x50] sm:$0xff]  ;;  %v6573_v41 = vld [vmem:[%s8165_s1 + $0xc8] sm:$0xff] }
  0x18   : > { %631 = vmatpush.bf16.msra.mxu0 %v6552_v3  ;;  %6829 = vmatpush.bf16.msra.mxu1 %v6552_v3  ;;  %v6559_v34 = vld [vmem:[%s8165_s1 + $0x58] sm:$0xff]  ;;  %v6582_v39 = vld [vmem:[%s8165_s1 + $0x110] sm:$0xff]  ;;  %v6557_v42 = vld [vmem:[%s8165_s1 + $0x48] sm:$0xff] }
  0x19   : > { %6830 = vmatpush.bf16.msra.mxu2 %v6552_v3  ;;  %6831 = vmatpush.bf16.msra.mxu3 %v6552_v3  ;;  %v6583_v35 = vld [vmem:[%s8165_s1 + $0x118] sm:$0xff]  ;;  %v6581_v43 = vld [vmem:[%s8165_s1 + $0x108] sm:$0xff]  ;;  %v6564_v44 = vld [vmem:[%s8165_s1 + $0x80] sm:$0xff] }
  0x1a   : > { %v6572_v45 = vld [vmem:[%s8165_s1 + $0xc0] sm:$0xff]  ;;  %v6603_v46 = vld [vmem:[%s8165_s1 + $0x1b8] sm:$0xff]  ;;  %v6602_v52 = vld [vmem:[%s8165_s1 + $0x1b0] sm:$0xff] }
  0x1b   : > { %v6611_v47 = vld [vmem:[%s8165_s1 + $0x1f8] sm:$0xff]  ;;  %v6556_v48 = vld [vmem:[%s8165_s1 + $0x40] sm:$0xff]  ;;  %v6610_v53 = vld [vmem:[%s8165_s1 + $0x1f0] sm:$0xff] }
  0x1c   : > { %632 = vmatpush.bf16.msra.mxu0 %v6551_v4  ;;  %6832 = vmatpush.bf16.msra.mxu1 %v6551_v4  ;;  %v6580_v49 = vld [vmem:[%s8165_s1 + $0x100] sm:$0xff]  ;;  %v6595_v50 = vld [vmem:[%s8165_s1 + $0x178] sm:$0xff]  ;;  %v7125_v54 = vld [vmem:[%s6976_s17 + $0x8] sm:$0xff] }
  0x1d   : > { %6833 = vmatpush.bf16.msra.mxu2 %v6551_v4  ;;  %6834 = vmatpush.bf16.msra.mxu3 %v6551_v4  ;;  %v6619_v51 = vld [vmem:[%s8165_s1 + $0x238] sm:$0xff]  ;;  %v7128_v55 = vld [vmem:[%s6976_s17 + $0x10] sm:$0xff]  ;;  %v6601_v58 = vld [vmem:[%s8165_s1 + $0x1a8] sm:$0xff] }
  0x1e   : > { %v6594_v56 = vld [vmem:[%s8165_s1 + $0x170] sm:$0xff]  ;;  %v6609_v59 = vld [vmem:[%s8165_s1 + $0x1e8] sm:$0xff]  ;;  %v7156_v63 = vld [vmem:[%s6976_s17 + $0x18] sm:$0xff] }
  0x1f   : > { %v6618_v57 = vld [vmem:[%s8165_s1 + $0x230] sm:$0xff]  ;;  %v6593_v60 = vld [vmem:[%s8165_s1 + $0x168] sm:$0xff]  ;;  %v6600_v0 = vld [vmem:[%s8165_s1 + $0x1a0] sm:$0xff] }
  0x20   : > { %633 = vmatpush.bf16.msra.mxu0 %v6550_v5  ;;  %6835 = vmatpush.bf16.msra.mxu1 %v6550_v5  ;;  %v6617_v61 = vld [vmem:[%s8165_s1 + $0x228] sm:$0xff]  ;;  %v7153_v62 = vld [vmem:[%s6976_s17 + $0x10] sm:$0xff]  ;;  %v6608_v1 = vld [vmem:[%s8165_s1 + $0x1e0] sm:$0xff] }
  0x21   : > { %6836 = vmatpush.bf16.msra.mxu2 %v6550_v5  ;;  %6837 = vmatpush.bf16.msra.mxu3 %v6550_v5  ;;  %v6592_v2 = vld [vmem:[%s8165_s1 + $0x160] sm:$0xff]  ;;  %v7175_v4 = vld [vmem:[%s6976_s17 + $0x18] sm:$0xff]  ;;  %vm7389_vm6 = vmand %vm1662_vm2, %vm1663_vm3 }
  0x22   : > { %v6616_v3 = vld [vmem:[%s8165_s1 + $0x220] sm:$0xff]  ;;  %vm7394_vm7 = vmand %vm1668_vm4, %vm1669_vm5 }
  0x23   : > { %v7178_v5 = vld [vmem:[%s6976_s17 + $0x20] sm:$0xff] }
  0x24   : > { %634 = vmatpush.bf16.msra.mxu0 %v6549_v6  ;;  %6838 = vmatpush.bf16.msra.mxu1 %v6549_v6 }
  0x25   : > { %6839 = vmatpush.bf16.msra.mxu2 %v6549_v6  ;;  %6840 = vmatpush.bf16.msra.mxu3 %v6549_v6  ;;  %v6599_v6 = vld [vmem:[%s8165_s1 + $0x198] sm:$0xff] }
  0x28   : > { %635 = vmatpush.bf16.msra.mxu0 %v6548_v7  ;;  %6841 = vmatpush.bf16.msra.mxu1 %v6548_v7 }
  0x29   : > { %6842 = vmatpush.bf16.msra.mxu2 %v6548_v7  ;;  %6843 = vmatpush.bf16.msra.mxu3 %v6548_v7  ;;  %v6607_v7 = vld [vmem:[%s8165_s1 + $0x1d8] sm:$0xff] }
  0x2b   : > { %636 = vmatmul.bf16.vlgmr.msra.gmra.mxu0 %v6985_v10  ;;  %644 = vmatmul.bf16.vlgmr.msra.gmra.mxu1 %v6988_v11 }
  0x2c   : > { %652 = vmatmul.bf16.vlgmr.msra.gmra.mxu2 %v6991_v12  ;;  %660 = vmatmul.bf16.vlgmr.msra.gmra.mxu3 %v6994_v13 }
  0x2d   : > { %710 = vmatpush.bf16.msrb.mxu2 %v6571_v8  ;;  %944 = vmatpush.bf16.msrb.mxu3 %v6579_v9  ;;  %v6591_v8 = vld [vmem:[%s8165_s1 + $0x158] sm:$0xff] }
  0x2e   : > { %669 = vmatpush.bf16.msrb.mxu1 %v6563_v14  ;;  %993 = vmatpush.bf16.msrb.mxu0 %v6587_v15  ;;  %v6615_v9 = vld [vmem:[%s8165_s1 + $0x218] sm:$0xff]  ;;  %v7197_v14 = vld [vmem:[%s6976_s17 + $0x20] sm:$0xff]  ;;  %v7200_v15 = vld [vmem:[%s6976_s17 + $0x28] sm:$0xff] }
  0x31   : > { %711 = vmatpush.bf16.msrb.mxu2 %v6570_v16  ;;  %945 = vmatpush.bf16.msrb.mxu3 %v6578_v17  ;;  %v6598_v16 = vld [vmem:[%s8165_s1 + $0x190] sm:$0xff] }
  0x32   : > { %670 = vmatpush.bf16.msrb.mxu1 %v6562_v18  ;;  %994 = vmatpush.bf16.msrb.mxu0 %v6586_v19  ;;  %v6606_v17 = vld [vmem:[%s8165_s1 + $0x1d0] sm:$0xff] }
  0x33   : > { %v6590_v18 = vld [vmem:[%s8165_s1 + $0x150] sm:$0xff] }
  0x34   : > { %v6614_v19 = vld [vmem:[%s8165_s1 + $0x210] sm:$0xff] }
  0x35   : > { %712 = vmatpush.bf16.msrb.mxu2 %v6569_v20  ;;  %946 = vmatpush.bf16.msrb.mxu3 %v6577_v21  ;;  %v7219_v20 = vld [vmem:[%s6976_s17 + $0x28] sm:$0xff]  ;;  %v7222_v21 = vld [vmem:[%s6976_s17 + $0x30] sm:$0xff] }
  0x36   : > { %671 = vmatpush.bf16.msrb.mxu1 %v6561_v22  ;;  %995 = vmatpush.bf16.msrb.mxu0 %v6585_v23  ;;  %v6597_v22 = vld [vmem:[%s8165_s1 + $0x188] sm:$0xff] }
  0x37   : > { %v6605_v23 = vld [vmem:[%s8165_s1 + $0x1c8] sm:$0xff] }
  0x39   : > { %713 = vmatpush.bf16.msrb.mxu2 %v6568_v24  ;;  %947 = vmatpush.bf16.msrb.mxu3 %v6576_v25  ;;  %v6589_v24 = vld [vmem:[%s8165_s1 + $0x148] sm:$0xff] }
  0x3a   : > { %672 = vmatpush.bf16.msrb.mxu1 %v6560_v26  ;;  %996 = vmatpush.bf16.msrb.mxu0 %v6584_v27  ;;  %v6613_v25 = vld [vmem:[%s8165_s1 + $0x208] sm:$0xff]  ;;  %v7241_v26 = vld [vmem:[%s6976_s17 + $0x30] sm:$0xff]  ;;  %v7244_v27 = vld [vmem:[%s6976_s17 + $0x38] sm:$0xff] }
  0x3b   : > { %640 = vmatmul.bf16.gmra.mxu0 %v7049_v30  ;;  %648 = vmatmul.bf16.gmra.mxu1 %v7052_v31 }
  0x3c   : > { %656 = vmatmul.bf16.gmra.mxu2 %v7055_v32  ;;  %664 = vmatmul.bf16.gmra.mxu3 %v7058_v33 }
  0x3d   : > { %714 = vmatpush.bf16.msrb.mxu2 %v6567_v28  ;;  %948 = vmatpush.bf16.msrb.mxu3 %v6575_v29  ;;  %v6596_v28 = vld [vmem:[%s8165_s1 + $0x180] sm:$0xff] }
  0x3e   : > { %673 = vmatpush.bf16.msrb.mxu1 %v6559_v34  ;;  %997 = vmatpush.bf16.msrb.mxu0 %v6583_v35  ;;  %v6604_v29 = vld [vmem:[%s8165_s1 + $0x1c0] sm:$0xff] }
  0x3f   : > { %v6588_v34 = vld [vmem:[%s8165_s1 + $0x140] sm:$0xff] }
  0x40   : > { %v6612_v35 = vld [vmem:[%s8165_s1 + $0x200] sm:$0xff] }
  0x41   : > { %715 = vmatpush.bf16.msrb.mxu2 %v6566_v36  ;;  %949 = vmatpush.bf16.msrb.mxu3 %v6574_v37 }
  0x42   : > { %674 = vmatpush.bf16.msrb.mxu1 %v6558_v38  ;;  %998 = vmatpush.bf16.msrb.mxu0 %v6582_v39  ;;  %v7263_v38 = vld [vmem:[%s6976_s17 + $0x38] sm:$0xff]  ;;  %v7266_v39 = vld [vmem:[%s6976_s17 + $0x40] sm:$0xff] }
  0x45   : > { %716 = vmatpush.bf16.msrb.mxu2 %v6565_v40  ;;  %950 = vmatpush.bf16.msrb.mxu3 %v6573_v41 }
  0x46   : > { %675 = vmatpush.bf16.msrb.mxu1 %v6557_v42  ;;  %999 = vmatpush.bf16.msrb.mxu0 %v6581_v43 }
  0x49   : > { %717 = vmatpush.bf16.msrb.mxu2 %v6564_v44  ;;  %951 = vmatpush.bf16.msrb.mxu3 %v6572_v45 }
  0x4a   : > { %676 = vmatpush.bf16.msrb.mxu1 %v6556_v48  ;;  %1000 = vmatpush.bf16.msrb.mxu0 %v6580_v49  ;;  %v7277_v48 = vld [vmem:[%s6976_s17 + $0x40] sm:$0xff]  ;;  %v7280_v49 = vld [vmem:[%s6976_s17 + $0x48] sm:$0xff] }
  0x4c   : > { %718 = vmatmul.bf16.vlgmr.msrb.gmra.mxu2 %v7128_v55  ;;  %952 = vmatmul.bf16.vlgmr.msrb.gmra.mxu3 %v6985_v10 }
  0x4d   : > { %1341 = vmatpush.bf16.msra.mxu2 %v6603_v46  ;;  %1390 = vmatpush.bf16.msra.mxu3 %v6611_v47 }
  0x4e   : > { %1042 = vmatpush.bf16.msra.mxu1 %v6595_v50  ;;  %1439 = vmatpush.bf16.msra.mxu0 %v6619_v51 }
  0x4f   : > { %677 = vmatmul.bf16.vlgmr.msrb.gmra.mxu1 %v7125_v54  ;;  %1001 = vmatmul.bf16.vlgmr.msrb.gmra.mxu0 %v7125_v54 }
  0x51   : > { %1342 = vmatpush.bf16.msra.mxu2 %v6602_v52  ;;  %1391 = vmatpush.bf16.msra.mxu3 %v6610_v53 }
  0x52   : > { %1043 = vmatpush.bf16.msra.mxu1 %v6594_v56  ;;  %1440 = vmatpush.bf16.msra.mxu0 %v6618_v57 }
  0x55   : > { %1343 = vmatpush.bf16.msra.mxu2 %v6601_v58  ;;  %1392 = vmatpush.bf16.msra.mxu3 %v6609_v59 }
  0x56   : > { %1044 = vmatpush.bf16.msra.mxu1 %v6593_v60  ;;  %1441 = vmatpush.bf16.msra.mxu0 %v6617_v61 }
  0x59   : > { %1344 = vmatpush.bf16.msra.mxu2 %v6600_v0  ;;  %1393 = vmatpush.bf16.msra.mxu3 %v6608_v1 }
  0x5a   : > { %1045 = vmatpush.bf16.msra.mxu1 %v6592_v2  ;;  %1442 = vmatpush.bf16.msra.mxu0 %v6616_v3 }
  0x5c   : > { %722 = vmatmul.bf16.gmra.mxu2 %v7156_v63  ;;  %957 = vmatmul.bf16.gmra.mxu3 %v7049_v30 }
  0x5d   : > { %1345 = vmatpush.bf16.msra.mxu2 %v6599_v6  ;;  %1394 = vmatpush.bf16.msra.mxu3 %v6607_v7 }
  0x5e   : > { %1046 = vmatpush.bf16.msra.mxu1 %v6591_v8  ;;  %1443 = vmatpush.bf16.msra.mxu0 %v6615_v9 }
  0x5f   : > { %681 = vmatmul.bf16.gmra.mxu1 %v7153_v62  ;;  %1006 = vmatmul.bf16.gmra.mxu0 %v7153_v62 }
  0x61   : > { %1346 = vmatpush.bf16.msra.mxu2 %v6598_v16  ;;  %1395 = vmatpush.bf16.msra.mxu3 %v6606_v17 }
  0x62   : > { %1047 = vmatpush.bf16.msra.mxu1 %v6590_v18  ;;  %1444 = vmatpush.bf16.msra.mxu0 %v6614_v19 }
  0x65   : > { %1347 = vmatpush.bf16.msra.mxu2 %v6597_v22  ;;  %1396 = vmatpush.bf16.msra.mxu3 %v6605_v23 }
  0x66   : > { %1048 = vmatpush.bf16.msra.mxu1 %v6589_v24  ;;  %1445 = vmatpush.bf16.msra.mxu0 %v6613_v25 }
  0x69   : > { %1348 = vmatpush.bf16.msra.mxu2 %v6596_v28  ;;  %1397 = vmatpush.bf16.msra.mxu3 %v6604_v29 }
  0x6a   : > { %1049 = vmatpush.bf16.msra.mxu1 %v6588_v34  ;;  %1446 = vmatpush.bf16.msra.mxu0 %v6612_v35 }
  0x6c   : > { %726 = vmatmul.bf16.gmra.mxu2 %v7178_v5  ;;  %962 = vmatmul.bf16.gmra.mxu3 %v6988_v11 }
  0x6f   : > { %685 = vmatmul.bf16.gmra.mxu1 %v7175_v4  ;;  %1011 = vmatmul.bf16.gmra.mxu0 %v7175_v4 }
  0x7c   : > { %730 = vmatmul.bf16.gmra.mxu2 %v7200_v15  ;;  %967 = vmatmul.bf16.gmra.mxu3 %v7052_v31 }
  0x7f   : > { %689 = vmatmul.bf16.gmra.mxu1 %v7197_v14  ;;  %1016 = vmatmul.bf16.gmra.mxu0 %v7197_v14 }
  0x8c   : > { %734 = vmatmul.bf16.gmra.mxu2 %v7222_v21  ;;  %972 = vmatmul.bf16.gmra.mxu3 %v6991_v12 }
  0x8f   : > { %693 = vmatmul.bf16.gmra.mxu1 %v7219_v20  ;;  %1021 = vmatmul.bf16.gmra.mxu0 %v7219_v20 }
  0x9c   : > { %738 = vmatmul.bf16.gmra.mxu2 %v7244_v27  ;;  %977 = vmatmul.bf16.gmra.mxu3 %v7055_v32 }
  0x9f   : > { %697 = vmatmul.bf16.gmra.mxu1 %v7241_v26  ;;  %1026 = vmatmul.bf16.gmra.mxu0 %v7241_v26 }
  0xa8   : > { %v637_v36 = vpop.f32.mrf.mxu0  ;;  %v645_v37 = vpop.f32.mrf.mxu1 }
  0xac   : > { %742 = vmatmul.bf16.gmra.mxu2 %v7266_v39  ;;  %982 = vmatmul.bf16.gmra.mxu3 %v6994_v13 }
  0xaf   : > { %701 = vmatmul.bf16.gmra.mxu1 %v7263_v38  ;;  %1031 = vmatmul.bf16.gmra.mxu0 %v7263_v38  ;;  %v7272_v40 = vpop.f32.mrf.mxu2  ;;  %v7274_v41 = vpop.f32.mrf.mxu3 }
  0xb0   : > { %v639_v42 = vpop.f32.mrf.mxu0  ;;  %v647_v43 = vpop.f32.mrf.mxu1 }
  0xb7   : > { %v655_v44 = vpop.f32.mrf.mxu2  ;;  %v663_v45 = vpop.f32.mrf.mxu3 }
  0xb8   : > { %v641_v46 = vpop.f32.mrf.mxu0  ;;  %v649_v47 = vpop.f32.mrf.mxu1 }
  0xbc   : > { %746 = vmatmul.bf16.gmra.mxu2 %v7280_v49  ;;  %987 = vmatmul.bf16.gmra.mxu3 %v7058_v33 }
  0xbf   : > { %705 = vmatmul.bf16.gmra.mxu1 %v7277_v48  ;;  %1036 = vmatmul.bf16.gmra.mxu0 %v7277_v48  ;;  %v7286_v50 = vpop.f32.mrf.mxu2  ;;  %v7288_v51 = vpop.f32.mrf.mxu3 }
  0xc0   : > { %v643_v52 = vpop.f32.mrf.mxu0  ;;  %v651_v53 = vpop.f32.mrf.mxu1 }
  0xc7   : > { %v659_v56 = vpop.f32.mrf.mxu2  ;;  %v667_v57 = vpop.f32.mrf.mxu3 }
  0xcc   : > { %v678_v58 = vpop.f32.mrf.mxu1  ;;  %v1002_v60 = vpop.f32.mrf.mxu0  ;;  %1349 = vmatmul.bf16.vlgmr.msra.gmra.mxu2 %v6985_v10  ;;  %1398 = vmatmul.bf16.vlgmr.msra.gmra.mxu3 %v7125_v54 }
  0xcd   : > { %v679_v59 = vadd.f32 %v678_v58, %v637_v36 }
  0xcf   : > { %1050 = vmatmul.bf16.vlgmr.msra.gmra.mxu1 %v7128_v55  ;;  %1447 = vmatmul.bf16.vlgmr.msra.gmra.mxu0 %v7128_v55  ;;  %v719_v61 = vpop.f32.mrf.mxu2  ;;  %v953_v1 = vpop.f32.mrf.mxu3 }
  0xd0   : > { %v7294_v0 = vadd.f32 %v719_v61, %v679_v59  ;;  %v7296_v2 = vadd.f32 %v1002_v60, %v953_v1 }
  0xd4   : > { %v680_v3 = vpop.f32.mrf.mxu1  ;;  %v1004_v6 = vpop.f32.mrf.mxu0 }
  0xd7   : > { %v721_v7 = vpop.f32.mrf.mxu2  ;;  %v955_v8 = vpop.f32.mrf.mxu3 }
  0xd8   : > { %v7298_v9 = vadd.f32 %v1004_v6, %v955_v8 }
  0xdc   : > { %v682_v16 = vpop.f32.mrf.mxu1  ;;  %v1007_v18 = vpop.f32.mrf.mxu0  ;;  %1354 = vmatmul.bf16.gmra.mxu2 %v7049_v30  ;;  %1403 = vmatmul.bf16.gmra.mxu3 %v7153_v62 }
  0xdd   : > { %v683_v17 = vadd.f32 %v682_v16, %v641_v46 }
  0xdf   : > { %1055 = vmatmul.bf16.gmra.mxu1 %v7156_v63  ;;  %1452 = vmatmul.bf16.gmra.mxu0 %v7156_v63  ;;  %v723_v10 = vpop.f32.mrf.mxu2  ;;  %v958_v55 = vpop.f32.mrf.mxu3 }
  0xe0   : > { %v7304_v54 = vadd.f32 %v723_v10, %v683_v17  ;;  %v7306_v19 = vadd.f32 %v1007_v18, %v958_v55 }
  0xe4   : > { %v684_v22 = vpop.f32.mrf.mxu1  ;;  %v1009_v23 = vpop.f32.mrf.mxu0 }
  0xe7   : > { %v725_v24 = vpop.f32.mrf.mxu2  ;;  %v960_v25 = vpop.f32.mrf.mxu3 }
  0xe8   : > { %v7308_v28 = vadd.f32 %v1009_v23, %v960_v25 }
  0xec   : > { %v686_v29 = vpop.f32.mrf.mxu1  ;;  %v1012_v35 = vpop.f32.mrf.mxu0  ;;  %1359 = vmatmul.bf16.gmra.mxu2 %v6988_v11  ;;  %1408 = vmatmul.bf16.gmra.mxu3 %v7175_v4 }
  0xed   : > { %v687_v34 = vadd.f32 %v686_v29, %v645_v37 }
  0xef   : > { %1060 = vmatmul.bf16.gmra.mxu1 %v7178_v5  ;;  %1457 = vmatmul.bf16.gmra.mxu0 %v7178_v5  ;;  %v727_v30 = vpop.f32.mrf.mxu2  ;;  %v963_v63 = vpop.f32.mrf.mxu3 }
  0xf0   : > { %v7314_v62 = vadd.f32 %v727_v30, %v687_v34  ;;  %v7316_v36 = vadd.f32 %v1012_v35, %v963_v63 }
  0xf4   : > { %v688_v42 = vpop.f32.mrf.mxu1  ;;  %v1014_v43 = vpop.f32.mrf.mxu0 }
  0xf7   : > { %v729_v44 = vpop.f32.mrf.mxu2  ;;  %v965_v45 = vpop.f32.mrf.mxu3 }
  0xf8   : > { %v7318_v37 = vadd.f32 %v1014_v43, %v965_v45 }
  0xfc   : > { %v690_v46 = vpop.f32.mrf.mxu1  ;;  %v1017_v53 = vpop.f32.mrf.mxu0  ;;  %1364 = vmatmul.bf16.gmra.mxu2 %v7052_v31  ;;  %1413 = vmatmul.bf16.gmra.mxu3 %v7197_v14 }
  0xfd   : > { %v691_v52 = vadd.f32 %v690_v46, %v649_v47  ;;  %v6903_v46 = vmov 0  }
  0xfe   : > { %224 = vst [vmem:[#allocation2 + $0x8] sm:$0xf] %v6903_v46 }
  0xff   : > { %1065 = vmatmul.bf16.gmra.mxu1 %v7200_v15  ;;  %1462 = vmatmul.bf16.gmra.mxu0 %v7200_v15  ;;  %v731_v11 = vpop.f32.mrf.mxu2  ;;  %v968_v5 = vpop.f32.mrf.mxu3  ;;  %225 = vst [vmem:[#allocation2 + $0xc] sm:$0xf] %v6903_v46 }
 0x100   : > { %v7324_v4 = vadd.f32 %v731_v11, %v691_v52  ;;  %v7326_v56 = vadd.f32 %v1017_v53, %v968_v5  ;;  %222 = vst [vmem:[#allocation2] sm:$0xf] %v6903_v46 }
 0x101   : > { %223 = vst [vmem:[#allocation2 + $0x4] sm:$0xf] %v6903_v46 }
 0x102   : > { %226 = vst [vmem:[#allocation2 + $0x10] sm:$0xf] %v6903_v46 }
 0x103   : > { %227 = vst [vmem:[#allocation2 + $0x14] sm:$0xf] %v6903_v46 }
 0x104   : > { %v692_v57 = vpop.f32.mrf.mxu1  ;;  %v1019_v58 = vpop.f32.mrf.mxu0  ;;  %228 = vst [vmem:[#allocation2 + $0x18] sm:$0xf] %v6903_v46 }
 0x105   : > { %229 = vst [vmem:[#allocation2 + $0x1c] sm:$0xf] %v6903_v46 }
 0x106   : > { %230 = vst [vmem:[#allocation2 + $0x20] sm:$0xf] %v6903_v46 }
 0x107   : > { %v733_v59 = vpop.f32.mrf.mxu2  ;;  %v970_v60 = vpop.f32.mrf.mxu3  ;;  %231 = vst [vmem:[#allocation2 + $0x24] sm:$0xf] %v6903_v46 }
 0x108   : > { %v7328_v47 = vadd.f32 %v1019_v58, %v970_v60  ;;  %232 = vst [vmem:[#allocation2 + $0x28] sm:$0xf] %v6903_v46 }
 0x109   : > { %233 = vst [vmem:[#allocation2 + $0x2c] sm:$0xf] %v6903_v46 }
 0x10a   : > { %234 = vst [vmem:[#allocation2 + $0x30] sm:$0xf] %v6903_v46 }
 0x10b   : > { %235 = vst [vmem:[#allocation2 + $0x34] sm:$0xf] %v6903_v46 }
 0x10c   : > { %v694_v61 = vpop.f32.mrf.mxu1  ;;  %v1022_v1 = vpop.f32.mrf.mxu0  ;;  %1369 = vmatmul.bf16.gmra.mxu2 %v6991_v12  ;;  %1418 = vmatmul.bf16.gmra.mxu3 %v7219_v20  ;;  %236 = vst [vmem:[#allocation2 + $0x38] sm:$0xf] %v6903_v46 }
 0x10d   : > { %v695_v31 = vadd.f32 %v694_v61, %v7272_v40  ;;  %237 = vst [vmem:[#allocation2 + $0x3c] sm:$0xf] %v6903_v46 }
 0x10e   : > { %238 = vst [vmem:[#allocation2 + $0x40] sm:$0xf] %v6903_v46 }
 0x10f   : > { %1070 = vmatmul.bf16.gmra.mxu1 %v7222_v21  ;;  %1467 = vmatmul.bf16.gmra.mxu0 %v7222_v21  ;;  %v735_v14 = vpop.f32.mrf.mxu2  ;;  %v973_v3 = vpop.f32.mrf.mxu3  ;;  %239 = vst [vmem:[#allocation2 + $0x44] sm:$0xf] %v6903_v46 }
 0x110   : > { %v7335_v15 = vadd.f32 %v735_v14, %v695_v31  ;;  %v7337_v6 = vadd.f32 %v1022_v1, %v973_v3  ;;  %240 = vst [vmem:[#allocation2 + $0x48] sm:$0xf] %v6903_v46 }
 0x111   : > { %241 = vst [vmem:[#allocation2 + $0x4c] sm:$0xf] %v6903_v46 }
 0x114   : > { %v696_v7 = vpop.f32.mrf.mxu1  ;;  %v1024_v8 = vpop.f32.mrf.mxu0 }
 0x117   : > { %v737_v16 = vpop.f32.mrf.mxu2  ;;  %v975_v17 = vpop.f32.mrf.mxu3 }
 0x118   : > { %v7339_v18 = vadd.f32 %v1024_v8, %v975_v17 }
 0x11c   : > { %v698_v10 = vpop.f32.mrf.mxu1  ;;  %v1027_v12 = vpop.f32.mrf.mxu0  ;;  %1374 = vmatmul.bf16.gmra.mxu2 %v7055_v32  ;;  %1423 = vmatmul.bf16.gmra.mxu3 %v7241_v26 }
 0x11d   : > { %v699_v20 = vadd.f32 %v698_v10, %v7286_v50 }
 0x11f   : > { %1075 = vmatmul.bf16.gmra.mxu1 %v7244_v27  ;;  %1472 = vmatmul.bf16.gmra.mxu0 %v7244_v27  ;;  %v739_v21 = vpop.f32.mrf.mxu2  ;;  %v978_v55 = vpop.f32.mrf.mxu3 }
 0x120   : > { %v7346_v40 = vadd.f32 %v739_v21, %v699_v20  ;;  %v7348_v22 = vadd.f32 %v1027_v12, %v978_v55 }
 0x124   : > { %v700_v23 = vpop.f32.mrf.mxu1  ;;  %v1029_v24 = vpop.f32.mrf.mxu0 }
 0x127   : > { %v741_v25 = vpop.f32.mrf.mxu2  ;;  %v980_v29 = vpop.f32.mrf.mxu3 }
 0x128   : > { %v7350_v34 = vadd.f32 %v1029_v24, %v980_v29 }
 0x12c   : > { %v702_v35 = vpop.f32.mrf.mxu1  ;;  %v1032_v32 = vpop.f32.mrf.mxu0  ;;  %1379 = vmatmul.bf16.gmra.mxu2 %v6994_v13  ;;  %1428 = vmatmul.bf16.gmra.mxu3 %v7263_v38 }
 0x12d   : > { %v703_v26 = vadd.f32 %v702_v35, %v7274_v41 }
 0x12f   : > { %1080 = vmatmul.bf16.gmra.mxu1 %v7266_v39  ;;  %1477 = vmatmul.bf16.gmra.mxu0 %v7266_v39  ;;  %v743_v27 = vpop.f32.mrf.mxu2  ;;  %v983_v30 = vpop.f32.mrf.mxu3 }
 0x130   : > { %v7357_v50 = vadd.f32 %v743_v27, %v703_v26  ;;  %v7359_v63 = vadd.f32 %v1032_v32, %v983_v30 }
 0x134   : > { %v704_v42 = vpop.f32.mrf.mxu1  ;;  %v1034_v43 = vpop.f32.mrf.mxu0 }
 0x137   : > { %v745_v44 = vpop.f32.mrf.mxu2  ;;  %v985_v45 = vpop.f32.mrf.mxu3 }
 0x138   : > { %v7361_v52 = vadd.f32 %v1034_v43, %v985_v45 }
 0x13c   : > { %v706_v13 = vpop.f32.mrf.mxu1  ;;  %v1037_v38 = vpop.f32.mrf.mxu0  ;;  %1384 = vmatmul.bf16.gmra.mxu2 %v7058_v33  ;;  %1433 = vmatmul.bf16.gmra.mxu3 %v7277_v48 }
 0x13d   : > { %v707_v39 = vadd.f32 %v706_v13, %v7288_v51 }
 0x13f   : > { %1085 = vmatmul.bf16.gmra.mxu1 %v7280_v49  ;;  %1482 = vmatmul.bf16.gmra.mxu0 %v7280_v49  ;;  %v747_v41 = vpop.f32.mrf.mxu2  ;;  %v988_v11 = vpop.f32.mrf.mxu3 }
 0x140   : > { %v7368_v53 = vadd.f32 %v747_v41, %v707_v39  ;;  %v7370_v5 = vadd.f32 %v1037_v38, %v988_v11 }
 0x144   : > { %v708_v57 = vpop.f32.mrf.mxu1  ;;  %v1039_v33 = vpop.f32.mrf.mxu0 }
 0x147   : > { %v749_v48 = vpop.f32.mrf.mxu2  ;;  %v990_v49 = vpop.f32.mrf.mxu3 }
 0x148   : > { %v7372_v51 = vadd.f32 %v1039_v33, %v990_v49 }
 0x14c   : > { %v1051_v58 = vpop.f32.mrf.mxu1  ;;  %v1448_v59 = vpop.f32.mrf.mxu0 }
 0x14d   : > { %v1052_v61 = vadd.f32 %v1051_v58, %v7296_v2 }
 0x14f   : > { %v1350_v60 = vpop.f32.mrf.mxu2  ;;  %v1399_v1 = vpop.f32.mrf.mxu3  ;;  %v1108_v7 = vrot.slane %v1052_v61, 1 }
 0x150   : > { %v1400_v16 = vadd.f32 %v1399_v1, %v1350_v60  ;;  %v1665_v1 = vld [vmem:[#allocation2 + $0x8] sm:$0xf] }
 0x152   : > { %v1449_v21 = vadd.f32 %v1448_v59, %v1400_v16 }
 0x154   : > { %v1053_v31 = vpop.f32.mrf.mxu1  ;;  %v1450_v3 = vpop.f32.mrf.mxu0  ;;  %v1505_v25 = vrot.slane %v1449_v21, 2 }
 0x155   : > { %v1054_v14 = vadd.f32 %v1053_v31, %v7298_v9  ;;  %v7381_v9 = vld [vmem:[%s8166_s2] ss:$0 sm:$0xff] }
 0x157   : > { %v1109_v8 = vrot.slane %v1054_v14, 1  ;;  %v1352_v12 = vpop.f32.mrf.mxu2  ;;  %v1401_v20 = vpop.f32.mrf.mxu3 }
 0x158   : > { %v1402_v55 = vadd.f32 %v1401_v20, %v1352_v12 }
 0x159   : > { %v1110_v17 = vsel %vm1107_vm0, %v1108_v7, %v1109_v8 }
 0x15a   : > { %v1140_v10 = vadd.f32 %v1110_v17, %v7294_v0  ;;  %v1451_v2 = vadd.f32 %v1450_v3, %v1402_v55 }
 0x15c   : > { %v1056_v23 = vpop.f32.mrf.mxu1  ;;  %v1453_v24 = vpop.f32.mrf.mxu0  ;;  %v1506_v29 = vrot.slane %v1451_v2, 2 }
 0x15d   : > { %v1057_v0 = vadd.f32 %v1056_v23, %v7306_v19 }
 0x15e   : > { %v1507_v35 = vsel %vm1504_vm1, %v1505_v25, %v1506_v29 }
 0x15f   : > { %v1355_v32 = vpop.f32.mrf.mxu2  ;;  %v1537_v26 = vadd.f32 %v1507_v35, %v1140_v10  ;;  %v1404_v27 = vpop.f32.mrf.mxu3  ;;  %v1111_v46 = vrot.slane %v1057_v0, 1 }
 0x160   : > { %v1405_v38 = vadd.f32 %v1404_v27, %v1355_v32 }
 0x161   : > { %v1549_v42 = vadd.f32 %v7381_v9, %v1537_v26 }
 0x162   : > { %v1454_v48 = vadd.f32 %v1453_v24, %v1405_v38 }
 0x163   : > { %v1557_v45 = vmax.f32 %v1549_v42, 0.0 }
 0x164   : > { %v1058_v30 = vpop.f32.mrf.mxu1  ;;  %v1455_v44 = vpop.f32.mrf.mxu0  ;;  %v1508_v8 = vrot.slane %v1454_v48, 2 }
 0x165   : > { %v1059_v43 = vadd.f32 %v1058_v30, %v7308_v28  ;;  %1565 = vst [vmem:[#allocation3 + $0x30] sm:$0xff] %v1557_v45  ;;  %v1573_v39 = vpack.c.bf16 %v1557_v45, %v1557_v45 }
 0x167   : > { %v1112_v13 = vrot.slane %v1059_v43, 1  ;;  %v1357_v19 = vpop.f32.mrf.mxu2  ;;  %v1582_v57 = vshrl.u32 %v1573_v39, 16  ;;  %v1406_v33 = vpop.f32.mrf.mxu3  ;;  %v1585_v59 = vshll.u32 %v1573_v39, 16 }
 0x168   : > { %v1407_v28 = vadd.f32 %v1406_v33, %v1357_v19 }
 0x169   : > { %v1113_v41 = vsel %vm1107_vm0, %v1111_v46, %v1112_v13  ;;  %v1584_v58 = vrot.slane %v1582_v57, 7 }
 0x16a   : > { %v1141_v11 = vadd.f32 %v1113_v41, %v7304_v54  ;;  %v1671_v54 = vld [vmem:[#allocation2 + $0xc] sm:$0x1]  ;;  %v1456_v14 = vadd.f32 %v1455_v44, %v1407_v28  ;;  %v1674_v41 = vld [vmem:[#allocation2 + $0x10] sm:$0xf] }
 0x16b   : > { %v1587_v3 = vor.u32 %v1585_v59, %v1584_v58  ;;  %v1588_v7 = vrot.slane %v1584_v58, 4 }
 0x16c   : > { %v1061_v49 = vpop.f32.mrf.mxu1  ;;  %v1458_v61 = vpop.f32.mrf.mxu0  ;;  %v1509_v16 = vrot.slane %v1456_v14, 2 }
 0x16d   : > { %v1666_v17 = vsel %vm7389_vm6, %v1587_v3, %v1665_v1  ;;  %v1672_v10 = vsel %vm7394_vm7, %v1588_v7, %v1671_v54  ;;  %v1062_v55 = vadd.f32 %v1061_v49, %v7316_v36 }
 0x16e   : > { %1667 = vst [vmem:[#allocation2 + $0x8] sm:$0xf] %v1666_v17  ;;  %v1510_v12 = vsel %vm1504_vm1, %v1508_v8, %v1509_v16 }
 0x16f   : > { %v1360_v20 = vpop.f32.mrf.mxu2  ;;  %1673 = vst [vmem:[#allocation2 + $0xc] sm:$0x1] %v1672_v10  ;;  %v1538_v21 = vadd.f32 %v1510_v12, %v1141_v11  ;;  %v1409_v23 = vpop.f32.mrf.mxu3  ;;  %v1114_v32 = vrot.slane %v1062_v55, 1  ;;  %v1677_v11 = vld [vmem:[#allocation2 + $0x14] sm:$0x1] }
 0x170   : > { %v1410_v0 = vadd.f32 %v1409_v23, %v1360_v20 }
 0x171   : > { %v1550_v2 = vadd.f32 %v7381_v9, %v1538_v21 }
 0x172   : > { %v1459_v45 = vadd.f32 %v1458_v61, %v1410_v0  ;;  %v1683_v0 = vld [vmem:[#allocation2 + $0x1c] sm:$0x1] }
 0x173   : > { %v1558_v35 = vmax.f32 %v1550_v2, 0.0 }
 0x174   : > { %v1063_v24 = vpop.f32.mrf.mxu1  ;;  %v1460_v29 = vpop.f32.mrf.mxu0  ;;  %v1511_v48 = vrot.slane %v1459_v45, 2 }
 0x175   : > { %v1064_v25 = vadd.f32 %v1063_v24, %v7318_v37  ;;  %1566 = vst [vmem:[#allocation3] sm:$0xff] %v1558_v35  ;;  %v1574_v27 = vpack.c.bf16 %v1558_v35, %v1558_v35 }
 0x177   : > { %v1115_v26 = vrot.slane %v1064_v25, 1  ;;  %v1362_v43 = vpop.f32.mrf.mxu2  ;;  %v1590_v44 = vshrl.u32 %v1574_v27, 16  ;;  %v1411_v36 = vpop.f32.mrf.mxu3  ;;  %v1593_v39 = vshll.u32 %v1574_v27, 16 }
 0x178   : > { %v1412_v46 = vadd.f32 %v1411_v36, %v1362_v43 }
 0x179   : > { %v1116_v30 = vsel %vm1107_vm0, %v1114_v32, %v1115_v26  ;;  %v1592_v38 = vrot.slane %v1590_v44, 7  ;;  %v1680_v26 = vld [vmem:[#allocation2 + $0x18] sm:$0xf] }
 0x17a   : > { %v1142_v42 = vadd.f32 %v1116_v30, %v7314_v62  ;;  %v1461_v19 = vadd.f32 %v1460_v29, %v1412_v46 }
 0x17b   : > { %v1595_v57 = vor.u32 %v1593_v39, %v1592_v38  ;;  %v1596_v33 = vrot.slane %v1592_v38, 4 }
 0x17c   : > { %v1066_v13 = vpop.f32.mrf.mxu1  ;;  %v1463_v37 = vpop.f32.mrf.mxu0  ;;  %v1512_v28 = vrot.slane %v1461_v19, 2 }
 0x17d   : > { %v1675_v49 = vsel %vm7389_vm6, %v1595_v57, %v1674_v41  ;;  %v1678_v62 = vsel %vm7394_vm7, %v1596_v33, %v1677_v11  ;;  %v1067_v1 = vadd.f32 %v1066_v13, %v7326_v56 }
 0x17e   : > { %1676 = vst [vmem:[#allocation2 + $0x10] sm:$0xf] %v1675_v49  ;;  %v1513_v58 = vsel %vm1504_vm1, %v1511_v48, %v1512_v28 }
 0x17f   : > { %v1365_v59 = vpop.f32.mrf.mxu2  ;;  %1679 = vst [vmem:[#allocation2 + $0x14] sm:$0x1] %v1678_v62  ;;  %v1539_v61 = vadd.f32 %v1513_v58, %v1142_v42  ;;  %v1414_v54 = vpop.f32.mrf.mxu3  ;;  %v1117_v17 = vrot.slane %v1067_v1, 1 }
 0x180   : > { %v1415_v12 = vadd.f32 %v1414_v54, %v1365_v59 }
 0x181   : > { %v1551_v3 = vadd.f32 %v7381_v9, %v1539_v61 }
 0x182   : > { %v1464_v2 = vadd.f32 %v1463_v37, %v1415_v12 }
 0x183   : > { %v1559_v16 = vmax.f32 %v1551_v3, 0.0 }
 0x184   : > { %v1068_v14 = vpop.f32.mrf.mxu1  ;;  %v1465_v8 = vpop.f32.mrf.mxu0  ;;  %v1514_v43 = vrot.slane %v1464_v2, 2 }
 0x185   : > { %v1069_v7 = vadd.f32 %v1068_v14, %v7328_v47  ;;  %1567 = vst [vmem:[#allocation3 + $0x18] sm:$0xff] %v1559_v16  ;;  %v1575_v20 = vpack.c.bf16 %v1559_v16, %v1559_v16  ;;  %v1689_v16 = vld [vmem:[#allocation2 + $0x24] sm:$0x1] }
 0x187   : > { %v1118_v10 = vrot.slane %v1069_v7, 1  ;;  %v1367_v23 = vpop.f32.mrf.mxu2  ;;  %v1598_v24 = vshrl.u32 %v1575_v20, 16  ;;  %v1416_v56 = vpop.f32.mrf.mxu3  ;;  %v1601_v32 = vshll.u32 %v1575_v20, 16 }
 0x188   : > { %v1417_v25 = vadd.f32 %v1416_v56, %v1367_v23 }
 0x189   : > { %v1119_v21 = vsel %vm1107_vm0, %v1117_v17, %v1118_v10  ;;  %v1600_v35 = vrot.slane %v1598_v24, 7 }
 0x18a   : > { %v1143_v55 = vadd.f32 %v1119_v21, %v7324_v4  ;;  %v1466_v27 = vadd.f32 %v1465_v8, %v1417_v25  ;;  %v1686_v8 = vld [vmem:[#allocation2 + $0x20] sm:$0xf] }
 0x18b   : > { %v1603_v30 = vor.u32 %v1601_v32, %v1600_v35  ;;  %v1604_v42 = vrot.slane %v1600_v35, 4 }
 0x18c   : > { %v1071_v29 = vpop.f32.mrf.mxu1  ;;  %v1468_v47 = vpop.f32.mrf.mxu0  ;;  %v1515_v44 = vrot.slane %v1466_v27, 2 }
 0x18d   : > { %v1681_v36 = vsel %vm7389_vm6, %v1603_v30, %v1680_v26  ;;  %v1684_v4 = vsel %vm7394_vm7, %v1604_v42, %v1683_v0  ;;  %v1072_v38 = vadd.f32 %v1071_v29, %v7337_v6 }
 0x18e   : > { %1682 = vst [vmem:[#allocation2 + $0x18] sm:$0xf] %v1681_v36  ;;  %v1516_v45 = vsel %vm1504_vm1, %v1514_v43, %v1515_v44 }
 0x18f   : > { %v1370_v46 = vpop.f32.mrf.mxu2  ;;  %1685 = vst [vmem:[#allocation2 + $0x1c] sm:$0x1] %v1684_v4  ;;  %v1540_v13 = vadd.f32 %v1516_v45, %v1143_v55  ;;  %v1419_v39 = vpop.f32.mrf.mxu3  ;;  %v1120_v33 = vrot.slane %v1072_v38, 1 }
 0x190   : > { %v1420_v28 = vadd.f32 %v1419_v39, %v1370_v46 }
 0x191   : > { %v1552_v41 = vadd.f32 %v7381_v9, %v1540_v13 }
 0x192   : > { %v1469_v1 = vadd.f32 %v1468_v47, %v1420_v28 }
 0x193   : > { %v1560_v57 = vmax.f32 %v1552_v41, 0.0 }
 0x194   : > { %v1073_v37 = vpop.f32.mrf.mxu1  ;;  %v1470_v19 = vpop.f32.mrf.mxu0  ;;  %v1517_v20 = vrot.slane %v1469_v1, 2 }
 0x195   : > { %v1074_v11 = vadd.f32 %v1073_v37, %v7339_v18  ;;  %1568 = vst [vmem:[#allocation3 + $0x10] sm:$0xff] %v1560_v57  ;;  %v1576_v49 = vpack.c.bf16 %v1560_v57, %v1560_v57  ;;  %v1695_v37 = vld [vmem:[#allocation2 + $0x2c] sm:$0x1] }
 0x197   : > { %v1121_v48 = vrot.slane %v1074_v11, 1  ;;  %v1372_v59 = vpop.f32.mrf.mxu2  ;;  %v1606_v61 = vshrl.u32 %v1576_v49, 16  ;;  %v1421_v6 = vpop.f32.mrf.mxu3  ;;  %v1609_v7 = vshll.u32 %v1576_v49, 16 }
 0x198   : > { %v1422_v54 = vadd.f32 %v1421_v6, %v1372_v59 }
 0x199   : > { %v1122_v62 = vsel %vm1107_vm0, %v1120_v33, %v1121_v48  ;;  %v1608_v3 = vrot.slane %v1606_v61, 7 }
 0x19a   : > { %v1144_v58 = vadd.f32 %v1122_v62, %v7335_v15  ;;  %v1471_v17 = vadd.f32 %v1470_v19, %v1422_v54 }
 0x19b   : > { %v1611_v10 = vor.u32 %v1609_v7, %v1608_v3  ;;  %v1612_v12 = vrot.slane %v1608_v3, 4 }
 0x19c   : > { %v1076_v14 = vpop.f32.mrf.mxu1  ;;  %v1473_v18 = vpop.f32.mrf.mxu0  ;;  %v1518_v21 = vrot.slane %v1471_v17, 2 }
 0x19d   : > { %v1687_v55 = vsel %vm7389_vm6, %v1611_v10, %v1686_v8  ;;  %v1690_v15 = vsel %vm7394_vm7, %v1612_v12, %v1689_v16  ;;  %v1077_v2 = vadd.f32 %v1076_v14, %v7348_v22 }
 0x19e   : > { %1688 = vst [vmem:[#allocation2 + $0x20] sm:$0xf] %v1687_v55  ;;  %v1519_v23 = vsel %vm1504_vm1, %v1517_v20, %v1518_v21 }
 0x19f   : > { %v1375_v24 = vpop.f32.mrf.mxu2  ;;  %1691 = vst [vmem:[#allocation2 + $0x24] sm:$0x1] %v1690_v15  ;;  %v1541_v56 = vadd.f32 %v1519_v23, %v1144_v58  ;;  %v1424_v25 = vpop.f32.mrf.mxu3  ;;  %v1123_v0 = vrot.slane %v1077_v2, 1 }
 0x1a0   : > { %v1425_v30 = vadd.f32 %v1424_v25, %v1375_v24 }
 0x1a1   : > { %v1553_v35 = vadd.f32 %v7381_v9, %v1541_v56  ;;  %v1701_v56 = vld [vmem:[#allocation2 + $0x34] sm:$0x1] }
 0x1a2   : > { %v1474_v45 = vadd.f32 %v1473_v18, %v1425_v30 }
 0x1a3   : > { %v1561_v26 = vmax.f32 %v1553_v35, 0.0 }
 0x1a4   : > { %v1078_v29 = vpop.f32.mrf.mxu1  ;;  %v1475_v47 = vpop.f32.mrf.mxu0  ;;  %v1520_v33 = vrot.slane %v1474_v45, 2 }
 0x1a5   : > { %v1079_v32 = vadd.f32 %v1078_v29, %v7350_v34  ;;  %1569 = vst [vmem:[#allocation3 + $0x8] sm:$0xff] %v1561_v26  ;;  %v1577_v42 = vpack.c.bf16 %v1561_v26, %v1561_v26  ;;  %v1692_v34 = vld [vmem:[#allocation2 + $0x28] sm:$0xf] }
 0x1a7   : > { %v1124_v27 = vrot.slane %v1079_v32, 1  ;;  %v1377_v36 = vpop.f32.mrf.mxu2  ;;  %v1614_v4 = vshrl.u32 %v1577_v42, 16  ;;  %v1426_v22 = vpop.f32.mrf.mxu3  ;;  %v1617_v39 = vshll.u32 %v1577_v42, 16 }
 0x1a8   : > { %v1427_v46 = vadd.f32 %v1426_v22, %v1377_v36 }
 0x1a9   : > { %v1125_v43 = vsel %vm1107_vm0, %v1123_v0, %v1124_v27  ;;  %v1616_v38 = vrot.slane %v1614_v4, 7 }
 0x1aa   : > { %v1145_v44 = vadd.f32 %v1125_v43, %v7346_v40  ;;  %v1476_v41 = vadd.f32 %v1475_v47, %v1427_v46 }
 0x1ab   : > { %v1619_v11 = vor.u32 %v1617_v39, %v1616_v38  ;;  %v1620_v19 = vrot.slane %v1616_v38, 4 }
 0x1ac   : > { %v1081_v13 = vpop.f32.mrf.mxu1  ;;  %v1478_v57 = vpop.f32.mrf.mxu0  ;;  %v1521_v48 = vrot.slane %v1476_v41, 2 }
 0x1ad   : > { %v1693_v28 = vsel %vm7389_vm6, %v1619_v11, %v1692_v34  ;;  %v1696_v40 = vsel %vm7394_vm7, %v1620_v19, %v1695_v37  ;;  %v1082_v59 = vadd.f32 %v1081_v13, %v7359_v63 }
 0x1ae   : > { %1694 = vst [vmem:[#allocation2 + $0x28] sm:$0xf] %v1693_v28  ;;  %v1522_v49 = vsel %vm1504_vm1, %v1520_v33, %v1521_v48  ;;  %v1704_v28 = vld [vmem:[#allocation2 + $0x38] sm:$0xf] }
 0x1af   : > { %v1380_v62 = vpop.f32.mrf.mxu2  ;;  %1697 = vst [vmem:[#allocation2 + $0x2c] sm:$0x1] %v1696_v40  ;;  %v1542_v58 = vadd.f32 %v1522_v49, %v1145_v44  ;;  %v1429_v61 = vpop.f32.mrf.mxu3  ;;  %v1126_v3 = vrot.slane %v1082_v59, 1 }
 0x1b0   : > { %v1430_v18 = vadd.f32 %v1429_v61, %v1380_v62 }
 0x1b1   : > { %v1554_v1 = vadd.f32 %v7381_v9, %v1542_v58 }
 0x1b2   : > { %v1479_v21 = vadd.f32 %v1478_v57, %v1430_v18 }
 0x1b3   : > { %v1562_v14 = vmax.f32 %v1554_v1, 0.0 }
 0x1b4   : > { %v1083_v6 = vpop.f32.mrf.mxu1  ;;  %v1480_v17 = vpop.f32.mrf.mxu0  ;;  %v1523_v35 = vrot.slane %v1479_v21, 2 }
 0x1b5   : > { %v1084_v54 = vadd.f32 %v1083_v6, %v7361_v52  ;;  %1570 = vst [vmem:[#allocation3 + $0x20] sm:$0xff] %v1562_v14  ;;  %v1578_v8 = vpack.c.bf16 %v1562_v14, %v1562_v14  ;;  %v1698_v52 = vld [vmem:[#allocation2 + $0x30] sm:$0xf] }
 0x1b7   : > { %v1127_v7 = vrot.slane %v1084_v54, 1  ;;  %v1382_v12 = vpop.f32.mrf.mxu2  ;;  %v1622_v20 = vshrl.u32 %v1578_v8, 16  ;;  %v1431_v63 = vpop.f32.mrf.mxu3  ;;  %v1625_v24 = vshll.u32 %v1578_v8, 16 }
 0x1b8   : > { %v1432_v55 = vadd.f32 %v1431_v63, %v1382_v12 }
 0x1b9   : > { %v1128_v16 = vsel %vm1107_vm0, %v1126_v3, %v1127_v7  ;;  %v1624_v23 = vrot.slane %v1622_v20, 7 }
 0x1ba   : > { %v1146_v10 = vadd.f32 %v1128_v16, %v7357_v50  ;;  %v1481_v2 = vadd.f32 %v1480_v17, %v1432_v55  ;;  %v1710_v16 = vld [vmem:[#allocation2 + $0x40] sm:$0xf]  ;;  %v1713_v17 = vld [vmem:[#allocation2 + $0x44] sm:$0x1] }
 0x1bb   : > { %v1627_v25 = vor.u32 %v1625_v24, %v1624_v23  ;;  %v1628_v29 = vrot.slane %v1624_v23, 4 }
 0x1bc   : > { %v1086_v15 = vpop.f32.mrf.mxu1  ;;  %v1524_v32 = vrot.slane %v1481_v2, 2  ;;  %v1483_v42 = vpop.f32.mrf.mxu0 }
 0x1bd   : > { %v1699_v47 = vsel %vm7389_vm6, %v1627_v25, %v1698_v52  ;;  %v1702_v50 = vsel %vm7394_vm7, %v1628_v29, %v1701_v56  ;;  %v1087_v30 = vadd.f32 %v1086_v15, %v7370_v5 }
 0x1be   : > { %1700 = vst [vmem:[#allocation2 + $0x30] sm:$0xf] %v1699_v47  ;;  %v1525_v26 = vsel %vm1504_vm1, %v1523_v35, %v1524_v32 }
 0x1bf   : > { %v1385_v0 = vpop.f32.mrf.mxu2  ;;  %1703 = vst [vmem:[#allocation2 + $0x34] sm:$0x1] %v1702_v50  ;;  %v1543_v27 = vadd.f32 %v1525_v26, %v1146_v10  ;;  %v1434_v43 = vpop.f32.mrf.mxu3  ;;  %v1129_v45 = vrot.slane %v1087_v30, 1 }
 0x1c0   : > { %v1435_v13 = vadd.f32 %v1434_v43, %v1385_v0 }
 0x1c1   : > { %v1555_v36 = vadd.f32 %v7381_v9, %v1543_v27 }
 0x1c2   : > { %v1484_v11 = vadd.f32 %v1483_v42, %v1435_v13 }
 0x1c3   : > { %v1563_v22 = vmax.f32 %v1555_v36, 0.0 }
 0x1c4   : > { %v1088_v44 = vpop.f32.mrf.mxu1  ;;  %v1485_v48 = vpop.f32.mrf.mxu0  ;;  %v1526_v58 = vrot.slane %v1484_v11, 2 }
 0x1c5   : > { %v1089_v4 = vadd.f32 %v1088_v44, %v7372_v51  ;;  %1571 = vst [vmem:[#allocation3 + $0x28] sm:$0xff] %v1563_v22  ;;  %v1579_v38 = vpack.c.bf16 %v1563_v22, %v1563_v22  ;;  %v1707_v51 = vld [vmem:[#allocation2 + $0x3c] sm:$0x1] }
 0x1c7   : > { %v1130_v46 = vrot.slane %v1089_v4, 1  ;;  %v1387_v37 = vpop.f32.mrf.mxu2  ;;  %v1630_v41 = vshrl.u32 %v1579_v38, 16  ;;  %v1436_v5 = vpop.f32.mrf.mxu3  ;;  %v1633_v33 = vshll.u32 %v1579_v38, 16 }
 0x1c8   : > { %v1437_v19 = vadd.f32 %v1436_v5, %v1387_v37 }
 0x1c9   : > { %v1131_v39 = vsel %vm1107_vm0, %v1129_v45, %v1130_v46  ;;  %v1632_v57 = vrot.slane %v1630_v41, 7 }
 0x1ca   : > { %v1147_v34 = vadd.f32 %v1131_v39, %v7368_v53  ;;  %v1486_v40 = vadd.f32 %v1485_v48, %v1437_v19 }
 0x1cb   : > { %v1635_v49 = vor.u32 %v1633_v33, %v1632_v57  ;;  %v1636_v62 = vrot.slane %v1632_v57, 4 }
 0x1cc   : > { %v1527_v59 = vrot.slane %v1486_v40, 2 }
 0x1cd   : > { %v1705_v61 = vsel %vm7389_vm6, %v1635_v49, %v1704_v28  ;;  %v1708_v53 = vsel %vm7394_vm7, %v1636_v62, %v1707_v51 }
 0x1ce   : > { %1706 = vst [vmem:[#allocation2 + $0x38] sm:$0xf] %v1705_v61  ;;  %v1528_v6 = vsel %vm1504_vm1, %v1526_v58, %v1527_v59 }
 0x1cf   : > { %1709 = vst [vmem:[#allocation2 + $0x3c] sm:$0x1] %v1708_v53  ;;  %v1544_v1 = vadd.f32 %v1528_v6, %v1147_v34 }
 0x1d1   : > { %v1556_v54 = vadd.f32 %v7381_v9, %v1544_v1 }
 0x1d3   : > { %v1564_v14 = vmax.f32 %v1556_v54, 0.0 }
 0x1d5   : > { %1572 = vst [vmem:[#allocation3 + $0x38] sm:$0xff] %v1564_v14  ;;  %v1580_v3 = vpack.c.bf16 %v1564_v14, %v1564_v14 }
 0x1d7   : > { %v1638_v7 = vshrl.u32 %v1580_v3, 16  ;;  %v1641_v8 = vshll.u32 %v1580_v3, 16 }
 0x1d9   : > { %v1640_v18 = vrot.slane %v1638_v7, 7 }
 0x1db   : > { %v1643_v10 = vor.u32 %v1641_v8, %v1640_v18  ;;  %v1644_v12 = vrot.slane %v1640_v18, 4 }
 0x1dd   : > { %v1711_v20 = vsel %vm7389_vm6, %v1643_v10, %v1710_v16  ;;  %v1714_v63 = vsel %vm7394_vm7, %v1644_v12, %v1713_v17 }
 0x1de   : > { %1712 = vst [vmem:[#allocation2 + $0x40] sm:$0xf] %v1711_v20 }
 0x1df   : > { %1715 = vst [vmem:[#allocation2 + $0x44] sm:$0x1] %v1714_v63 }
 0x1e0 LB: >> { %s5511_s24 = smul.u32 1152, %s6901_s23  ;;  %v7497_v30 = vld [vmem:[#allocation2] sm:$0xff]  ;;  %v7501_v43 = vld [vmem:[#allocation2 + $0x28] sm:$0xff]  ;;  %v7527_v48 = vld [vmem:[#allocation2 + $0x30] sm:$0xff]  ;;  %s5950_s29 = sshll.u32 %s6901_s23, 1  ;;  %s6901_s23 = sphi %s7468_s23, %s1721_s23  }
 0x1e1   : >> { %v7499_v42 = vld [vmem:[#allocation2 + $0x20] sm:$0xff]  ;;  %v7504_v36 = vld [vmem:[#allocation2 + $0x8] sm:$0xff]  ;;  %v7530_v51 = vld [vmem:[#allocation2 + $0x10] sm:$0xff]  ;;  %s7677_s7 = scalar_lea.vmem %s8166_s2, %s5950_s29  ;;  %s1721_s23 = sadd.s32 1, %s6901_s23  }
 0x1e2   : >> { %s7477_s28 = scalar_lea.vmem %s8165_s1, %s5511_s24  ;;  %v7523_v57 = vld [vmem:[#allocation2 + $0x8] sm:$0xff]  ;;  %v7549_v18 = vld [vmem:[#allocation2 + $0x10] sm:$0xff]  ;;  %v7553_v16 = vld [vmem:[#allocation2 + $0x38] sm:$0xff]  ;;  %p1718_p4 = scmp.ge.s32.totalorder %s1721_s23, 2  }
 0x1e3   : >> { %v6651_v9 = vld [vmem:[%s7477_s28 + $0x278] sm:$0xff]  ;;  %v6650_v55 = vld [vmem:[%s7477_s28 + $0x270] sm:$0xff]  ;;  %v6649_v23 = vld [vmem:[%s7477_s28 + $0x268] sm:$0xff] }
 0x1e4   : >> { %v6659_v21 = vld [vmem:[%s7477_s28 + $0x2b8] sm:$0xff]  ;;  %2112 = vmatpush.bf16.msra.mxu0 %v6651_v9  ;;  %6844 = vmatpush.bf16.msra.mxu2 %v6651_v9  ;;  %v6658_v15 = vld [vmem:[%s7477_s28 + $0x2b0] sm:$0xff]  ;;  %v6657_v24 = vld [vmem:[%s7477_s28 + $0x2a8] sm:$0xff] }
 0x1e5   : >> { %6852 = vmatpush.bf16.msra.mxu3 %v6659_v21  ;;  %2153 = vmatpush.bf16.msra.mxu1 %v6659_v21  ;;  %v6648_v52 = vld [vmem:[%s7477_s28 + $0x260] sm:$0xff]  ;;  %v6647_v2 = vld [vmem:[%s7477_s28 + $0x258] sm:$0xff]  ;;  %v6646_v29 = vld [vmem:[%s7477_s28 + $0x250] sm:$0xff] }
 0x1e6   : >> { %v6656_v56 = vld [vmem:[%s7477_s28 + $0x2a0] sm:$0xff]  ;;  %v6655_v25 = vld [vmem:[%s7477_s28 + $0x298] sm:$0xff]  ;;  %v6654_v35 = vld [vmem:[%s7477_s28 + $0x290] sm:$0xff] }
 0x1e7   : >> { %v6645_v32 = vld [vmem:[%s7477_s28 + $0x248] sm:$0xff]  ;;  %v6644_v50 = vld [vmem:[%s7477_s28 + $0x240] sm:$0xff]  ;;  %v6667_v0 = vld [vmem:[%s7477_s28 + $0x2f8] sm:$0xff] }
 0x1e8   : >> { %2113 = vmatpush.bf16.msra.mxu0 %v6650_v55  ;;  %6845 = vmatpush.bf16.msra.mxu2 %v6650_v55  ;;  %v6653_v47 = vld [vmem:[%s7477_s28 + $0x288] sm:$0xff]  ;;  %v6652_v26 = vld [vmem:[%s7477_s28 + $0x280] sm:$0xff]  ;;  %v6675_v27 = vld [vmem:[%s7477_s28 + $0x338] sm:$0xff] }
 0x1e9   : >> { %6853 = vmatpush.bf16.msra.mxu3 %v6658_v15  ;;  %2154 = vmatpush.bf16.msra.mxu1 %v6658_v15  ;;  %v6683_v44 = vld [vmem:[%s7477_s28 + $0x378] sm:$0xff]  ;;  %v6666_v4 = vld [vmem:[%s7477_s28 + $0x2f0] sm:$0xff]  ;;  %v6665_v46 = vld [vmem:[%s7477_s28 + $0x2e8] sm:$0xff] }
 0x1ea   : >> { %v6674_v22 = vld [vmem:[%s7477_s28 + $0x330] sm:$0xff]  ;;  %v6673_v13 = vld [vmem:[%s7477_s28 + $0x328] sm:$0xff]  ;;  %v6691_v38 = vld [vmem:[%s7477_s28 + $0x3b8] sm:$0xff] }
 0x1eb   : >> { %v6682_v45 = vld [vmem:[%s7477_s28 + $0x370] sm:$0xff]  ;;  %v6681_v39 = vld [vmem:[%s7477_s28 + $0x368] sm:$0xff]  ;;  %v6664_v37 = vld [vmem:[%s7477_s28 + $0x2e0] sm:$0xff] }
 0x1ec   : >> { %2114 = vmatpush.bf16.msra.mxu0 %v6649_v23  ;;  %6846 = vmatpush.bf16.msra.mxu2 %v6649_v23  ;;  %v6690_v34 = vld [vmem:[%s7477_s28 + $0x3b0] sm:$0xff]  ;;  %v6672_v41 = vld [vmem:[%s7477_s28 + $0x320] sm:$0xff]  ;;  %v6663_v11 = vld [vmem:[%s7477_s28 + $0x2d8] sm:$0xff] }
 0x1ed   : >> { %6854 = vmatpush.bf16.msra.mxu3 %v6657_v24  ;;  %2155 = vmatpush.bf16.msra.mxu1 %v6657_v24  ;;  %v6680_v5 = vld [vmem:[%s7477_s28 + $0x360] sm:$0xff]  ;;  %v6671_v19 = vld [vmem:[%s7477_s28 + $0x318] sm:$0xff]  ;;  %v7525_v33 = vld [vmem:[#allocation2 + $0x28] sm:$0xff] }
 0x1ee   : >> { %v6679_v28 = vld [vmem:[%s7477_s28 + $0x358] sm:$0xff]  ;;  %v6662_v40 = vld [vmem:[%s7477_s28 + $0x2d0] sm:$0xff]  ;;  %v6689_v62 = vld [vmem:[%s7477_s28 + $0x3a8] sm:$0xff] }
 0x1ef   : >> { %v6670_v49 = vld [vmem:[%s7477_s28 + $0x310] sm:$0xff]  ;;  %v6661_v59 = vld [vmem:[%s7477_s28 + $0x2c8] sm:$0xff]  ;;  %v6688_v53 = vld [vmem:[%s7477_s28 + $0x3a0] sm:$0xff] }
 0x1f0   : >> { %2115 = vmatpush.bf16.msra.mxu0 %v6648_v52  ;;  %6847 = vmatpush.bf16.msra.mxu2 %v6648_v52  ;;  %v6678_v58 = vld [vmem:[%s7477_s28 + $0x350] sm:$0xff]  ;;  %v6669_v61 = vld [vmem:[%s7477_s28 + $0x308] sm:$0xff]  ;;  %v6660_v1 = vld [vmem:[%s7477_s28 + $0x2c0] sm:$0xff] }
 0x1f1   : >> { %6855 = vmatpush.bf16.msra.mxu3 %v6656_v56  ;;  %2156 = vmatpush.bf16.msra.mxu1 %v6656_v56  ;;  %v6677_v6 = vld [vmem:[%s7477_s28 + $0x348] sm:$0xff]  ;;  %v6668_v54 = vld [vmem:[%s7477_s28 + $0x300] sm:$0xff]  ;;  %v6687_v14 = vld [vmem:[%s7477_s28 + $0x398] sm:$0xff] }
 0x1f2   : >> { %v6676_v3 = vld [vmem:[%s7477_s28 + $0x340] sm:$0xff]  ;;  %v6686_v7 = vld [vmem:[%s7477_s28 + $0x390] sm:$0xff]  ;;  %v7555_v17 = vld [vmem:[#allocation2 + $0x18] sm:$0xff] }
 0x1f3   : >> { %v7551_v8 = vld [vmem:[#allocation2 + $0x30] sm:$0xff]  ;;  %v6685_v10 = vld [vmem:[%s7477_s28 + $0x388] sm:$0xff]  ;;  %v6699_v12 = vld [vmem:[%s7477_s28 + $0x3f8] sm:$0xff] }
 0x1f4   : >> { %2116 = vmatpush.bf16.msra.mxu0 %v6647_v2  ;;  %6848 = vmatpush.bf16.msra.mxu2 %v6647_v2  ;;  %v6707_v20 = vld [vmem:[%s7477_s28 + $0x438] sm:$0xff]  ;;  %v6684_v9 = vld [vmem:[%s7477_s28 + $0x380] sm:$0xff]  ;;  %v6698_v24 = vld [vmem:[%s7477_s28 + $0x3f0] sm:$0xff] }
 0x1f5   : >> { %6856 = vmatpush.bf16.msra.mxu3 %v6655_v25  ;;  %2157 = vmatpush.bf16.msra.mxu1 %v6655_v25  ;;  %v6715_v63 = vld [vmem:[%s7477_s28 + $0x478] sm:$0xff]  ;;  %v7570_v15 = vld [vmem:[#allocation2 + $0x40] sm:$0xff]  ;;  %v6706_v52 = vld [vmem:[%s7477_s28 + $0x430] sm:$0xff] }
 0x1f6   : >> { %v7566_v21 = vld [vmem:[#allocation2 + $0x18] sm:$0xff]  ;;  %v7572_v23 = vld [vmem:[#allocation2 + $0x20] sm:$0xff]  ;;  %v6714_v56 = vld [vmem:[%s7477_s28 + $0x470] sm:$0xff] }
 0x1f7   : >> { %v7568_v55 = vld [vmem:[#allocation2 + $0x38] sm:$0xff]  ;;  %v7581_v2 = vld [vmem:[#allocation2 + $0x10] sm:$0xff]  ;;  %v6697_v25 = vld [vmem:[%s7477_s28 + $0x3e8] sm:$0xff] }
 0x1f8   : >> { %2117 = vmatpush.bf16.msra.mxu0 %v6646_v29  ;;  %6849 = vmatpush.bf16.msra.mxu2 %v6646_v29  ;;  %v6705_v29 = vld [vmem:[%s7477_s28 + $0x428] sm:$0xff] }
 0x1f9   : >> { %6857 = vmatpush.bf16.msra.mxu3 %v6654_v35  ;;  %2158 = vmatpush.bf16.msra.mxu1 %v6654_v35  ;;  %v6713_v35 = vld [vmem:[%s7477_s28 + $0x468] sm:$0xff] }
 0x1fc   : >> { %2118 = vmatpush.bf16.msra.mxu0 %v6645_v32  ;;  %6850 = vmatpush.bf16.msra.mxu2 %v6645_v32  ;;  %v7590_v32 = vld [vmem:[#allocation2 + $0x18] sm:$0xff] }
 0x1fd   : >> { %6858 = vmatpush.bf16.msra.mxu3 %v6653_v47  ;;  %2159 = vmatpush.bf16.msra.mxu1 %v6653_v47  ;;  %v6696_v47 = vld [vmem:[%s7477_s28 + $0x3e0] sm:$0xff] }
 0x200   : >> { %2119 = vmatpush.bf16.msra.mxu0 %v6644_v50  ;;  %6851 = vmatpush.bf16.msra.mxu2 %v6644_v50  ;;  %v6704_v50 = vld [vmem:[%s7477_s28 + $0x420] sm:$0xff] }
 0x201   : >> { %6859 = vmatpush.bf16.msra.mxu3 %v6652_v26  ;;  %2160 = vmatpush.bf16.msra.mxu1 %v6652_v26  ;;  %v6712_v26 = vld [vmem:[%s7477_s28 + $0x460] sm:$0xff] }
 0x203   : >> { %2120 = vmatmul.bf16.vlgmr.msra.gmra.mxu0 %v7497_v30  ;;  %2136 = vmatmul.bf16.vlgmr.msra.gmra.mxu2 %v7499_v42 }
 0x204   : >> { %2194 = vmatpush.bf16.msrb.mxu2 %v6667_v0  ;;  %2177 = vmatmul.bf16.vlgmr.msra.gmra.mxu3 %v7501_v43  ;;  %v7599_v0 = vld [vmem:[#allocation2 + $0x20] sm:$0xff] }
 0x205   : >> { %2430 = vmatpush.bf16.msrb.mxu3 %v6675_v27  ;;  %2479 = vmatpush.bf16.msrb.mxu0 %v6683_v44  ;;  %v6695_v27 = vld [vmem:[%s7477_s28 + $0x3d8] sm:$0xff] }
 0x206   : >> { %2161 = vmatmul.bf16.vlgmr.msra.gmra.mxu1 %v7504_v36  ;;  %v6703_v44 = vld [vmem:[%s7477_s28 + $0x418] sm:$0xff] }
 0x207   : >> { %2528 = vmatpush.bf16.msrb.mxu1 %v6691_v38  ;;  %v7617_v38 = vld [vmem:[#allocation2 + $0x30] sm:$0xff] }
 0x208   : >> { %2195 = vmatpush.bf16.msrb.mxu2 %v6666_v4  ;;  %v6711_v4 = vld [vmem:[%s7477_s28 + $0x458] sm:$0xff] }
 0x209   : >> { %2431 = vmatpush.bf16.msrb.mxu3 %v6674_v22  ;;  %2480 = vmatpush.bf16.msrb.mxu0 %v6682_v45  ;;  %v7608_v22 = vld [vmem:[#allocation2 + $0x28] sm:$0xff]  ;;  %v6694_v45 = vld [vmem:[%s7477_s28 + $0x3d0] sm:$0xff] }
 0x20b   : >> { %2529 = vmatpush.bf16.msrb.mxu1 %v6690_v34 }
 0x20c   : >> { %2196 = vmatpush.bf16.msrb.mxu2 %v6665_v46  ;;  %v6702_v46 = vld [vmem:[%s7477_s28 + $0x410] sm:$0xff] }
 0x20d   : >> { %2432 = vmatpush.bf16.msrb.mxu3 %v6673_v13  ;;  %2481 = vmatpush.bf16.msrb.mxu0 %v6681_v39  ;;  %v6710_v13 = vld [vmem:[%s7477_s28 + $0x450] sm:$0xff] }
 0x20f   : >> { %2530 = vmatpush.bf16.msrb.mxu1 %v6689_v62 }
 0x210   : >> { %2197 = vmatpush.bf16.msrb.mxu2 %v6664_v37 }
 0x211   : >> { %2433 = vmatpush.bf16.msrb.mxu3 %v6672_v41  ;;  %2482 = vmatpush.bf16.msrb.mxu0 %v6680_v5  ;;  %v6693_v41 = vld [vmem:[%s7477_s28 + $0x3c8] sm:$0xff] }
 0x212   : >> { %v6701_v5 = vld [vmem:[%s7477_s28 + $0x408] sm:$0xff] }
 0x213   : >> { %2124 = vmatmul.bf16.gmra.mxu0 %v7523_v57  ;;  %2140 = vmatmul.bf16.gmra.mxu2 %v7525_v33 }
 0x214   : >> { %2198 = vmatpush.bf16.msrb.mxu2 %v6663_v11  ;;  %2181 = vmatmul.bf16.gmra.mxu3 %v7527_v48 }
 0x215   : >> { %2434 = vmatpush.bf16.msrb.mxu3 %v6671_v19  ;;  %2483 = vmatpush.bf16.msrb.mxu0 %v6679_v28 }
 0x216   : >> { %2165 = vmatmul.bf16.gmra.mxu1 %v7530_v51 }
 0x217   : >> { %2531 = vmatpush.bf16.msrb.mxu1 %v6688_v53 }
 0x218   : >> { %2199 = vmatpush.bf16.msrb.mxu2 %v6662_v40 }
 0x219   : >> { %2435 = vmatpush.bf16.msrb.mxu3 %v6670_v49  ;;  %2484 = vmatpush.bf16.msrb.mxu0 %v6678_v58  ;;  %v6709_v49 = vld [vmem:[%s7477_s28 + $0x448] sm:$0xff] }
 0x21b   : >> { %2532 = vmatpush.bf16.msrb.mxu1 %v6687_v14  ;;  %v6700_v14 = vld [vmem:[%s7477_s28 + $0x400] sm:$0xff] }
 0x21c   : >> { %2200 = vmatpush.bf16.msrb.mxu2 %v6661_v59 }
 0x21d   : >> { %2436 = vmatpush.bf16.msrb.mxu3 %v6669_v61  ;;  %2485 = vmatpush.bf16.msrb.mxu0 %v6677_v6  ;;  %v7630_v61 = vld [vmem:[#allocation2 + $0x38] sm:$0xff] }
 0x21f   : >> { %2533 = vmatpush.bf16.msrb.mxu1 %v6686_v7 }
 0x220   : >> { %2201 = vmatpush.bf16.msrb.mxu2 %v6660_v1 }
 0x221   : >> { %2437 = vmatpush.bf16.msrb.mxu3 %v6668_v54  ;;  %2486 = vmatpush.bf16.msrb.mxu0 %v6676_v3  ;;  %v6692_v54 = vld [vmem:[%s7477_s28 + $0x3c0] sm:$0xff] }
 0x223   : >> { %2128 = vmatmul.bf16.gmra.mxu0 %v7549_v18  ;;  %2144 = vmatmul.bf16.gmra.mxu2 %v7551_v8 }
 0x224   : >> { %2185 = vmatmul.bf16.gmra.mxu3 %v7553_v16  ;;  %2828 = vmatpush.bf16.msra.mxu2 %v6699_v12 }
 0x225   : >> { %2877 = vmatpush.bf16.msra.mxu3 %v6707_v20  ;;  %2534 = vmatpush.bf16.msrb.mxu1 %v6685_v10  ;;  %v6708_v20 = vld [vmem:[%s7477_s28 + $0x440] sm:$0xff] }
 0x226   : >> { %2169 = vmatmul.bf16.gmra.mxu1 %v7555_v17  ;;  %2926 = vmatpush.bf16.msra.mxu0 %v6715_v63 }
 0x228   : >> { %2829 = vmatpush.bf16.msra.mxu2 %v6698_v24 }
 0x229   : >> { %2535 = vmatpush.bf16.msrb.mxu1 %v6684_v9  ;;  %2878 = vmatpush.bf16.msra.mxu3 %v6706_v52  ;;  %v7643_v52 = vld [vmem:[#allocation2 + $0x40] sm:$0xff] }
 0x22a   : >> { %2927 = vmatpush.bf16.msra.mxu0 %v6714_v56 }
 0x22c   : >> { %2830 = vmatpush.bf16.msra.mxu2 %v6697_v25 }
 0x22d   : >> { %2879 = vmatpush.bf16.msra.mxu3 %v6705_v29 }
 0x22e   : >> { %2928 = vmatpush.bf16.msra.mxu0 %v6713_v35 }
 0x230   : >> { %2831 = vmatpush.bf16.msra.mxu2 %v6696_v47 }
 0x231   : >> { %2880 = vmatpush.bf16.msra.mxu3 %v6704_v50 }
 0x232   : >> { %2929 = vmatpush.bf16.msra.mxu0 %v6712_v26 }
 0x233   : >> { %2132 = vmatmul.bf16.gmra.mxu0 %v7566_v21  ;;  %2148 = vmatmul.bf16.gmra.mxu2 %v7568_v55 }
 0x234   : >> { %2189 = vmatmul.bf16.gmra.mxu3 %v7570_v15  ;;  %2832 = vmatpush.bf16.msra.mxu2 %v6695_v27 }
 0x235   : >> { %2881 = vmatpush.bf16.msra.mxu3 %v6703_v44 }
 0x236   : >> { %2173 = vmatmul.bf16.gmra.mxu1 %v7572_v23  ;;  %2930 = vmatpush.bf16.msra.mxu0 %v6711_v4 }
 0x238   : >> { %2833 = vmatpush.bf16.msra.mxu2 %v6694_v45  ;;  %v7653_v45 = vld [vmem:[#allocation2 + $0x48] sm:$0xff] }
 0x239   : >> { %2882 = vmatpush.bf16.msra.mxu3 %v6702_v46 }
 0x23a   : >> { %2931 = vmatpush.bf16.msra.mxu0 %v6710_v13 }
 0x23c   : >> { %2834 = vmatpush.bf16.msra.mxu2 %v6693_v41 }
 0x23d   : >> { %2883 = vmatpush.bf16.msra.mxu3 %v6701_v5 }
 0x23e   : >> { %2932 = vmatpush.bf16.msra.mxu0 %v6709_v49 }
 0x240   : >> { %2835 = vmatpush.bf16.msra.mxu2 %v6692_v54 }
 0x241   : >> { %2884 = vmatpush.bf16.msra.mxu3 %v6700_v14 }
 0x242   : >> { %2933 = vmatpush.bf16.msra.mxu0 %v6708_v20 }
 0x243   : >> { %2202 = vmatmul.bf16.vlgmr.msrb.gmra.mxu2 %v7581_v2  ;;  %2487 = vmatmul.bf16.vlgmr.msrb.gmra.mxu0 %v7504_v36 }
 0x244   : >> { %2438 = vmatmul.bf16.vlgmr.msrb.gmra.mxu3 %v7497_v30 }
 0x246   : >> { %2536 = vmatmul.bf16.vlgmr.msrb.gmra.mxu1 %v7581_v2 }
 0x253   : >> { %2206 = vmatmul.bf16.gmra.mxu2 %v7590_v32  ;;  %2492 = vmatmul.bf16.gmra.mxu0 %v7530_v51 }
 0x254   : >> { %2443 = vmatmul.bf16.gmra.mxu3 %v7523_v57 }
 0x256   : >> { %2541 = vmatmul.bf16.gmra.mxu1 %v7590_v32 }
 0x263   : >> { %2210 = vmatmul.bf16.gmra.mxu2 %v7599_v0  ;;  %2497 = vmatmul.bf16.gmra.mxu0 %v7555_v17 }
 0x264   : >> { %2448 = vmatmul.bf16.gmra.mxu3 %v7549_v18 }
 0x266   : >> { %2546 = vmatmul.bf16.gmra.mxu1 %v7599_v0 }
 0x273   : >> { %2214 = vmatmul.bf16.gmra.mxu2 %v7608_v22  ;;  %2502 = vmatmul.bf16.gmra.mxu0 %v7572_v23 }
 0x274   : >> { %2453 = vmatmul.bf16.gmra.mxu3 %v7566_v21 }
 0x276   : >> { %2551 = vmatmul.bf16.gmra.mxu1 %v7608_v22 }
 0x280   : >> { %v2121_v39 = vpop.f32.mrf.mxu0 }
 0x283   : >> { %v2162_v34 = vpop.f32.mrf.mxu1  ;;  %2218 = vmatmul.bf16.gmra.mxu2 %v7617_v38  ;;  %2507 = vmatmul.bf16.gmra.mxu0 %v7501_v43 }
 0x284   : >> { %v7621_v37 = vadd.f32 %v2162_v34, %v2121_v39  ;;  %2458 = vmatmul.bf16.gmra.mxu3 %v7499_v42 }
 0x286   : >> { %2556 = vmatmul.bf16.gmra.mxu1 %v7617_v38  ;;  %v2137_v11 = vpop.f32.mrf.mxu2 }
 0x287   : >> { %v2178_v19 = vpop.f32.mrf.mxu3 }
 0x288   : >> { %v7627_v28 = vadd.f32 %v2178_v19, %v2137_v11  ;;  %v2123_v40 = vpop.f32.mrf.mxu0 }
 0x28b   : >> { %v2164_v62 = vpop.f32.mrf.mxu1 }
 0x28e   : >> { %v2139_v58 = vpop.f32.mrf.mxu2 }
 0x28f   : >> { %v2180_v59 = vpop.f32.mrf.mxu3  ;;  %v6747_v58 = vld [vmem:[%s7477_s28 + $0x4b8] sm:$0xff] }
 0x290   : >> { %v2125_v53 = vpop.f32.mrf.mxu0  ;;  %3575 = vmatpush.bf16.msra.mxu1 %v6747_v58 }
 0x293   : >> { %v2166_v6 = vpop.f32.mrf.mxu1  ;;  %2222 = vmatmul.bf16.gmra.mxu2 %v7630_v61  ;;  %2512 = vmatmul.bf16.gmra.mxu0 %v7527_v48 }
 0x294   : >> { %v7634_v1 = vadd.f32 %v2166_v6, %v2125_v53  ;;  %2463 = vmatmul.bf16.gmra.mxu3 %v7525_v33 }
 0x296   : >> { %2561 = vmatmul.bf16.gmra.mxu1 %v7630_v61  ;;  %v2141_v3 = vpop.f32.mrf.mxu2 }
 0x297   : >> { %v2182_v7 = vpop.f32.mrf.mxu3 }
 0x298   : >> { %v7640_v10 = vadd.f32 %v2182_v7, %v2141_v3  ;;  %v2127_v12 = vpop.f32.mrf.mxu0 }
 0x29b   : >> { %v2168_v63 = vpop.f32.mrf.mxu1 }
 0x29e   : >> { %v2143_v9 = vpop.f32.mrf.mxu2 }
 0x29f   : >> { %v2184_v24 = vpop.f32.mrf.mxu3 }
 0x2a0   : >> { %v2129_v56 = vpop.f32.mrf.mxu0 }
 0x2a3   : >> { %v2170_v25 = vpop.f32.mrf.mxu1  ;;  %2226 = vmatmul.bf16.gmra.mxu2 %v7643_v52  ;;  %2517 = vmatmul.bf16.gmra.mxu0 %v7553_v16 }
 0x2a4   : >> { %v7647_v29 = vadd.f32 %v2170_v25, %v2129_v56  ;;  %2468 = vmatmul.bf16.gmra.mxu3 %v7551_v8  ;;  %v6746_v56 = vld [vmem:[%s7477_s28 + $0x4b0] sm:$0xff] }
 0x2a5   : >> { %3576 = vmatpush.bf16.msra.mxu1 %v6746_v56 }
 0x2a6   : >> { %2566 = vmatmul.bf16.gmra.mxu1 %v7643_v52  ;;  %v2145_v35 = vpop.f32.mrf.mxu2 }
 0x2a7   : >> { %v2186_v47 = vpop.f32.mrf.mxu3 }
 0x2a8   : >> { %v7651_v50 = vadd.f32 %v2186_v47, %v2145_v35  ;;  %v2131_v26 = vpop.f32.mrf.mxu0 }
 0x2ab   : >> { %v2172_v27 = vpop.f32.mrf.mxu1 }
 0x2ae   : >> { %v2147_v44 = vpop.f32.mrf.mxu2 }
 0x2af   : >> { %v2188_v4 = vpop.f32.mrf.mxu3 }
 0x2b0   : >> { %v2133_v46 = vpop.f32.mrf.mxu0 }
 0x2b3   : >> { %v2174_v13 = vpop.f32.mrf.mxu1  ;;  %2230 = vmatmul.bf16.gmra.mxu2 %v7653_v45  ;;  %2522 = vmatmul.bf16.gmra.mxu0 %v7570_v15 }
 0x2b4   : >> { %v7657_v39 = vadd.f32 %v2174_v13, %v2133_v46  ;;  %2473 = vmatmul.bf16.gmra.mxu3 %v7568_v55 }
 0x2b6   : >> { %2571 = vmatmul.bf16.gmra.mxu1 %v7653_v45  ;;  %v2149_v34 = vpop.f32.mrf.mxu2 }
 0x2b7   : >> { %v2190_v41 = vpop.f32.mrf.mxu3 }
 0x2b8   : >> { %v7661_v5 = vadd.f32 %v2190_v41, %v2149_v34  ;;  %v2135_v11 = vpop.f32.mrf.mxu0  ;;  %v6745_v41 = vld [vmem:[%s7477_s28 + $0x4a8] sm:$0xff] }
 0x2b9   : >> { %3577 = vmatpush.bf16.msra.mxu1 %v6745_v41 }
 0x2bb   : >> { %v2176_v19 = vpop.f32.mrf.mxu1 }
 0x2be   : >> { %v2151_v40 = vpop.f32.mrf.mxu2 }
 0x2bf   : >> { %v2192_v49 = vpop.f32.mrf.mxu3 }
 0x2c0   : >> { %v2488_v62 = vpop.f32.mrf.mxu0 }
 0x2c3   : >> { %v2537_v59 = vpop.f32.mrf.mxu1  ;;  %2836 = vmatmul.bf16.vlgmr.msra.gmra.mxu2 %v7497_v30  ;;  %2934 = vmatmul.bf16.vlgmr.msra.gmra.mxu0 %v7581_v2 }
 0x2c4   : >> { %2885 = vmatmul.bf16.vlgmr.msra.gmra.mxu3 %v7504_v36 }
 0x2c6   : >> { %v2203_v53 = vpop.f32.mrf.mxu2 }
 0x2c7   : >> { %v2204_v6 = vadd.f32 %v2203_v53, %v7621_v37  ;;  %v2439_v54 = vpop.f32.mrf.mxu3 }
 0x2c8   : >> { %v2489_v14 = vadd.f32 %v2488_v62, %v2439_v54  ;;  %v2490_v3 = vpop.f32.mrf.mxu0 }
 0x2ca   : >> { %v2538_v63 = vadd.f32 %v2537_v59, %v2489_v14 }
 0x2cb   : >> { %v2539_v7 = vpop.f32.mrf.mxu1 }
 0x2cc   : >> { %v2593_v36 = vrot.slane %v2538_v63, 1 }
 0x2ce   : >> { %v2205_v12 = vpop.f32.mrf.mxu2 }
 0x2cf   : >> { %v2441_v20 = vpop.f32.mrf.mxu3 }
 0x2d0   : >> { %v2491_v9 = vadd.f32 %v2490_v3, %v2441_v20  ;;  %v2493_v24 = vpop.f32.mrf.mxu0  ;;  %v6744_v20 = vld [vmem:[%s7477_s28 + $0x4a0] sm:$0xff] }
 0x2d1   : >> { %3578 = vmatpush.bf16.msra.mxu1 %v6744_v20 }
 0x2d2   : >> { %v2540_v25 = vadd.f32 %v2539_v7, %v2491_v9 }
 0x2d3   : >> { %v2542_v30 = vpop.f32.mrf.mxu1  ;;  %2841 = vmatmul.bf16.gmra.mxu2 %v7523_v57  ;;  %2939 = vmatmul.bf16.gmra.mxu0 %v7590_v32 }
 0x2d4   : >> { %v2594_v2 = vrot.slane %v2540_v25, 1  ;;  %2890 = vmatmul.bf16.gmra.mxu3 %v7530_v51 }
 0x2d6   : >> { %v2595_v37 = vsel %vm1107_vm0, %v2593_v36, %v2594_v2  ;;  %v2207_v35 = vpop.f32.mrf.mxu2 }
 0x2d7   : >> { %v7679_v47 = vadd.f32 %v2595_v37, %v2204_v6  ;;  %v2208_v57 = vadd.f32 %v2207_v35, %v7634_v1  ;;  %v2444_v26 = vpop.f32.mrf.mxu3 }
 0x2d8   : >> { %v2494_v32 = vadd.f32 %v2493_v24, %v2444_v26  ;;  %v2495_v27 = vpop.f32.mrf.mxu0 }
 0x2da   : >> { %v2543_v46 = vadd.f32 %v2542_v30, %v2494_v32 }
 0x2db   : >> { %v2544_v44 = vpop.f32.mrf.mxu1 }
 0x2dc   : >> { %v2596_v40 = vrot.slane %v2543_v46, 1 }
 0x2de   : >> { %v2209_v4 = vpop.f32.mrf.mxu2 }
 0x2df   : >> { %v2446_v51 = vpop.f32.mrf.mxu3 }
 0x2e0   : >> { %v2496_v13 = vadd.f32 %v2495_v27, %v2446_v51  ;;  %v2498_v34 = vpop.f32.mrf.mxu0  ;;  %v6743_v27 = vld [vmem:[%s7477_s28 + $0x498] sm:$0xff] }
 0x2e1   : >> { %3579 = vmatpush.bf16.msra.mxu1 %v6743_v27 }
 0x2e2   : >> { %v2545_v11 = vadd.f32 %v2544_v44, %v2496_v13 }
 0x2e3   : >> { %v2547_v19 = vpop.f32.mrf.mxu1  ;;  %2846 = vmatmul.bf16.gmra.mxu2 %v7549_v18  ;;  %2944 = vmatmul.bf16.gmra.mxu0 %v7599_v0 }
 0x2e4   : >> { %v2597_v1 = vrot.slane %v2545_v11, 1  ;;  %2895 = vmatmul.bf16.gmra.mxu3 %v7555_v17 }
 0x2e6   : >> { %v2598_v49 = vsel %vm1107_vm0, %v2596_v40, %v2597_v1  ;;  %v2211_v62 = vpop.f32.mrf.mxu2 }
 0x2e7   : >> { %v7687_v58 = vadd.f32 %v2598_v49, %v2208_v57  ;;  %v2212_v59 = vadd.f32 %v2211_v62, %v7647_v29  ;;  %v2449_v53 = vpop.f32.mrf.mxu3 }
 0x2e8   : >> { %v2499_v6 = vadd.f32 %v2498_v34, %v2449_v53  ;;  %v2500_v54 = vpop.f32.mrf.mxu0 }
 0x2ea   : >> { %v2548_v7 = vadd.f32 %v2547_v19, %v2499_v6 }
 0x2eb   : >> { %v2549_v14 = vpop.f32.mrf.mxu1 }
 0x2ec   : >> { %v2599_v17 = vrot.slane %v2548_v7, 1 }
 0x2ee   : >> { %v2213_v3 = vpop.f32.mrf.mxu2 }
 0x2ef   : >> { %v2451_v18 = vpop.f32.mrf.mxu3 }
 0x2f0   : >> { %v2501_v0 = vadd.f32 %v2500_v54, %v2451_v18  ;;  %v2503_v12 = vpop.f32.mrf.mxu0 }
 0x2f2   : >> { %v2550_v63 = vadd.f32 %v2549_v14, %v2501_v0 }
 0x2f3   : >> { %v2552_v9 = vpop.f32.mrf.mxu1  ;;  %2851 = vmatmul.bf16.gmra.mxu2 %v7566_v21  ;;  %2949 = vmatmul.bf16.gmra.mxu0 %v7608_v22 }
 0x2f4   : >> { %v2600_v29 = vrot.slane %v2550_v63, 1  ;;  %2900 = vmatmul.bf16.gmra.mxu3 %v7572_v23  ;;  %v6771_v63 = vld [vmem:[%s7477_s28 + $0x578] sm:$0xff] }
 0x2f5   : >> { %3893 = vmatpush.bf16.msrb.mxu0 %v6771_v63  ;;  %v6762_v63 = vld [vmem:[%s7477_s28 + $0x530] sm:$0xff] }
 0x2f6   : >> { %v2601_v24 = vsel %vm1107_vm0, %v2599_v17, %v2600_v29  ;;  %v2215_v56 = vpop.f32.mrf.mxu2 }
 0x2f7   : >> { %v7695_v25 = vadd.f32 %v2601_v24, %v2212_v59  ;;  %v2216_v30 = vadd.f32 %v2215_v56, %v7657_v39  ;;  %v2454_v36 = vpop.f32.mrf.mxu3  ;;  %v6742_v59 = vld [vmem:[%s7477_s28 + $0x490] sm:$0xff] }
 0x2f8   : >> { %v2504_v2 = vadd.f32 %v2503_v12, %v2454_v36  ;;  %v2505_v37 = vpop.f32.mrf.mxu0  ;;  %3580 = vmatpush.bf16.msra.mxu1 %v6742_v59 }
 0x2fa   : >> { %v2553_v26 = vadd.f32 %v2552_v9, %v2504_v2 }
 0x2fb   : >> { %v2554_v35 = vpop.f32.mrf.mxu1 }
 0x2fc   : >> { %v2602_v23 = vrot.slane %v2553_v26, 1 }
 0x2fe   : >> { %v2217_v57 = vpop.f32.mrf.mxu2 }
 0x2ff   : >> { %v2456_v21 = vpop.f32.mrf.mxu3 }
 0x300   : >> { %v2506_v22 = vadd.f32 %v2505_v37, %v2456_v21  ;;  %v2508_v32 = vpop.f32.mrf.mxu0 }
 0x302   : >> { %v2555_v44 = vadd.f32 %v2554_v35, %v2506_v22  ;;  %v6769_v35 = vld [vmem:[%s7477_s28 + $0x568] sm:$0xff] }
 0x303   : >> { %v2557_v4 = vpop.f32.mrf.mxu1  ;;  %2856 = vmatmul.bf16.gmra.mxu2 %v7499_v42  ;;  %2954 = vmatmul.bf16.gmra.mxu0 %v7617_v38 }
 0x304   : >> { %v2603_v39 = vrot.slane %v2555_v44, 1  ;;  %2905 = vmatmul.bf16.gmra.mxu3 %v7501_v43  ;;  %v6755_v44 = vld [vmem:[%s7477_s28 + $0x4f8] sm:$0xff] }
 0x305   : >> { %3616 = vmatpush.bf16.msrb.mxu2 %v6755_v44  ;;  %v6758_v44 = vld [vmem:[%s7477_s28 + $0x510] sm:$0xff] }
 0x306   : >> { %v2604_v51 = vsel %vm1107_vm0, %v2602_v23, %v2603_v39  ;;  %v2219_v46 = vpop.f32.mrf.mxu2 }
 0x307   : >> { %v7703_v13 = vadd.f32 %v2604_v51, %v2216_v30  ;;  %v2220_v34 = vadd.f32 %v2219_v46, %v7627_v28  ;;  %v2459_v41 = vpop.f32.mrf.mxu3  ;;  %v6770_v30 = vld [vmem:[%s7477_s28 + $0x570] sm:$0xff]  ;;  %v6740_v46 = vld [vmem:[%s7477_s28 + $0x480] sm:$0xff] }
 0x308   : >> { %v2509_v11 = vadd.f32 %v2508_v32, %v2459_v41  ;;  %v2510_v19 = vpop.f32.mrf.mxu0  ;;  %3894 = vmatpush.bf16.msrb.mxu0 %v6770_v30  ;;  %v6766_v41 = vld [vmem:[%s7477_s28 + $0x550] sm:$0xff]  ;;  %v6761_v30 = vld [vmem:[%s7477_s28 + $0x528] sm:$0xff] }
 0x30a   : >> { %v2558_v49 = vadd.f32 %v2557_v4, %v2509_v11  ;;  %v6767_v4 = vld [vmem:[%s7477_s28 + $0x558] sm:$0xff] }
 0x30b   : >> { %v2559_v40 = vpop.f32.mrf.mxu1 }
 0x30c   : >> { %v2605_v43 = vrot.slane %v2558_v49, 1  ;;  %3895 = vmatpush.bf16.msrb.mxu0 %v6769_v35 }
 0x30e   : >> { %v2221_v1 = vpop.f32.mrf.mxu2 }
 0x30f   : >> { %v2461_v42 = vpop.f32.mrf.mxu3 }
 0x310   : >> { %v2511_v38 = vadd.f32 %v2510_v19, %v2461_v42  ;;  %v2513_v62 = vpop.f32.mrf.mxu0 }
 0x312   : >> { %v2560_v53 = vadd.f32 %v2559_v40, %v2511_v38 }
 0x313   : >> { %v2562_v6 = vpop.f32.mrf.mxu1  ;;  %2861 = vmatmul.bf16.gmra.mxu2 %v7525_v33  ;;  %2959 = vmatmul.bf16.gmra.mxu0 %v7630_v61 }
 0x314   : >> { %v2606_v28 = vrot.slane %v2560_v53, 1  ;;  %2910 = vmatmul.bf16.gmra.mxu3 %v7527_v48  ;;  %v6741_v48 = vld [vmem:[%s7477_s28 + $0x488] sm:$0xff] }
 0x315   : >> { %3581 = vmatpush.bf16.msra.mxu1 %v6741_v48 }
 0x316   : >> { %v2607_v54 = vsel %vm1107_vm0, %v2605_v43, %v2606_v28  ;;  %v2223_v14 = vpop.f32.mrf.mxu2  ;;  %v6764_v43 = vld [vmem:[%s7477_s28 + $0x540] sm:$0xff] }
 0x317   : >> { %v7711_v3 = vadd.f32 %v2607_v54, %v2220_v34  ;;  %v2224_v18 = vadd.f32 %v2223_v14, %v7640_v10  ;;  %v2464_v7 = vpop.f32.mrf.mxu3  ;;  %v6754_v34 = vld [vmem:[%s7477_s28 + $0x4f0] sm:$0xff]  ;;  %v6763_v14 = vld [vmem:[%s7477_s28 + $0x538] sm:$0xff] }
 0x318   : >> { %v2514_v0 = vadd.f32 %v2513_v62, %v2464_v7  ;;  %v2515_v12 = vpop.f32.mrf.mxu0  ;;  %3617 = vmatpush.bf16.msrb.mxu2 %v6754_v34  ;;  %v6753_v62 = vld [vmem:[%s7477_s28 + $0x4e8] sm:$0xff]  ;;  %3657 = vmatpush.bf16.msrb.mxu3 %v6763_v14 }
 0x319   : >> { %3582 = vmatpush.bf16.msra.mxu1 %v6740_v46  ;;  %v6779_v46 = vld [vmem:[%s7477_s28 + $0x5b8] sm:$0xff] }
 0x31a   : >> { %v2563_v9 = vadd.f32 %v2562_v6, %v2514_v0  ;;  %v6752_v6 = vld [vmem:[%s7477_s28 + $0x4e0] sm:$0xff] }
 0x31b   : >> { %v2564_v20 = vpop.f32.mrf.mxu1 }
 0x31c   : >> { %v2608_v10 = vrot.slane %v2563_v9, 1  ;;  %3618 = vmatpush.bf16.msrb.mxu2 %v6753_v62  ;;  %3658 = vmatpush.bf16.msrb.mxu3 %v6762_v63 }
 0x31d   : >> { %3942 = vmatpush.bf16.msrb.mxu1 %v6779_v46 }
 0x31e   : >> { %v2225_v33 = vpop.f32.mrf.mxu2 }
 0x31f   : >> { %v2466_v61 = vpop.f32.mrf.mxu3  ;;  %v6750_v33 = vld [vmem:[%s7477_s28 + $0x4d0] sm:$0xff] }
 0x320   : >> { %v2516_v17 = vadd.f32 %v2515_v12, %v2466_v61  ;;  %v2518_v29 = vpop.f32.mrf.mxu0  ;;  %3619 = vmatpush.bf16.msrb.mxu2 %v6752_v6  ;;  %3659 = vmatpush.bf16.msrb.mxu3 %v6761_v30 }
 0x322   : >> { %v2565_v24 = vadd.f32 %v2564_v20, %v2516_v17 }
 0x323   : >> { %v2567_v56 = vpop.f32.mrf.mxu1  ;;  %2866 = vmatmul.bf16.gmra.mxu2 %v7551_v8  ;;  %2964 = vmatmul.bf16.gmra.mxu0 %v7643_v52  ;;  %v6768_v52 = vld [vmem:[%s7477_s28 + $0x560] sm:$0xff] }
 0x324   : >> { %v2609_v36 = vrot.slane %v2565_v24, 1  ;;  %2915 = vmatmul.bf16.gmra.mxu3 %v7553_v16  ;;  %3896 = vmatpush.bf16.msrb.mxu0 %v6768_v52  ;;  %v6759_v52 = vld [vmem:[%s7477_s28 + $0x518] sm:$0xff] }
 0x326   : >> { %v2610_v2 = vsel %vm1107_vm0, %v2608_v10, %v2609_v36  ;;  %v2227_v37 = vpop.f32.mrf.mxu2  ;;  %v6748_v36 = vld [vmem:[%s7477_s28 + $0x4c0] sm:$0xff] }
 0x327   : >> { %v7722_v57 = vadd.f32 %v2610_v2, %v2224_v18  ;;  %v2228_v21 = vadd.f32 %v2227_v37, %v7651_v50  ;;  %v2469_v26 = vpop.f32.mrf.mxu3  ;;  %v6751_v18 = vld [vmem:[%s7477_s28 + $0x4d8] sm:$0xff]  ;;  %v6760_v2 = vld [vmem:[%s7477_s28 + $0x520] sm:$0xff] }
 0x328   : >> { %v2519_v22 = vadd.f32 %v2518_v29, %v2469_v26  ;;  %v2520_v8 = vpop.f32.mrf.mxu0  ;;  %3897 = vmatpush.bf16.msrb.mxu0 %v6767_v4  ;;  %3620 = vmatpush.bf16.msrb.mxu2 %v6751_v18  ;;  %v7760_v4 = vld [vmem:[%s7677_s7 + $0x1] ss:$0 sm:$0xff] }
 0x329   : >> { %3660 = vmatpush.bf16.msrb.mxu3 %v6760_v2 }
 0x32a   : >> { %v2568_v23 = vadd.f32 %v2567_v56, %v2519_v22  ;;  %v6749_v56 = vld [vmem:[%s7477_s28 + $0x4c8] sm:$0xff] }
 0x32b   : >> { %v2569_v32 = vpop.f32.mrf.mxu1 }
 0x32c   : >> { %v2611_v11 = vrot.slane %v2568_v23, 1  ;;  %3898 = vmatpush.bf16.msrb.mxu0 %v6766_v41  ;;  %3621 = vmatpush.bf16.msrb.mxu2 %v6750_v33  ;;  %v6757_v41 = vld [vmem:[%s7477_s28 + $0x508] sm:$0xff] }
 0x32d   : >> { %3661 = vmatpush.bf16.msrb.mxu3 %v6759_v52  ;;  %v3145_v52 = vld [vmem:[#allocation2 + $0x10] sm:$0xf] }
 0x32e   : >> { %v2229_v16 = vpop.f32.mrf.mxu2 }
 0x32f   : >> { %v2471_v27 = vpop.f32.mrf.mxu3 }
 0x330   : >> { %v2521_v39 = vadd.f32 %v2520_v8, %v2471_v27  ;;  %v2523_v51 = vpop.f32.mrf.mxu0  ;;  %3622 = vmatpush.bf16.msrb.mxu2 %v6749_v56 }
 0x331   : >> { %3662 = vmatpush.bf16.msrb.mxu3 %v6758_v44 }
 0x332   : >> { %v2570_v50 = vadd.f32 %v2569_v32, %v2521_v39 }
 0x333   : >> { %2871 = vmatmul.bf16.gmra.mxu2 %v7568_v55  ;;  %2969 = vmatmul.bf16.gmra.mxu0 %v7653_v45  ;;  %v2572_v40 = vpop.f32.mrf.mxu1  ;;  %v7735_v55 = vld [vmem:[#allocation2] sm:$0xff] }
 0x334   : >> { %v2612_v19 = vrot.slane %v2570_v50, 1  ;;  %2920 = vmatmul.bf16.gmra.mxu3 %v7570_v15  ;;  %v6765_v15 = vld [vmem:[%s7477_s28 + $0x548] sm:$0xff]  ;;  %3583 = vmatmul.bf16.vlgmr.msra.gmra.mxu1 %v7735_v55 }
 0x335   : >> { %3899 = vmatpush.bf16.msrb.mxu0 %v6765_v15  ;;  %3623 = vmatpush.bf16.msrb.mxu2 %v6748_v36 }
 0x336   : >> { %v2613_v1 = vsel %vm1107_vm0, %v2611_v11, %v2612_v19  ;;  %v2231_v42 = vpop.f32.mrf.mxu2  ;;  %3663 = vmatpush.bf16.msrb.mxu3 %v6757_v41 }
 0x337   : >> { %v7737_v45 = vadd.f32 %v2613_v1, %v2228_v21  ;;  %v2232_v49 = vadd.f32 %v2231_v42, %v7661_v5  ;;  %v2474_v38 = vpop.f32.mrf.mxu3  ;;  %v6756_v1 = vld [vmem:[%s7477_s28 + $0x500] sm:$0xff] }
 0x338   : >> { %v2524_v59 = vadd.f32 %v2523_v51, %v2474_v38  ;;  %v2525_v53 = vpop.f32.mrf.mxu0 }
 0x339   : >> { %3900 = vmatpush.bf16.msrb.mxu0 %v6764_v43  ;;  %v1740_v43 = vld [vmem:[#allocation2 + $0x8] sm:$0xf] }
 0x33a   : >> { %v2573_v7 = vadd.f32 %v2572_v40, %v2524_v59  ;;  %3664 = vmatpush.bf16.msrb.mxu3 %v6756_v1 }
 0x33b   : >> { %v2574_v5 = vpop.f32.mrf.mxu1 }
 0x33c   : >> { %v2614_v61 = vrot.slane %v2573_v7, 1 }
 0x33e   : >> { %v2233_v28 = vpop.f32.mrf.mxu2 }
 0x33f   : >> { %v2476_v54 = vpop.f32.mrf.mxu3  ;;  %v3142_v28 = vld [vmem:[#allocation2 + $0xc] sm:$0x1] }
 0x340   : >> { %v2526_v0 = vadd.f32 %v2525_v53, %v2476_v54  ;;  %v2935_v12 = vpop.f32.mrf.mxu0 }
 0x342   : >> { %v2575_v20 = vadd.f32 %v2574_v5, %v2526_v0 }
 0x343   : >> { %3901 = vmatmul.bf16.vlgmr.msrb.gmra.mxu0 %v7735_v55 }
 0x344   : >> { %v2615_v9 = vrot.slane %v2575_v20, 1 }
 0x346   : >> { %v2616_v17 = vsel %vm1107_vm0, %v2614_v61, %v2615_v9  ;;  %v2837_v29 = vpop.f32.mrf.mxu2  ;;  %v6778_v9 = vld [vmem:[%s7477_s28 + $0x5b0] sm:$0xff] }
 0x347   : >> { %v7751_v48 = vadd.f32 %v2616_v17, %v2232_v49  ;;  %v2886_v24 = vpop.f32.mrf.mxu3  ;;  %3943 = vmatpush.bf16.msrb.mxu1 %v6778_v9 }
 0x348   : >> { %v2937_v10 = vpop.f32.mrf.mxu0  ;;  %v2887_v37 = vadd.f32 %v2886_v24, %v2837_v29 }
 0x34a   : >> { %v2936_v26 = vadd.f32 %v2935_v12, %v2887_v37 }
 0x34c   : >> { %v2991_v16 = vrot.slane %v2936_v26, 2 }
 0x34e   : >> { %v2839_v35 = vpop.f32.mrf.mxu2 }
 0x34f   : >> { %v2888_v21 = vpop.f32.mrf.mxu3 }
 0x350   : >> { %v2889_v22 = vadd.f32 %v2888_v21, %v2839_v35  ;;  %v2940_v8 = vpop.f32.mrf.mxu0 }
 0x352   : >> { %v2938_v32 = vadd.f32 %v2937_v10, %v2889_v22 }
 0x354   : >> { %v2992_v27 = vrot.slane %v2938_v32, 2  ;;  %v3148_v32 = vld [vmem:[#allocation2 + $0x14] sm:$0x1] }
 0x356   : >> { %v2993_v23 = vsel %vm1504_vm1, %v2991_v16, %v2992_v27  ;;  %v2842_v39 = vpop.f32.mrf.mxu2 }
 0x357   : >> { %v3023_v51 = vadd.f32 %v2993_v23, %v7679_v47  ;;  %v2891_v50 = vpop.f32.mrf.mxu3 }
 0x358   : >> { %v2942_v34 = vpop.f32.mrf.mxu0  ;;  %v2892_v40 = vadd.f32 %v2891_v50, %v2842_v39 }
 0x359   : >> { %v3036_v11 = vadd.f32 %v7760_v4, %v3023_v51 }
 0x35a   : >> { %v2941_v15 = vadd.f32 %v2940_v8, %v2892_v40 }
 0x35b   : >> { %v3044_v19 = vmax.f32 %v3036_v11, 0.0 }
 0x35c   : >> { %v2994_v18 = vrot.slane %v2941_v15, 2 }
 0x35d   : >> { %v3052_v42 = vpack.c.bf16 %v3044_v19, %v3044_v19  ;;  %v6777_v19 = vld [vmem:[%s7477_s28 + $0x5a8] sm:$0xff] }
 0x35e   : >> { %v2844_v49 = vpop.f32.mrf.mxu2  ;;  %3944 = vmatpush.bf16.msrb.mxu1 %v6777_v19 }
 0x35f   : >> { %v3061_v38 = vshrl.u32 %v3052_v42, 16  ;;  %v2893_v62 = vpop.f32.mrf.mxu3  ;;  %v3064_v6 = vshll.u32 %v3052_v42, 16 }
 0x360   : >> { %v2894_v59 = vadd.f32 %v2893_v62, %v2844_v49  ;;  %v2945_v53 = vpop.f32.mrf.mxu0 }
 0x361   : >> { %v3063_v47 = vrot.slane %v3061_v38, 7 }
 0x362   : >> { %v2943_v54 = vadd.f32 %v2942_v34, %v2894_v59 }
 0x363   : >> { %v3066_v5 = vor.u32 %v3064_v6, %v3063_v47  ;;  %v3067_v14 = vrot.slane %v3063_v47, 4 }
 0x364   : >> { %v2995_v7 = vrot.slane %v2943_v54, 2 }
 0x365   : >> { %v3140_v0 = vsel %vm7389_vm6, %v3066_v5, %v1740_v43  ;;  %v3143_v12 = vsel %vm7394_vm7, %v3067_v14, %v3142_v28  ;;  %v3151_v14 = vld [vmem:[#allocation2 + $0x18] sm:$0xf] }
 0x366   : >> { %3141 = vst [vmem:[#allocation2 + $0x8] sm:$0xf] %v3140_v0  ;;  %v2996_v20 = vsel %vm1504_vm1, %v2994_v18, %v2995_v7  ;;  %v2847_v33 = vpop.f32.mrf.mxu2  ;;  %v3154_v18 = vld [vmem:[#allocation2 + $0x1c] sm:$0x1] }
 0x367   : >> { %3144 = vst [vmem:[#allocation2 + $0xc] sm:$0x1] %v3143_v12  ;;  %v3024_v63 = vadd.f32 %v2996_v20, %v7687_v58  ;;  %v2896_v61 = vpop.f32.mrf.mxu3 }
 0x368   : >> { %v2947_v17 = vpop.f32.mrf.mxu0  ;;  %v2897_v56 = vadd.f32 %v2896_v61, %v2847_v33 }
 0x369   : >> { %v3037_v29 = vadd.f32 %v7760_v4, %v3024_v63 }
 0x36a   : >> { %v2946_v21 = vadd.f32 %v2945_v53, %v2897_v56  ;;  %v6776_v56 = vld [vmem:[%s7477_s28 + $0x5a0] sm:$0xff] }
 0x36b   : >> { %v3045_v24 = vmax.f32 %v3037_v29, 0.0  ;;  %3945 = vmatpush.bf16.msrb.mxu1 %v6776_v56 }
 0x36c   : >> { %v2997_v23 = vrot.slane %v2946_v21, 2 }
 0x36d   : >> { %v3053_v30 = vpack.c.bf16 %v3045_v24, %v3045_v24 }
 0x36e   : >> { %v2849_v10 = vpop.f32.mrf.mxu2  ;;  %v7776_v36 = vld [vmem:[#allocation2 + $0x8] sm:$0xff] }
 0x36f   : >> { %v7778_v2 = vld [vmem:[#allocation2 + $0x8] sm:$0xff]  ;;  %v3069_v37 = vshrl.u32 %v3053_v30, 16  ;;  %v2898_v35 = vpop.f32.mrf.mxu3  ;;  %3587 = vmatmul.bf16.gmra.mxu1 %v7776_v36  ;;  %v3072_v8 = vshll.u32 %v3053_v30, 16  ;;  %3906 = vmatmul.bf16.gmra.mxu0 %v7776_v36 }
 0x370   : >> { %v2899_v26 = vadd.f32 %v2898_v35, %v2849_v10  ;;  %3624 = vmatmul.bf16.vlgmr.msrb.gmra.mxu2 %v7778_v2  ;;  %v2950_v58 = vpop.f32.mrf.mxu0 }
 0x371   : >> { %v3071_v22 = vrot.slane %v3069_v37, 7 }
 0x372   : >> { %v2948_v16 = vadd.f32 %v2947_v17, %v2899_v26 }
 0x373   : >> { %v3074_v27 = vor.u32 %v3072_v8, %v3071_v22  ;;  %v3075_v44 = vrot.slane %v3071_v22, 4 }
 0x374   : >> { %v2998_v39 = vrot.slane %v2948_v16, 2 }
 0x375   : >> { %v3146_v51 = vsel %vm7389_vm6, %v3074_v27, %v3145_v52  ;;  %v3149_v50 = vsel %vm7394_vm7, %v3075_v44, %v3148_v32 }
 0x376   : >> { %3147 = vst [vmem:[#allocation2 + $0x10] sm:$0xf] %v3146_v51  ;;  %v2999_v46 = vsel %vm1504_vm1, %v2997_v23, %v2998_v39  ;;  %v2852_v34 = vpop.f32.mrf.mxu2  ;;  %v3157_v39 = vld [vmem:[#allocation2 + $0x20] sm:$0xf]  ;;  %v3160_v51 = vld [vmem:[#allocation2 + $0x24] sm:$0x1] }
 0x377   : >> { %3150 = vst [vmem:[#allocation2 + $0x14] sm:$0x1] %v3149_v50  ;;  %v3025_v41 = vadd.f32 %v2999_v46, %v7695_v25  ;;  %v2901_v11 = vpop.f32.mrf.mxu3 }
 0x378   : >> { %v2952_v40 = vpop.f32.mrf.mxu0  ;;  %v2902_v49 = vadd.f32 %v2901_v11, %v2852_v34 }
 0x379   : >> { %v3038_v1 = vadd.f32 %v7760_v4, %v3025_v41 }
 0x37a   : >> { %v2951_v43 = vadd.f32 %v2950_v58, %v2902_v49 }
 0x37b   : >> { %v3046_v42 = vmax.f32 %v3038_v1, 0.0 }
 0x37c   : >> { %v3000_v20 = vrot.slane %v2951_v43, 2 }
 0x37d   : >> { %v3054_v38 = vpack.c.bf16 %v3046_v42, %v3046_v42 }
 0x37e   : >> { %v2854_v62 = vpop.f32.mrf.mxu2  ;;  %v7791_v15 = vld [vmem:[#allocation2 + $0x10] sm:$0xff] }
 0x37f   : >> { %v7793_v59 = vld [vmem:[#allocation2 + $0x10] sm:$0xff]  ;;  %v3077_v47 = vshrl.u32 %v3054_v38, 16  ;;  %v2903_v6 = vpop.f32.mrf.mxu3  ;;  %3591 = vmatmul.bf16.gmra.mxu1 %v7791_v15  ;;  %v3080_v5 = vshll.u32 %v3054_v38, 16  ;;  %3911 = vmatmul.bf16.gmra.mxu0 %v7791_v15 }
 0x380   : >> { %v7795_v53 = vld [vmem:[#allocation2 + $0x10] sm:$0xff]  ;;  %v2904_v25 = vadd.f32 %v2903_v6, %v2854_v62  ;;  %3628 = vmatmul.bf16.gmra.mxu2 %v7793_v59  ;;  %v2955_v28 = vpop.f32.mrf.mxu0  ;;  %v6775_v62 = vld [vmem:[%s7477_s28 + $0x598] sm:$0xff] }
 0x381   : >> { %v3079_v54 = vrot.slane %v3077_v47, 7  ;;  %3665 = vmatmul.bf16.vlgmr.msrb.gmra.mxu3 %v7795_v53  ;;  %3946 = vmatpush.bf16.msrb.mxu1 %v6775_v62  ;;  %v6799_v62 = vld [vmem:[%s7477_s28 + $0x658] sm:$0xff] }
 0x382   : >> { %v2953_v7 = vadd.f32 %v2952_v40, %v2904_v25 }
 0x383   : >> { %v3082_v0 = vor.u32 %v3080_v5, %v3079_v54  ;;  %v3083_v12 = vrot.slane %v3079_v54, 4 }
 0x384   : >> { %v3001_v33 = vrot.slane %v2953_v7, 2 }
 0x385   : >> { %v3152_v63 = vsel %vm7389_vm6, %v3082_v0, %v3151_v14  ;;  %v3155_v61 = vsel %vm7394_vm7, %v3083_v12, %v3154_v18 }
 0x386   : >> { %3153 = vst [vmem:[#allocation2 + $0x18] sm:$0xf] %v3152_v63  ;;  %v3002_v9 = vsel %vm1504_vm1, %v3000_v20, %v3001_v33  ;;  %v2857_v17 = vpop.f32.mrf.mxu2  ;;  %v6803_v20 = vld [vmem:[%s7477_s28 + $0x678] sm:$0xff] }
 0x387   : >> { %3156 = vst [vmem:[#allocation2 + $0x1c] sm:$0x1] %v3155_v61  ;;  %v3026_v29 = vadd.f32 %v3002_v9, %v7703_v13  ;;  %v2906_v24 = vpop.f32.mrf.mxu3  ;;  %v3163_v61 = vld [vmem:[#allocation2 + $0x28] sm:$0xf]  ;;  %v3166_v9 = vld [vmem:[#allocation2 + $0x2c] sm:$0x1]  ;;  %4340 = vmatpush.bf16.msra.mxu0 %v6803_v20 }
 0x388   : >> { %v2957_v30 = vpop.f32.mrf.mxu0  ;;  %v2907_v35 = vadd.f32 %v2906_v24, %v2857_v17  ;;  %v6798_v20 = vld [vmem:[%s7477_s28 + $0x650] sm:$0xff] }
 0x389   : >> { %v3039_v10 = vadd.f32 %v7760_v4, %v3026_v29 }
 0x38a   : >> { %v2956_v16 = vadd.f32 %v2955_v28, %v2907_v35 }
 0x38b   : >> { %v3047_v37 = vmax.f32 %v3039_v10, 0.0 }
 0x38c   : >> { %v3003_v41 = vrot.slane %v2956_v16, 2 }
 0x38d   : >> { %v3055_v21 = vpack.c.bf16 %v3047_v37, %v3047_v37  ;;  %v6802_v37 = vld [vmem:[%s7477_s28 + $0x670] sm:$0xff] }
 0x38e   : >> { %v2859_v26 = vpop.f32.mrf.mxu2  ;;  %v7809_v58 = vld [vmem:[#allocation2 + $0x18] sm:$0xff]  ;;  %4341 = vmatpush.bf16.msra.mxu0 %v6802_v37  ;;  %v6785_v37 = vld [vmem:[%s7477_s28 + $0x5e8] sm:$0xff] }
 0x38f   : >> { %v7811_v22 = vld [vmem:[#allocation2 + $0x18] sm:$0xff]  ;;  %v3085_v52 = vshrl.u32 %v3055_v21, 16  ;;  %v2908_v32 = vpop.f32.mrf.mxu3  ;;  %3595 = vmatmul.bf16.gmra.mxu1 %v7809_v58  ;;  %v3088_v23 = vshll.u32 %v3055_v21, 16  ;;  %3916 = vmatmul.bf16.gmra.mxu0 %v7809_v58 }
 0x390   : >> { %v7813_v8 = vld [vmem:[#allocation2 + $0x18] sm:$0xff]  ;;  %v2909_v13 = vadd.f32 %v2908_v32, %v2859_v26  ;;  %3632 = vmatmul.bf16.gmra.mxu2 %v7811_v22  ;;  %v2960_v27 = vpop.f32.mrf.mxu0 }
 0x391   : >> { %v3087_v44 = vrot.slane %v3085_v52, 7  ;;  %3669 = vmatmul.bf16.gmra.mxu3 %v7813_v8 }
 0x392   : >> { %v2958_v50 = vadd.f32 %v2957_v30, %v2909_v13  ;;  %v6774_v13 = vld [vmem:[%s7477_s28 + $0x590] sm:$0xff] }
 0x393   : >> { %v3090_v46 = vor.u32 %v3088_v23, %v3087_v44  ;;  %v3091_v34 = vrot.slane %v3087_v44, 4  ;;  %3947 = vmatpush.bf16.msrb.mxu1 %v6774_v13  ;;  %v6773_v23 = vld [vmem:[%s7477_s28 + $0x588] sm:$0xff] }
 0x394   : >> { %v3004_v11 = vrot.slane %v2958_v50, 2  ;;  %v6800_v50 = vld [vmem:[%s7477_s28 + $0x660] sm:$0xff] }
 0x395   : >> { %v3158_v19 = vsel %vm7389_vm6, %v3090_v46, %v3157_v39  ;;  %v3161_v40 = vsel %vm7394_vm7, %v3091_v34, %v3160_v51 }
 0x396   : >> { %3159 = vst [vmem:[#allocation2 + $0x20] sm:$0xf] %v3158_v19  ;;  %v3005_v1 = vsel %vm1504_vm1, %v3003_v41, %v3004_v11  ;;  %v2862_v42 = vpop.f32.mrf.mxu2 }
 0x397   : >> { %3162 = vst [vmem:[#allocation2 + $0x24] sm:$0x1] %v3161_v40  ;;  %v3027_v49 = vadd.f32 %v3005_v1, %v7711_v3  ;;  %v2911_v38 = vpop.f32.mrf.mxu3  ;;  %3948 = vmatpush.bf16.msrb.mxu1 %v6773_v23 }
 0x398   : >> { %v2962_v6 = vpop.f32.mrf.mxu0  ;;  %v2912_v25 = vadd.f32 %v2911_v38, %v2862_v42  ;;  %v6787_v38 = vld [vmem:[%s7477_s28 + $0x5f8] sm:$0xff] }
 0x399   : >> { %v3040_v47 = vadd.f32 %v7760_v4, %v3027_v49  ;;  %3991 = vmatpush.bf16.msra.mxu2 %v6787_v38  ;;  %v6794_v38 = vld [vmem:[%s7477_s28 + $0x630] sm:$0xff] }
 0x39a   : >> { %v2961_v3 = vadd.f32 %v2960_v27, %v2912_v25  ;;  %v6801_v27 = vld [vmem:[%s7477_s28 + $0x668] sm:$0xff]  ;;  %v3172_v25 = vld [vmem:[#allocation2 + $0x34] sm:$0x1] }
 0x39b   : >> { %v3048_v43 = vmax.f32 %v3040_v47, 0.0  ;;  %4342 = vmatpush.bf16.msra.mxu0 %v6801_v27 }
 0x39c   : >> { %v3006_v30 = vrot.slane %v2961_v3, 2 }
 0x39d   : >> { %v3056_v28 = vpack.c.bf16 %v3048_v43, %v3048_v43  ;;  %v3169_v43 = vld [vmem:[#allocation2 + $0x30] sm:$0xf] }
 0x39e   : >> { %v2864_v54 = vpop.f32.mrf.mxu2  ;;  %v7827_v5 = vld [vmem:[#allocation2 + $0x20] sm:$0xff] }
 0x39f   : >> { %v7829_v14 = vld [vmem:[#allocation2 + $0x20] sm:$0xff]  ;;  %v3093_v7 = vshrl.u32 %v3056_v28, 16  ;;  %v2913_v0 = vpop.f32.mrf.mxu3  ;;  %3599 = vmatmul.bf16.gmra.mxu1 %v7827_v5  ;;  %v3096_v63 = vshll.u32 %v3056_v28, 16  ;;  %3921 = vmatmul.bf16.gmra.mxu0 %v7827_v5 }
 0x3a0   : >> { %v7831_v18 = vld [vmem:[#allocation2 + $0x20] sm:$0xff]  ;;  %v2914_v12 = vadd.f32 %v2913_v0, %v2864_v54  ;;  %3636 = vmatmul.bf16.gmra.mxu2 %v7829_v14  ;;  %v2965_v56 = vpop.f32.mrf.mxu0  ;;  %4343 = vmatpush.bf16.msra.mxu0 %v6800_v50 }
 0x3a1   : >> { %v3095_v33 = vrot.slane %v3093_v7, 7  ;;  %3673 = vmatmul.bf16.gmra.mxu3 %v7831_v18 }
 0x3a2   : >> { %v2963_v17 = vadd.f32 %v2962_v6, %v2914_v12  ;;  %v6786_v12 = vld [vmem:[%s7477_s28 + $0x5f0] sm:$0xff] }
 0x3a3   : >> { %v3098_v29 = vor.u32 %v3096_v63, %v3095_v33  ;;  %v3099_v24 = vrot.slane %v3095_v33, 4  ;;  %3992 = vmatpush.bf16.msra.mxu2 %v6786_v12 }
 0x3a4   : >> { %v3007_v10 = vrot.slane %v2963_v17, 2  ;;  %4344 = vmatpush.bf16.msra.mxu0 %v6799_v62  ;;  %v3175_v62 = vld [vmem:[#allocation2 + $0x38] sm:$0xf] }
 0x3a5   : >> { %v3164_v35 = vsel %vm7389_vm6, %v3098_v29, %v3163_v61  ;;  %v3167_v21 = vsel %vm7394_vm7, %v3099_v24, %v3166_v9 }
 0x3a6   : >> { %3165 = vst [vmem:[#allocation2 + $0x28] sm:$0xf] %v3164_v35  ;;  %v3008_v26 = vsel %vm1504_vm1, %v3006_v30, %v3007_v10  ;;  %v2867_v52 = vpop.f32.mrf.mxu2  ;;  %v6772_v30 = vld [vmem:[%s7477_s28 + $0x580] sm:$0xff]  ;;  %v6795_v10 = vld [vmem:[%s7477_s28 + $0x638] sm:$0xff]  ;;  %v6797_v35 = vld [vmem:[%s7477_s28 + $0x648] sm:$0xff] }
 0x3a7   : >> { %3168 = vst [vmem:[#allocation2 + $0x2c] sm:$0x1] %v3167_v21  ;;  %v3028_v32 = vadd.f32 %v3008_v26, %v7722_v57  ;;  %v2916_v16 = vpop.f32.mrf.mxu3  ;;  %3949 = vmatpush.bf16.msrb.mxu1 %v6772_v30  ;;  %4291 = vmatpush.bf16.msra.mxu3 %v6795_v10 }
 0x3a8   : >> { %v2917_v51 = vadd.f32 %v2916_v16, %v2867_v52  ;;  %v2967_v34 = vpop.f32.mrf.mxu0  ;;  %4345 = vmatpush.bf16.msra.mxu0 %v6798_v20  ;;  %3993 = vmatpush.bf16.msra.mxu2 %v6785_v37  ;;  %v6784_v52 = vld [vmem:[%s7477_s28 + $0x5e0] sm:$0xff] }
 0x3a9   : >> { %v3041_v44 = vadd.f32 %v7760_v4, %v3028_v32  ;;  %v6796_v32 = vld [vmem:[%s7477_s28 + $0x640] sm:$0xff] }
 0x3aa   : >> { %v2966_v42 = vadd.f32 %v2965_v56, %v2917_v51 }
 0x3ab   : >> { %v3049_v39 = vmax.f32 %v3041_v44, 0.0  ;;  %4292 = vmatpush.bf16.msra.mxu3 %v6794_v38 }
 0x3ac   : >> { %v3009_v0 = vrot.slane %v2966_v42, 2  ;;  %4346 = vmatpush.bf16.msra.mxu0 %v6797_v35  ;;  %3994 = vmatpush.bf16.msra.mxu2 %v6784_v52  ;;  %v3181_v52 = vld [vmem:[#allocation2 + $0x40] sm:$0xf] }
 0x3ad   : >> { %v3057_v46 = vpack.c.bf16 %v3049_v39, %v3049_v39 }
 0x3ae   : >> { %v2869_v41 = vpop.f32.mrf.mxu2  ;;  %v7850_v11 = vld [vmem:[#allocation2 + $0x28] sm:$0xff] }
 0x3af   : >> { %v7852_v57 = vld [vmem:[#allocation2 + $0x28] sm:$0xff]  ;;  %v3101_v40 = vshrl.u32 %v3057_v46, 16  ;;  %v2918_v1 = vpop.f32.mrf.mxu3  ;;  %3603 = vmatmul.bf16.gmra.mxu1 %v7850_v11  ;;  %v3104_v6 = vshll.u32 %v3057_v46, 16  ;;  %3926 = vmatmul.bf16.gmra.mxu0 %v7850_v11 }
 0x3b0   : >> { %v7854_v19 = vld [vmem:[#allocation2 + $0x28] sm:$0xff]  ;;  %v2919_v49 = vadd.f32 %v2918_v1, %v2869_v41  ;;  %3640 = vmatmul.bf16.gmra.mxu2 %v7852_v57  ;;  %v2970_v61 = vpop.f32.mrf.mxu0  ;;  %4347 = vmatpush.bf16.msra.mxu0 %v6796_v32  ;;  %v3184_v32 = vld [vmem:[#allocation2 + $0x44] sm:$0x1] }
 0x3b1   : >> { %v3103_v47 = vrot.slane %v3101_v40, 7  ;;  %3677 = vmatmul.bf16.gmra.mxu3 %v7854_v19  ;;  %v7869_v29 = vpop.f32.mrf.mxu1  ;;  %v6783_v40 = vld [vmem:[%s7477_s28 + $0x5d8] sm:$0xff] }
 0x3b2   : >> { %v2968_v28 = vadd.f32 %v2967_v34, %v2919_v49  ;;  %v6811_v49 = vld [vmem:[%s7477_s28 + $0x6b8] sm:$0xff]  ;;  %3995 = vmatpush.bf16.msra.mxu2 %v6783_v40  ;;  %v6809_v40 = vld [vmem:[%s7477_s28 + $0x6a8] sm:$0xff] }
 0x3b3   : >> { %v3106_v54 = vor.u32 %v3104_v6, %v3103_v47  ;;  %v3107_v7 = vrot.slane %v3103_v47, 4  ;;  %v3178_v47 = vld [vmem:[#allocation2 + $0x3c] sm:$0x1]  ;;  %4389 = vmatpush.bf16.msra.mxu1 %v6811_v49  ;;  %v6808_v49 = vld [vmem:[%s7477_s28 + $0x6a0] sm:$0xff] }
 0x3b4   : >> { %v3010_v3 = vrot.slane %v2968_v28, 2 }
 0x3b5   : >> { %v3170_v33 = vsel %vm7389_vm6, %v3106_v54, %v3169_v43  ;;  %v3173_v63 = vsel %vm7394_vm7, %v3107_v7, %v3172_v25  ;;  %v6782_v25 = vld [vmem:[%s7477_s28 + $0x5d0] sm:$0xff]  ;;  %v6793_v7 = vld [vmem:[%s7477_s28 + $0x628] sm:$0xff] }
 0x3b6   : >> { %3171 = vst [vmem:[#allocation2 + $0x30] sm:$0xf] %v3170_v33  ;;  %v3011_v9 = vsel %vm1504_vm1, %v3009_v0, %v3010_v3  ;;  %v2872_v17 = vpop.f32.mrf.mxu2  ;;  %3996 = vmatpush.bf16.msra.mxu2 %v6782_v25  ;;  %v6781_v33 = vld [vmem:[%s7477_s28 + $0x5c8] sm:$0xff]  ;;  %4293 = vmatpush.bf16.msra.mxu3 %v6793_v7 }
 0x3b7   : >> { %3174 = vst [vmem:[#allocation2 + $0x34] sm:$0x1] %v3173_v63  ;;  %v3029_v24 = vadd.f32 %v3011_v9, %v7737_v45  ;;  %v2921_v56 = vpop.f32.mrf.mxu3 }
 0x3b8   : >> { %v2922_v26 = vadd.f32 %v2921_v56, %v2872_v17  ;;  %v2972_v34 = vpop.f32.mrf.mxu0  ;;  %v6780_v17 = vld [vmem:[%s7477_s28 + $0x5c0] sm:$0xff] }
 0x3b9   : >> { %v3042_v21 = vadd.f32 %v7760_v4, %v3029_v24  ;;  %v3586_v51 = vpop.f32.mrf.mxu1  ;;  %v6792_v24 = vld [vmem:[%s7477_s28 + $0x620] sm:$0xff] }
 0x3ba   : >> { %v2971_v27 = vadd.f32 %v2970_v61, %v2922_v26  ;;  %3997 = vmatpush.bf16.msra.mxu2 %v6781_v33  ;;  %4294 = vmatpush.bf16.msra.mxu3 %v6792_v24  ;;  %v6810_v26 = vld [vmem:[%s7477_s28 + $0x6b0] sm:$0xff] }
 0x3bb   : >> { %v3050_v16 = vmax.f32 %v3042_v21, 0.0  ;;  %4390 = vmatpush.bf16.msra.mxu1 %v6810_v26 }
 0x3bc   : >> { %v3012_v6 = vrot.slane %v2971_v27, 2  ;;  %v6790_v27 = vld [vmem:[%s7477_s28 + $0x610] sm:$0xff] }
 0x3bd   : >> { %v3058_v13 = vpack.c.bf16 %v3050_v16, %v3050_v16 }
 0x3be   : >> { %v2874_v44 = vpop.f32.mrf.mxu2  ;;  %v7879_v45 = vld [vmem:[#allocation2 + $0x30] sm:$0xff]  ;;  %3998 = vmatpush.bf16.msra.mxu2 %v6780_v17 }
 0x3bf   : >> { %v7881_v23 = vld [vmem:[#allocation2 + $0x30] sm:$0xff]  ;;  %v3109_v50 = vshrl.u32 %v3058_v13, 16  ;;  %v2923_v46 = vpop.f32.mrf.mxu3  ;;  %3607 = vmatmul.bf16.gmra.mxu1 %v7879_v45  ;;  %v3112_v42 = vshll.u32 %v3058_v13, 16  ;;  %3931 = vmatmul.bf16.gmra.mxu0 %v7879_v45 }
 0x3c0   : >> { %v7883_v39 = vld [vmem:[#allocation2 + $0x30] sm:$0xff]  ;;  %v2924_v41 = vadd.f32 %v2923_v46, %v2874_v44  ;;  %3644 = vmatmul.bf16.gmra.mxu2 %v7881_v23  ;;  %v6788_v46 = vld [vmem:[%s7477_s28 + $0x600] sm:$0xff]  ;;  %4391 = vmatpush.bf16.msra.mxu1 %v6809_v40  ;;  %v7947_v7 = vpop.f32.mrf.mxu0 }
 0x3c1   : >> { %v3111_v1 = vrot.slane %v3109_v50, 7  ;;  %3681 = vmatmul.bf16.gmra.mxu3 %v7883_v39  ;;  %v6789_v50 = vld [vmem:[%s7477_s28 + $0x608] sm:$0xff] }
 0x3c2   : >> { %v2973_v43 = vadd.f32 %v2972_v34, %v2924_v41 }
 0x3c3   : >> { %v3114_v28 = vor.u32 %v3112_v42, %v3111_v1  ;;  %v3115_v54 = vrot.slane %v3111_v1, 4  ;;  %v7932_v42 = vld [vmem:[#allocation2 + $0x48] sm:$0xff] }
 0x3c4   : >> { %v3013_v0 = vrot.slane %v2973_v43, 2  ;;  %4392 = vmatpush.bf16.msra.mxu1 %v6808_v49  ;;  %v6807_v43 = vld [vmem:[%s7477_s28 + $0x698] sm:$0xff] }
 0x3c5   : >> { %v3176_v3 = vsel %vm7389_vm6, %v3114_v28, %v3175_v62  ;;  %v3179_v12 = vsel %vm7394_vm7, %v3115_v54, %v3178_v47 }
 0x3c6   : >> { %3177 = vst [vmem:[#allocation2 + $0x38] sm:$0xf] %v3176_v3  ;;  %v3014_v20 = vsel %vm1504_vm1, %v3012_v6, %v3013_v0 }
 0x3c7   : >> { %3180 = vst [vmem:[#allocation2 + $0x3c] sm:$0x1] %v3179_v12  ;;  %v3030_v63 = vadd.f32 %v3014_v20, %v7751_v48 }
 0x3c8   : >> { %4393 = vmatpush.bf16.msra.mxu1 %v6807_v43 }
 0x3c9   : >> { %v3043_v61 = vadd.f32 %v7760_v4, %v3030_v63  ;;  %v6791_v4 = vld [vmem:[%s7477_s28 + $0x618] sm:$0xff]  ;;  %v7954_v63 = vpop.f32.mrf.mxu0 }
 0x3ca   : >> { %4295 = vmatpush.bf16.msra.mxu3 %v6791_v4 }
 0x3cb   : >> { %v3051_v9 = vmax.f32 %v3043_v61, 0.0 }
 0x3cd   : >> { %v3059_v56 = vpack.c.bf16 %v3051_v9, %v3051_v9 }
 0x3ce   : >> { %v7904_v30 = vld [vmem:[#allocation2 + $0x38] sm:$0xff]  ;;  %4296 = vmatpush.bf16.msra.mxu3 %v6790_v27 }
 0x3cf   : >> { %v7906_v10 = vld [vmem:[#allocation2 + $0x38] sm:$0xff]  ;;  %v3117_v48 = vshrl.u32 %v3059_v56, 16  ;;  %3611 = vmatmul.bf16.gmra.mxu1 %v7904_v30  ;;  %v3120_v21 = vshll.u32 %v3059_v56, 16  ;;  %3936 = vmatmul.bf16.gmra.mxu0 %v7904_v30 }
 0x3d0   : >> { %v7908_v37 = vld [vmem:[#allocation2 + $0x38] sm:$0xff]  ;;  %3648 = vmatmul.bf16.gmra.mxu2 %v7906_v10 }
 0x3d1   : >> { %v3119_v35 = vrot.slane %v3117_v48, 7  ;;  %3685 = vmatmul.bf16.gmra.mxu3 %v7908_v37 }
 0x3d2   : >> { %4297 = vmatpush.bf16.msra.mxu3 %v6789_v50 }
 0x3d3   : >> { %v3122_v16 = vor.u32 %v3120_v21, %v3119_v35  ;;  %v3123_v13 = vrot.slane %v3119_v35, 4 }
 0x3d5   : >> { %v3182_v44 = vsel %vm7389_vm6, %v3122_v16, %v3181_v52  ;;  %v3185_v51 = vsel %vm7394_vm7, %v3123_v13, %v3184_v32 }
 0x3d6   : >> { %3183 = vst [vmem:[#allocation2 + $0x40] sm:$0xf] %v3182_v44  ;;  %4298 = vmatpush.bf16.msra.mxu3 %v6788_v46 }
 0x3d7   : >> { %3186 = vst [vmem:[#allocation2 + $0x44] sm:$0x1] %v3185_v51 }
 0x3de   : >> { %v7923_v34 = vld [vmem:[#allocation2 + $0x40] sm:$0xff] }
 0x3df   : >> { %v7925_v41 = vld [vmem:[#allocation2 + $0x40] sm:$0xff]  ;;  %3950 = vmatmul.bf16.vlgmr.msrb.gmra.mxu1 %v7778_v2  ;;  %4348 = vmatmul.bf16.vlgmr.msra.gmra.mxu0 %v7778_v2 }
 0x3e0   : >> { %3652 = vmatmul.bf16.gmra.mxu2 %v7923_v34 }
 0x3e1   : >> { %3689 = vmatmul.bf16.gmra.mxu3 %v7925_v41 }
 0x3ec   : >> { %v3588_v1 = vpop.f32.mrf.mxu1  ;;  %v7958_v48 = vpop.f32.mrf.mxu0 }
 0x3ef   : >> { %3955 = vmatmul.bf16.gmra.mxu1 %v7793_v59  ;;  %4353 = vmatmul.bf16.gmra.mxu0 %v7793_v59 }
 0x3f0   : >> { %3999 = vmatmul.bf16.vlgmr.msra.gmra.mxu2 %v7795_v53 }
 0x3f1   : >> { %3693 = vmatmul.bf16.gmra.mxu3 %v7932_v42 }
 0x3f3   : >> { %v3625_v38 = vpop.f32.mrf.mxu2 }
 0x3f4   : >> { %v3626_v62 = vadd.f32 %v3625_v38, %v7869_v29  ;;  %v3590_v2 = vpop.f32.mrf.mxu1  ;;  %v7967_v52 = vpop.f32.mrf.mxu0 }
 0x3fb   : >> { %v3627_v47 = vpop.f32.mrf.mxu2 }
 0x3fc   : >> { %v3592_v6 = vpop.f32.mrf.mxu1 }
 0x3ff   : >> { %3960 = vmatmul.bf16.gmra.mxu1 %v7811_v22  ;;  %4358 = vmatmul.bf16.gmra.mxu0 %v7811_v22 }
 0x400   : >> { %4004 = vmatmul.bf16.gmra.mxu2 %v7813_v8 }
 0x401   : >> { %4299 = vmatmul.bf16.vlgmr.msra.gmra.mxu3 %v7735_v55  ;;  %v6806_v55 = vld [vmem:[%s7477_s28 + $0x690] sm:$0xff] }
 0x402   : >> { %4394 = vmatpush.bf16.msra.mxu1 %v6806_v55 }
 0x403   : >> { %v3629_v25 = vpop.f32.mrf.mxu2 }
 0x404   : >> { %v3630_v59 = vadd.f32 %v3629_v25, %v3588_v1  ;;  %v3666_v28 = vpop.f32.mrf.mxu3  ;;  %v3594_v29 = vpop.f32.mrf.mxu1 }
 0x405   : >> { %v7945_v54 = vadd.f32 %v3666_v28, %v3626_v62 }
 0x40b   : >> { %v3631_v0 = vpop.f32.mrf.mxu2 }
 0x40c   : >> { %v3668_v3 = vpop.f32.mrf.mxu3  ;;  %v3596_v12 = vpop.f32.mrf.mxu1 }
 0x40f   : >> { %3965 = vmatmul.bf16.gmra.mxu1 %v7829_v14  ;;  %4363 = vmatmul.bf16.gmra.mxu0 %v7829_v14 }
 0x410   : >> { %4009 = vmatmul.bf16.gmra.mxu2 %v7831_v18 }
 0x411   : >> { %4304 = vmatmul.bf16.gmra.mxu3 %v7776_v36  ;;  %v6805_v36 = vld [vmem:[%s7477_s28 + $0x688] sm:$0xff] }
 0x412   : >> { %4395 = vmatpush.bf16.msra.mxu1 %v6805_v36 }
 0x413   : >> { %v3633_v22 = vpop.f32.mrf.mxu2 }
 0x414   : >> { %v3634_v20 = vadd.f32 %v3633_v22, %v3592_v6  ;;  %v3670_v33 = vpop.f32.mrf.mxu3  ;;  %v3598_v9 = vpop.f32.mrf.mxu1 }
 0x415   : >> { %v7956_v61 = vadd.f32 %v3670_v33, %v3630_v59 }
 0x41b   : >> { %v3635_v17 = vpop.f32.mrf.mxu2 }
 0x41c   : >> { %v3672_v24 = vpop.f32.mrf.mxu3  ;;  %v3600_v56 = vpop.f32.mrf.mxu1 }
 0x41f   : >> { %3970 = vmatmul.bf16.gmra.mxu1 %v7852_v57  ;;  %4368 = vmatmul.bf16.gmra.mxu0 %v7852_v57  ;;  %v7974_v57 = vpop.f32.mrf.mxu0 }
 0x420   : >> { %4014 = vmatmul.bf16.gmra.mxu2 %v7854_v19 }
 0x421   : >> { %4309 = vmatmul.bf16.gmra.mxu3 %v7791_v15  ;;  %v6804_v15 = vld [vmem:[%s7477_s28 + $0x680] sm:$0xff] }
 0x422   : >> { %4396 = vmatpush.bf16.msra.mxu1 %v6804_v15 }
 0x423   : >> { %v3637_v14 = vpop.f32.mrf.mxu2 }
 0x424   : >> { %v3638_v4 = vadd.f32 %v3637_v14, %v3596_v12  ;;  %v3674_v35 = vpop.f32.mrf.mxu3  ;;  %v3602_v26 = vpop.f32.mrf.mxu1 }
 0x425   : >> { %v7965_v21 = vadd.f32 %v3674_v35, %v3634_v20 }
 0x427   : >> { %v7978_v49 = vpop.f32.mrf.mxu0 }
 0x42b   : >> { %v3639_v32 = vpop.f32.mrf.mxu2 }
 0x42c   : >> { %v3676_v16 = vpop.f32.mrf.mxu3  ;;  %v3604_v13 = vpop.f32.mrf.mxu1 }
 0x42f   : >> { %3975 = vmatmul.bf16.gmra.mxu1 %v7881_v23  ;;  %4373 = vmatmul.bf16.gmra.mxu0 %v7881_v23  ;;  %v7986_v6 = vpop.f32.mrf.mxu0 }
 0x430   : >> { %4019 = vmatmul.bf16.gmra.mxu2 %v7883_v39 }
 0x431   : >> { %4314 = vmatmul.bf16.gmra.mxu3 %v7809_v58 }
 0x433   : >> { %v3641_v27 = vpop.f32.mrf.mxu2 }
 0x434   : >> { %v3642_v44 = vadd.f32 %v3641_v27, %v3600_v56  ;;  %v3678_v51 = vpop.f32.mrf.mxu3  ;;  %v3606_v46 = vpop.f32.mrf.mxu1 }
 0x435   : >> { %v7976_v50 = vadd.f32 %v3678_v51, %v3638_v4 }
 0x437   : >> { %v7990_v28 = vpop.f32.mrf.mxu0 }
 0x43b   : >> { %v3643_v40 = vpop.f32.mrf.mxu2 }
 0x43c   : >> { %v3680_v1 = vpop.f32.mrf.mxu3  ;;  %v3608_v38 = vpop.f32.mrf.mxu1 }
 0x43f   : >> { %3980 = vmatmul.bf16.gmra.mxu1 %v7906_v10  ;;  %4378 = vmatmul.bf16.gmra.mxu0 %v7906_v10  ;;  %v8001_v56 = vpop.f32.mrf.mxu0 }
 0x440   : >> { %4024 = vmatmul.bf16.gmra.mxu2 %v7908_v37 }
 0x441   : >> { %4319 = vmatmul.bf16.gmra.mxu3 %v7827_v5 }
 0x443   : >> { %v3645_v58 = vpop.f32.mrf.mxu2 }
 0x444   : >> { %v3646_v23 = vadd.f32 %v3645_v58, %v3604_v13  ;;  %v3682_v62 = vpop.f32.mrf.mxu3  ;;  %v3610_v47 = vpop.f32.mrf.mxu1 }
 0x445   : >> { %v7984_v2 = vadd.f32 %v3682_v62, %v3642_v44 }
 0x447   : >> { %v3924_v35 = vpop.f32.mrf.mxu0 }
 0x44b   : >> { %v3647_v43 = vpop.f32.mrf.mxu2 }
 0x44c   : >> { %v3684_v25 = vpop.f32.mrf.mxu3  ;;  %v3612_v59 = vpop.f32.mrf.mxu1 }
 0x44f   : >> { %3985 = vmatmul.bf16.gmra.mxu1 %v7923_v34  ;;  %4383 = vmatmul.bf16.gmra.mxu0 %v7923_v34 }
 0x450   : >> { %4029 = vmatmul.bf16.gmra.mxu2 %v7925_v41 }
 0x451   : >> { %4324 = vmatmul.bf16.gmra.mxu3 %v7850_v11 }
 0x453   : >> { %v3649_v5 = vpop.f32.mrf.mxu2 }
 0x454   : >> { %v3650_v10 = vadd.f32 %v3649_v5, %v3608_v38  ;;  %v3686_v29 = vpop.f32.mrf.mxu3  ;;  %v3614_v3 = vpop.f32.mrf.mxu1 }
 0x455   : >> { %v7994_v0 = vadd.f32 %v3686_v29, %v3646_v23 }
 0x45b   : >> { %v3651_v12 = vpop.f32.mrf.mxu2 }
 0x45c   : >> { %v3688_v55 = vpop.f32.mrf.mxu3  ;;  %v3951_v22 = vpop.f32.mrf.mxu1 }
 0x45d   : >> { %v3952_v26 = vadd.f32 %v3951_v22, %v7947_v7 }
 0x45f   : >> { %4397 = vmatmul.bf16.vlgmr.msra.gmra.mxu1 %v7795_v53 }
 0x460   : >> { %4034 = vmatmul.bf16.gmra.mxu2 %v7932_v42 }
 0x461   : >> { %4329 = vmatmul.bf16.gmra.mxu3 %v7879_v45 }
 0x463   : >> { %v3653_v20 = vpop.f32.mrf.mxu2 }
 0x464   : >> { %v3654_v33 = vadd.f32 %v3653_v20, %v3612_v59  ;;  %v3690_v11 = vpop.f32.mrf.mxu3  ;;  %v3953_v34 = vpop.f32.mrf.mxu1 }
 0x465   : >> { %v7999_v9 = vadd.f32 %v3690_v11, %v3650_v10  ;;  %v3954_v32 = vadd.f32 %v3953_v34, %v7954_v63 }
 0x46b   : >> { %v3655_v17 = vpop.f32.mrf.mxu2 }
 0x46c   : >> { %v3692_v24 = vpop.f32.mrf.mxu3  ;;  %v3956_v36 = vpop.f32.mrf.mxu1 }
 0x46d   : >> { %v3957_v63 = vadd.f32 %v3956_v36, %v7958_v48 }
 0x46f   : >> { %4402 = vmatmul.bf16.gmra.mxu1 %v7813_v8 }
 0x471   : >> { %4334 = vmatmul.bf16.gmra.mxu3 %v7904_v30  ;;  %v8011_v30 = vpop.f32.mrf.mxu0 }
 0x473   : >> { %v4000_v14 = vpop.f32.mrf.mxu2 }
 0x474   : >> { %v3694_v4 = vpop.f32.mrf.mxu3  ;;  %v3958_v45 = vpop.f32.mrf.mxu1  ;;  %v4001_v16 = vadd.f32 %v4000_v14, %v3952_v26 }
 0x475   : >> { %v8005_v53 = vadd.f32 %v3694_v4, %v3654_v33  ;;  %v3959_v38 = vadd.f32 %v3958_v45, %v7967_v52 }
 0x476   : >> { %v4056_v51 = vrot.slane %v4001_v16, 1 }
 0x479   : >> { %v3929_v23 = vpop.f32.mrf.mxu0 }
 0x47b   : >> { %v4002_v13 = vpop.f32.mrf.mxu2 }
 0x47c   : >> { %v3696_v15 = vpop.f32.mrf.mxu3  ;;  %v4003_v27 = vadd.f32 %v4002_v13, %v3954_v32  ;;  %v3961_v44 = vpop.f32.mrf.mxu1 }
 0x47d   : >> { %v3962_v52 = vadd.f32 %v3961_v44, %v7974_v57 }
 0x47e   : >> { %v4057_v46 = vrot.slane %v4003_v27, 1 }
 0x47f   : >> { %4407 = vmatmul.bf16.gmra.mxu1 %v7831_v18 }
 0x480   : >> { %v4058_v8 = vsel %vm1107_vm0, %v4056_v51, %v4057_v46 }
 0x481   : >> { %v8014_v40 = vadd.f32 %v4058_v8, %v7945_v54  ;;  %v8023_v10 = vpop.f32.mrf.mxu0 }
 0x483   : >> { %v4005_v1 = vpop.f32.mrf.mxu2 }
 0x484   : >> { %v3963_v7 = vpop.f32.mrf.mxu1  ;;  %v4006_v58 = vadd.f32 %v4005_v1, %v3957_v63  ;;  %v4300_v44 = vpop.f32.mrf.mxu3 }
 0x485   : >> { %v3964_v29 = vadd.f32 %v3963_v7, %v7978_v49 }
 0x486   : >> { %v4059_v25 = vrot.slane %v4006_v58, 1 }
 0x489   : >> { %v3934_v11 = vpop.f32.mrf.mxu0 }
 0x48b   : >> { %v4007_v62 = vpop.f32.mrf.mxu2 }
 0x48c   : >> { %v4008_v47 = vadd.f32 %v4007_v62, %v3959_v38  ;;  %v3966_v43 = vpop.f32.mrf.mxu1  ;;  %v4302_v58 = vpop.f32.mrf.mxu3 }
 0x48d   : >> { %v3967_v57 = vadd.f32 %v3966_v43, %v7986_v6 }
 0x48e   : >> { %v4060_v59 = vrot.slane %v4008_v47, 1 }
 0x48f   : >> { %4412 = vmatmul.bf16.gmra.mxu1 %v7854_v19 }
 0x490   : >> { %v4061_v18 = vsel %vm1107_vm0, %v4059_v25, %v4060_v59 }
 0x491   : >> { %v8021_v54 = vadd.f32 %v4061_v18, %v7956_v61  ;;  %v8033_v24 = vpop.f32.mrf.mxu0 }
 0x493   : >> { %v4010_v5 = vpop.f32.mrf.mxu2 }
 0x494   : >> { %v3968_v48 = vpop.f32.mrf.mxu1  ;;  %v4011_v3 = vadd.f32 %v4010_v5, %v3962_v52  ;;  %v4305_v52 = vpop.f32.mrf.mxu3 }
 0x495   : >> { %v3969_v49 = vadd.f32 %v3968_v48, %v7990_v28 }
 0x496   : >> { %v4062_v20 = vrot.slane %v4011_v3, 1 }
 0x49b   : >> { %v4012_v12 = vpop.f32.mrf.mxu2 }
 0x49c   : >> { %v4013_v55 = vadd.f32 %v4012_v12, %v3964_v29  ;;  %v3971_v22 = vpop.f32.mrf.mxu1 }
 0x49d   : >> { %v3972_v15 = vadd.f32 %v3971_v22, %v8001_v56 }
 0x49e   : >> { %v4063_v33 = vrot.slane %v4013_v55, 1 }
 0x49f   : >> { %4417 = vmatmul.bf16.gmra.mxu1 %v7883_v39 }
 0x4a0   : >> { %v4064_v19 = vsel %vm1107_vm0, %v4062_v20, %v4063_v33 }
 0x4a1   : >> { %v8030_v61 = vadd.f32 %v4064_v19, %v7965_v21  ;;  %v3939_v21 = vpop.f32.mrf.mxu0 }
 0x4a3   : >> { %v4015_v34 = vpop.f32.mrf.mxu2 }
 0x4a4   : >> { %v3973_v17 = vpop.f32.mrf.mxu1  ;;  %v4016_v36 = vadd.f32 %v4015_v34, %v3967_v57 }
 0x4a5   : >> { %v3974_v27 = vadd.f32 %v3973_v17, %v3924_v35 }
 0x4a6   : >> { %v4065_v26 = vrot.slane %v4016_v36, 1 }
 0x4a9   : >> { %v4349_v8 = vpop.f32.mrf.mxu0 }
 0x4ab   : >> { %v4017_v14 = vpop.f32.mrf.mxu2 }
 0x4ac   : >> { %v4018_v4 = vadd.f32 %v4017_v14, %v3969_v49  ;;  %v3976_v45 = vpop.f32.mrf.mxu1 }
 0x4ad   : >> { %v3977_v35 = vadd.f32 %v3976_v45, %v8011_v30 }
 0x4ae   : >> { %v4066_v32 = vrot.slane %v4018_v4, 1 }
 0x4af   : >> { %4422 = vmatmul.bf16.gmra.mxu1 %v7908_v37 }
 0x4b0   : >> { %v4067_v16 = vsel %vm1107_vm0, %v4065_v26, %v4066_v32 }
 0x4b1   : >> { %v8039_v39 = vadd.f32 %v4067_v16, %v7976_v50  ;;  %v4351_v56 = vpop.f32.mrf.mxu0 }
 0x4b2   : >> { %v4352_v4 = vadd.f32 %v4351_v56, %v4302_v58 }
 0x4b3   : >> { %v4020_v13 = vpop.f32.mrf.mxu2 }
 0x4b4   : >> { %v3978_v6 = vpop.f32.mrf.mxu1  ;;  %v4021_v28 = vadd.f32 %v4020_v13, %v3972_v15 }
 0x4b5   : >> { %v3979_v47 = vadd.f32 %v3978_v6, %v3929_v23  ;;  %v4307_v23 = vpop.f32.mrf.mxu3  ;;  %v8060_v6 = vld [vmem:[%s7677_s7 + $0x2] ss:$0 sm:$0xff] }
 0x4b6   : >> { %v4068_v7 = vrot.slane %v4021_v28, 1 }
 0x4bb   : >> { %v4022_v51 = vpop.f32.mrf.mxu2 }
 0x4bc   : >> { %v4023_v46 = vadd.f32 %v4022_v51, %v3974_v27  ;;  %v3981_v1 = vpop.f32.mrf.mxu1  ;;  %v4507_v51 = vld [vmem:[#allocation3 + $0x30] sm:$0xff] }
 0x4bd   : >> { %v3982_v30 = vadd.f32 %v3981_v1, %v8023_v10  ;;  %v4310_v36 = vpop.f32.mrf.mxu3 }
 0x4be   : >> { %v4069_v63 = vrot.slane %v4023_v46, 1 }
 0x4bf   : >> { %4427 = vmatmul.bf16.gmra.mxu1 %v7925_v41  ;;  %v4354_v41 = vpop.f32.mrf.mxu0 }
 0x4c0   : >> { %v4070_v38 = vsel %vm1107_vm0, %v4068_v7, %v4069_v63  ;;  %v4355_v56 = vadd.f32 %v4354_v41, %v4305_v52 }
 0x4c1   : >> { %v8045_v37 = vadd.f32 %v4070_v38, %v7984_v2 }
 0x4c3   : >> { %v4025_v50 = vpop.f32.mrf.mxu2 }
 0x4c4   : >> { %v3983_v62 = vpop.f32.mrf.mxu1  ;;  %v4026_v43 = vadd.f32 %v4025_v50, %v3977_v35 }
 0x4c5   : >> { %v3984_v55 = vadd.f32 %v3983_v62, %v3934_v11 }
 0x4c6   : >> { %v4071_v5 = vrot.slane %v4026_v43, 1 }
 0x4c7   : >> { %v4356_v20 = vpop.f32.mrf.mxu0 }
 0x4c8   : >> { %v4357_v35 = vadd.f32 %v4356_v20, %v4307_v23  ;;  %v4508_v20 = vld [vmem:[#allocation3] sm:$0xff] }
 0x4cb   : >> { %v4027_v25 = vpop.f32.mrf.mxu2 }
 0x4cc   : >> { %v4028_v59 = vadd.f32 %v4027_v25, %v3979_v47  ;;  %v3986_v18 = vpop.f32.mrf.mxu1 }
 0x4cd   : >> { %v3987_v32 = vadd.f32 %v3986_v18, %v8033_v24 }
 0x4ce   : >> { %v4072_v48 = vrot.slane %v4028_v59, 1 }
 0x4cf   : >> { %4432 = vmatmul.bf16.gmra.mxu1 %v7932_v42  ;;  %v4359_v45 = vpop.f32.mrf.mxu0 }
 0x4d0   : >> { %v4073_v29 = vsel %vm1107_vm0, %v4071_v5, %v4072_v48 }
 0x4d1   : >> { %v8051_v2 = vadd.f32 %v4073_v29, %v7994_v0  ;;  %v4350_v0 = vadd.f32 %v4349_v8, %v4300_v44  ;;  %v4312_v8 = vpop.f32.mrf.mxu3 }
 0x4d3   : >> { %v4030_v3 = vpop.f32.mrf.mxu2 }
 0x4d4   : >> { %v3988_v12 = vpop.f32.mrf.mxu1  ;;  %v4031_v22 = vadd.f32 %v4030_v3, %v3982_v30 }
 0x4d5   : >> { %v3989_v15 = vadd.f32 %v3988_v12, %v3939_v21 }
 0x4d6   : >> { %v4074_v17 = vrot.slane %v4031_v22, 1  ;;  %v4627_v22 = vld [vmem:[#allocation2 + $0x8] sm:$0xf] }
 0x4d7   : >> { %v4361_v24 = vpop.f32.mrf.mxu0 }
 0x4d9   : >> { %v4315_v18 = vpop.f32.mrf.mxu3 }
 0x4db   : >> { %v4032_v33 = vpop.f32.mrf.mxu2 }
 0x4dc   : >> { %v4033_v19 = vadd.f32 %v4032_v33, %v3984_v55  ;;  %v4398_v34 = vpop.f32.mrf.mxu1  ;;  %v4630_v33 = vld [vmem:[#allocation2 + $0xc] sm:$0x1] }
 0x4dd   : >> { %v4399_v10 = vadd.f32 %v4398_v34, %v4350_v0  ;;  %v4360_v0 = vadd.f32 %v4359_v45, %v4310_v36 }
 0x4de   : >> { %v4075_v57 = vrot.slane %v4033_v19, 1 }
 0x4df   : >> { %v4454_v16 = vrot.slane %v4399_v10, 2  ;;  %v4364_v12 = vpop.f32.mrf.mxu0  ;;  %v4362_v10 = vadd.f32 %v4361_v24, %v4312_v8 }
 0x4e0   : >> { %v4076_v42 = vsel %vm1107_vm0, %v4074_v17, %v4075_v57 }
 0x4e1   : >> { %v8056_v49 = vadd.f32 %v4076_v42, %v7999_v9  ;;  %v4317_v57 = vpop.f32.mrf.mxu3 }
 0x4e3   : >> { %v4035_v14 = vpop.f32.mrf.mxu2 }
 0x4e4   : >> { %v4400_v11 = vpop.f32.mrf.mxu1  ;;  %v4036_v27 = vadd.f32 %v4035_v14, %v3987_v32 }
 0x4e5   : >> { %v4401_v26 = vadd.f32 %v4400_v11, %v4352_v4 }
 0x4e6   : >> { %v4077_v63 = vrot.slane %v4036_v27, 1 }
 0x4e7   : >> { %v4455_v13 = vrot.slane %v4401_v26, 2  ;;  %v4366_v14 = vpop.f32.mrf.mxu0 }
 0x4e9   : >> { %v4456_v28 = vsel %vm1504_vm1, %v4454_v16, %v4455_v13 }
 0x4ea   : >> { %v4486_v9 = vadd.f32 %v4456_v28, %v8014_v40 }
 0x4eb   : >> { %v4037_v44 = vpop.f32.mrf.mxu2 }
 0x4ec   : >> { %v4038_v46 = vadd.f32 %v4037_v44, %v3989_v15  ;;  %v4499_v1 = vadd.f32 %v8060_v6, %v4486_v9  ;;  %v4403_v7 = vpop.f32.mrf.mxu1  ;;  %v4633_v44 = vld [vmem:[#allocation2 + $0x10] sm:$0xf] }
 0x4ed   : >> { %v4404_v47 = vadd.f32 %v4403_v7, %v4355_v56  ;;  %v4509_v7 = vld [vmem:[#allocation3 + $0x18] sm:$0xff] }
 0x4ee   : >> { %v4078_v38 = vrot.slane %v4038_v46, 1  ;;  %v4515_v50 = vadd.f32 %v4507_v51, %v4499_v1  ;;  %v4636_v51 = vld [vmem:[#allocation2 + $0x14] sm:$0x1]  ;;  %v4320_v1 = vpop.f32.mrf.mxu3 }
 0x4ef   : >> { %v4457_v29 = vrot.slane %v4404_v47, 2 }
 0x4f0   : >> { %v4079_v58 = vsel %vm1107_vm0, %v4077_v63, %v4078_v38  ;;  %v4523_v62 = vmax.f32 %v4515_v50, 0.0  ;;  %v4369_v63 = vpop.f32.mrf.mxu0 }
 0x4f1   : >> { %v8067_v21 = vadd.f32 %v4079_v58, %v8005_v53 }
 0x4f2   : >> { %4531 = vst [vmem:[#allocation3 + $0x30] sm:$0xff] %v4523_v62  ;;  %v4539_v40 = vpack.c.bf16 %v4523_v62, %v4523_v62  ;;  %v4365_v62 = vadd.f32 %v4364_v12, %v4315_v18 }
 0x4f4   : >> { %v4548_v43 = vshrl.u32 %v4539_v40, 16  ;;  %v4405_v25 = vpop.f32.mrf.mxu1  ;;  %v4551_v48 = vshll.u32 %v4539_v40, 16  ;;  %v4367_v40 = vadd.f32 %v4366_v14, %v4317_v57 }
 0x4f5   : >> { %v4406_v59 = vadd.f32 %v4405_v25, %v4357_v35 }
 0x4f6   : >> { %v4550_v5 = vrot.slane %v4548_v43, 7  ;;  %v4322_v47 = vpop.f32.mrf.mxu3 }
 0x4f7   : >> { %v4458_v3 = vrot.slane %v4406_v59, 2 }
 0x4f8   : >> { %v4553_v30 = vor.u32 %v4551_v48, %v4550_v5  ;;  %v4554_v55 = vrot.slane %v4550_v5, 4  ;;  %v4371_v5 = vpop.f32.mrf.mxu0 }
 0x4f9   : >> { %v4459_v53 = vsel %vm1504_vm1, %v4457_v29, %v4458_v3  ;;  %v4372_v14 = vadd.f32 %v4371_v5, %v4322_v47 }
 0x4fa   : >> { %v4628_v52 = vsel %vm7389_vm6, %v4553_v30, %v4627_v22  ;;  %v4631_v41 = vsel %vm7394_vm7, %v4554_v55, %v4630_v33  ;;  %v4487_v23 = vadd.f32 %v4459_v53, %v8021_v54  ;;  %v4639_v22 = vld [vmem:[#allocation2 + $0x18] sm:$0xf]  ;;  %v4642_v33 = vld [vmem:[#allocation2 + $0x1c] sm:$0x1] }
 0x4fb   : >> { %4629 = vst [vmem:[#allocation2 + $0x8] sm:$0xf] %v4628_v52 }
 0x4fc   : >> { %4632 = vst [vmem:[#allocation2 + $0xc] sm:$0x1] %v4631_v41  ;;  %v4500_v19 = vadd.f32 %v8060_v6, %v4487_v23  ;;  %v4408_v34 = vpop.f32.mrf.mxu1  ;;  %v4510_v41 = vld [vmem:[#allocation3 + $0x10] sm:$0xff] }
 0x4fd   : >> { %v4409_v11 = vadd.f32 %v4408_v34, %v4360_v0 }
 0x4fe   : >> { %v4516_v17 = vadd.f32 %v4508_v20, %v4500_v19  ;;  %v4325_v19 = vpop.f32.mrf.mxu3 }
 0x4ff   : >> { %v4460_v15 = vrot.slane %v4409_v11, 2 }
 0x500   : >> { %v4524_v42 = vmax.f32 %v4516_v17, 0.0  ;;  %v4374_v17 = vpop.f32.mrf.mxu0 }
 0x502   : >> { %4532 = vst [vmem:[#allocation3] sm:$0xff] %v4524_v42  ;;  %v4540_v4 = vpack.c.bf16 %v4524_v42, %v4524_v42  ;;  %v4370_v42 = vadd.f32 %v4369_v63, %v4320_v1 }
 0x504   : >> { %v4556_v26 = vshrl.u32 %v4540_v4, 16  ;;  %v4410_v32 = vpop.f32.mrf.mxu1  ;;  %v4559_v54 = vshll.u32 %v4540_v4, 16 }
 0x505   : >> { %v4411_v16 = vadd.f32 %v4410_v32, %v4362_v10 }
 0x506   : >> { %v4558_v13 = vrot.slane %v4556_v26, 7 }
 0x507   : >> { %v4461_v27 = vrot.slane %v4411_v16, 2 }
 0x508   : >> { %v4561_v28 = vor.u32 %v4559_v54, %v4558_v13  ;;  %v4562_v9 = vrot.slane %v4558_v13, 4  ;;  %v4327_v54 = vpop.f32.mrf.mxu3 }
 0x509   : >> { %v4462_v46 = vsel %vm1504_vm1, %v4460_v15, %v4461_v27 }
 0x50a   : >> { %v4634_v36 = vsel %vm7389_vm6, %v4561_v28, %v4633_v44  ;;  %v4637_v45 = vsel %vm7394_vm7, %v4562_v9, %v4636_v51  ;;  %v4488_v8 = vadd.f32 %v4462_v46, %v8030_v61  ;;  %v4645_v28 = vld [vmem:[#allocation2 + $0x20] sm:$0xf]  ;;  %v4648_v9 = vld [vmem:[#allocation2 + $0x24] sm:$0x1]  ;;  %v4376_v51 = vpop.f32.mrf.mxu0 }
 0x50b   : >> { %4635 = vst [vmem:[#allocation2 + $0x10] sm:$0xf] %v4634_v36 }
 0x50c   : >> { %4638 = vst [vmem:[#allocation2 + $0x14] sm:$0x1] %v4637_v45  ;;  %v4501_v38 = vadd.f32 %v8060_v6, %v4488_v8  ;;  %v4413_v24 = vpop.f32.mrf.mxu1  ;;  %v4511_v45 = vld [vmem:[#allocation3 + $0x8] sm:$0xff] }
 0x50d   : >> { %v4414_v35 = vadd.f32 %v4413_v24, %v4365_v62  ;;  %v4375_v24 = vadd.f32 %v4374_v17, %v4325_v19  ;;  %v4377_v62 = vadd.f32 %v4376_v51, %v4327_v54  ;;  %v4660_v54 = vld [vmem:[#allocation2 + $0x34] sm:$0x1] }
 0x50e   : >> { %v4517_v50 = vadd.f32 %v4509_v7, %v4501_v38 }
 0x50f   : >> { %v4463_v29 = vrot.slane %v4414_v35, 2 }
 0x510   : >> { %v4525_v58 = vmax.f32 %v4517_v50, 0.0  ;;  %v4330_v50 = vpop.f32.mrf.mxu3 }
 0x512   : >> { %4533 = vst [vmem:[#allocation3 + $0x18] sm:$0xff] %v4525_v58  ;;  %v4541_v56 = vpack.c.bf16 %v4525_v58, %v4525_v58 }
 0x514   : >> { %v4564_v43 = vshrl.u32 %v4541_v56, 16  ;;  %v4415_v25 = vpop.f32.mrf.mxu1  ;;  %v4567_v48 = vshll.u32 %v4541_v56, 16 }
 0x515   : >> { %v4416_v59 = vadd.f32 %v4415_v25, %v4367_v40  ;;  %v4379_v40 = vpop.f32.mrf.mxu0 }
 0x516   : >> { %v4566_v61 = vrot.slane %v4564_v43, 7  ;;  %v4380_v19 = vadd.f32 %v4379_v40, %v4330_v50 }
 0x517   : >> { %v4464_v3 = vrot.slane %v4416_v59, 2 }
 0x518   : >> { %v4569_v30 = vor.u32 %v4567_v48, %v4566_v61  ;;  %v4570_v55 = vrot.slane %v4566_v61, 4 }
 0x519   : >> { %v4465_v53 = vsel %vm1504_vm1, %v4463_v29, %v4464_v3  ;;  %v4651_v29 = vld [vmem:[#allocation2 + $0x28] sm:$0xf]  ;;  %v4654_v3 = vld [vmem:[#allocation2 + $0x2c] sm:$0x1] }
 0x51a   : >> { %v4640_v18 = vsel %vm7389_vm6, %v4569_v30, %v4639_v22  ;;  %v4643_v12 = vsel %vm7394_vm7, %v4570_v55, %v4642_v33  ;;  %v4489_v52 = vadd.f32 %v4465_v53, %v8039_v39  ;;  %v4512_v53 = vld [vmem:[#allocation3 + $0x20] sm:$0xff] }
 0x51b   : >> { %4641 = vst [vmem:[#allocation2 + $0x18] sm:$0xf] %v4640_v18  ;;  %v4332_v18 = vpop.f32.mrf.mxu3 }
 0x51c   : >> { %4644 = vst [vmem:[#allocation2 + $0x1c] sm:$0x1] %v4643_v12  ;;  %v4502_v23 = vadd.f32 %v8060_v6, %v4489_v52  ;;  %v4418_v20 = vpop.f32.mrf.mxu1 }
 0x51d   : >> { %v4419_v4 = vadd.f32 %v4418_v20, %v4370_v42 }
 0x51e   : >> { %v4518_v34 = vadd.f32 %v4510_v41, %v4502_v23  ;;  %v4381_v41 = vpop.f32.mrf.mxu0 }
 0x51f   : >> { %v4466_v16 = vrot.slane %v4419_v4, 2  ;;  %v4382_v17 = vadd.f32 %v4381_v41, %v4332_v18  ;;  %v4669_v41 = vld [vmem:[#allocation2 + $0x40] sm:$0xf] }
 0x520   : >> { %v4526_v57 = vmax.f32 %v4518_v34, 0.0 }
 0x522   : >> { %4534 = vst [vmem:[#allocation3 + $0x10] sm:$0xff] %v4526_v57  ;;  %v4542_v0 = vpack.c.bf16 %v4526_v57, %v4526_v57 }
 0x523   : >> { %v4335_v4 = vpop.f32.mrf.mxu3 }
 0x524   : >> { %v4572_v10 = vshrl.u32 %v4542_v0, 16  ;;  %v4420_v11 = vpop.f32.mrf.mxu1  ;;  %v4575_v39 = vshll.u32 %v4542_v0, 16 }
 0x525   : >> { %v4421_v26 = vadd.f32 %v4420_v11, %v4372_v14 }
 0x526   : >> { %v4574_v32 = vrot.slane %v4572_v10, 7 }
 0x527   : >> { %v4467_v13 = vrot.slane %v4421_v26, 2 }
 0x528   : >> { %v4577_v15 = vor.u32 %v4575_v39, %v4574_v32  ;;  %v4578_v27 = vrot.slane %v4574_v32, 4  ;;  %v4384_v32 = vpop.f32.mrf.mxu0 }
 0x529   : >> { %v4468_v44 = vsel %vm1504_vm1, %v4466_v16, %v4467_v13  ;;  %v4657_v13 = vld [vmem:[#allocation2 + $0x30] sm:$0xf] }
 0x52a   : >> { %v4646_v46 = vsel %vm7389_vm6, %v4577_v15, %v4645_v28  ;;  %v4649_v1 = vsel %vm7394_vm7, %v4578_v27, %v4648_v9  ;;  %v4490_v36 = vadd.f32 %v4468_v44, %v8045_v37  ;;  %v4513_v44 = vld [vmem:[#allocation3 + $0x28] sm:$0xff] }
 0x52b   : >> { %4647 = vst [vmem:[#allocation2 + $0x20] sm:$0xf] %v4646_v46 }
 0x52c   : >> { %4650 = vst [vmem:[#allocation2 + $0x24] sm:$0x1] %v4649_v1  ;;  %v4503_v8 = vadd.f32 %v8060_v6, %v4490_v36  ;;  %v4423_v7 = vpop.f32.mrf.mxu1  ;;  %v4337_v36 = vpop.f32.mrf.mxu3 }
 0x52d   : >> { %v4424_v56 = vadd.f32 %v4423_v7, %v4375_v24 }
 0x52e   : >> { %v4519_v63 = vadd.f32 %v4511_v45, %v4503_v8  ;;  %v4385_v8 = vadd.f32 %v4384_v32, %v4335_v4 }
 0x52f   : >> { %v4469_v59 = vrot.slane %v4424_v56, 2 }
 0x530   : >> { %v4527_v38 = vmax.f32 %v4519_v63, 0.0  ;;  %v4386_v7 = vpop.f32.mrf.mxu0 }
 0x532   : >> { %4535 = vst [vmem:[#allocation3 + $0x8] sm:$0xff] %v4527_v38  ;;  %v4543_v58 = vpack.c.bf16 %v4527_v38, %v4527_v38  ;;  %v4387_v38 = vadd.f32 %v4386_v7, %v4337_v36  ;;  %v4776_v7 = vlaneseq (%p1718_p4) }
 0x534   : >> { %v4580_v35 = vshrl.u32 %v4543_v58, 16  ;;  %v4425_v47 = vpop.f32.mrf.mxu1  ;;  %v4583_v37 = vshll.u32 %v4543_v58, 16 }
 0x535   : >> { %v4426_v43 = vadd.f32 %v4425_v47, %v4377_v62 }
 0x536   : >> { %v4582_v25 = vrot.slane %v4580_v35, 7 }
 0x537   : >> { %v4470_v5 = vrot.slane %v4426_v43, 2 }
 0x538   : >> { %v4585_v61 = vor.u32 %v4583_v37, %v4582_v25  ;;  %v4586_v48 = vrot.slane %v4582_v25, 4  ;;  %v4663_v25 = vld [vmem:[#allocation2 + $0x38] sm:$0xf]  ;;  %v4666_v37 = vld [vmem:[#allocation2 + $0x3c] sm:$0x1] }
 0x539   : >> { %v4471_v30 = vsel %vm1504_vm1, %v4469_v59, %v4470_v5  ;;  %v4679_v60 = vld [vmem:[#allocation3 + $0x8] sm:$0xff] (%p1718_p4) }
 0x53a   : >> { %v4652_v55 = vsel %vm7389_vm6, %v4585_v61, %v4651_v29  ;;  %v4655_v22 = vsel %vm7394_vm7, %v4586_v48, %v4654_v3  ;;  %v4491_v33 = vadd.f32 %v4471_v30, %v8051_v2  ;;  %v4514_v29 = vld [vmem:[#allocation3 + $0x38] sm:$0xff] }
 0x53b   : >> { %4653 = vst [vmem:[#allocation2 + $0x28] sm:$0xf] %v4652_v55 }
 0x53c   : >> { %4656 = vst [vmem:[#allocation2 + $0x2c] sm:$0x1] %v4655_v22  ;;  %v4504_v12 = vadd.f32 %v8060_v6, %v4491_v33  ;;  %v4428_v52 = vpop.f32.mrf.mxu1 }
 0x53d   : >> { %v4429_v57 = vadd.f32 %v4428_v52, %v4380_v19  ;;  %v6818_v19 = vld [vmem:[%s8167_s3 + $0x30] sm:$0xff] (%p1718_p4) }
 0x53e   : >> { %v4520_v23 = vadd.f32 %v4512_v53, %v4504_v12 }
 0x53f   : >> { %v4472_v11 = vrot.slane %v4429_v57, 2  ;;  %v4677_v57 = vld [vmem:[#allocation3 + $0x18] sm:$0xff] (%p1718_p4) }
 0x540   : >> { %v4528_v20 = vmax.f32 %v4520_v23, 0.0  ;;  %v4672_v23 = vld [vmem:[#allocation2 + $0x44] sm:$0x1] }
 0x542   : >> { %4536 = vst [vmem:[#allocation3 + $0x20] sm:$0xff] %v4528_v20  ;;  %v4544_v34 = vpack.c.bf16 %v4528_v20, %v4528_v20 }
 0x544   : >> { %v4588_v42 = vshrl.u32 %v4544_v34, 16  ;;  %v4430_v0 = vpop.f32.mrf.mxu1  ;;  %v4591_v10 = vshll.u32 %v4544_v34, 16  ;;  %v4675_v34 = vld [vmem:[#allocation3 + $0x30] sm:$0xff] (%p1718_p4) }
 0x545   : >> { %v4431_v14 = vadd.f32 %v4430_v0, %v4382_v17  ;;  %v4676_v17 = vld [vmem:[#allocation3] sm:$0xff] (%p1718_p4)  ;;  %v4678_v0 = vld [vmem:[#allocation3 + $0x10] sm:$0xff] (%p1718_p4) }
 0x546   : >> { %v4590_v2 = vrot.slane %v4588_v42, 7  ;;  %v4683_v42 = vadd.f32 (%p1718_p4), %v4676_v17, %v4675_v34 }
 0x547   : >> { %v4473_v26 = vrot.slane %v4431_v14, 2  ;;  %v6817_v14 = vld [vmem:[%s8167_s3 + $0x28] sm:$0xff] (%p1718_p4) }
 0x548   : >> { %v4593_v39 = vor.u32 %v4591_v10, %v4590_v2  ;;  %v4594_v16 = vrot.slane %v4590_v2, 4  ;;  %v4684_v4 = vadd.f32 (%p1718_p4), %v4683_v42, %v4677_v57  ;;  %v6816_v10 = vld [vmem:[%s8167_s3 + $0x20] sm:$0xff] (%p1718_p4) }
 0x549   : >> { %v4474_v15 = vsel %vm1504_vm1, %v4472_v11, %v4473_v26  ;;  %v4680_v2 = vld [vmem:[#allocation3 + $0x20] sm:$0xff] (%p1718_p4) }
 0x54a   : >> { %v4658_v27 = vsel %vm7389_vm6, %v4593_v39, %v4657_v13  ;;  %v4661_v28 = vsel %vm7394_vm7, %v4594_v16, %v4660_v54  ;;  %v4492_v9 = vadd.f32 %v4474_v15, %v8056_v49  ;;  %v4685_v31 = vadd.f32 (%p1718_p4), %v4684_v4, %v4678_v0  ;;  %v6815_v16 = vld [vmem:[%s8167_s3 + $0x18] sm:$0xff] (%p1718_p4)  ;;  %v6814_v15 = vld [vmem:[%s8167_s3 + $0x10] sm:$0xff] (%p1718_p4) }
 0x54b   : >> { %4659 = vst [vmem:[#allocation2 + $0x30] sm:$0xf] %v4658_v27 }
 0x54c   : >> { %4662 = vst [vmem:[#allocation2 + $0x34] sm:$0x1] %v4661_v28  ;;  %v4505_v51 = vadd.f32 %v8060_v6, %v4492_v9  ;;  %v4433_v46 = vpop.f32.mrf.mxu1  ;;  %v4686_v11 = vadd.f32 (%p1718_p4), %v4685_v31, %v4679_v60  ;;  %v6813_v9 = vld [vmem:[%s8167_s3 + $0x8] sm:$0xff] (%p1718_p4) }
 0x54d   : >> { %v4434_v24 = vadd.f32 %v4433_v46, %v4385_v8  ;;  %v6812_v46 = vld [vmem:[%s8167_s3] sm:$0xff] (%p1718_p4) }
 0x54e   : >> { %v4521_v1 = vadd.f32 %v4513_v44, %v4505_v51  ;;  %v4687_v32 = vadd.f32 (%p1718_p4), %v4686_v11, %v4680_v2 }
 0x54f   : >> { %v4475_v40 = vrot.slane %v4434_v24, 2 }
 0x550   : >> { %v4529_v45 = vmax.f32 %v4521_v1, 0.0 }
 0x552   : >> { %4537 = vst [vmem:[#allocation3 + $0x28] sm:$0xff] %v4529_v45  ;;  %v4545_v63 = vpack.c.bf16 %v4529_v45, %v4529_v45 }
 0x554   : >> { %v4596_v50 = vshrl.u32 %v4545_v63, 16  ;;  %v4435_v58 = vpop.f32.mrf.mxu1  ;;  %v4599_v49 = vshll.u32 %v4545_v63, 16  ;;  %v4777_v63 = vand.u32 (%p1718_p4), 127, %v4776_v7 }
 0x555   : >> { %v4436_v62 = vadd.f32 %v4435_v58, %v4387_v38  ;;  %v4714_v38 = vld [vmem:[%s8168_s4] sm:$0x1] (%p1718_p4) }
 0x556   : >> { %v4598_v56 = vrot.slane %v4596_v50, 7  ;;  %vm4778_vm8 = vcmp.lt.s32.totalorder (%p1718_p4), %v4777_v63, 10  ;;  %vm4806_vm9 = vcmp.eq.s32.totalorder (%p1718_p4), %v4777_v63, 10 }
 0x557   : >> { %v4476_v35 = vrot.slane %v4436_v62, 2 }
 0x558   : >> { %v4601_v47 = vor.u32 %v4599_v49, %v4598_v56  ;;  %v4602_v43 = vrot.slane %v4598_v56, 4 }
 0x559   : >> { %v4477_v59 = vsel %vm1504_vm1, %v4475_v40, %v4476_v35  ;;  %v4681_v26 = vld [vmem:[#allocation3 + $0x28] sm:$0xff] (%p1718_p4) }
 0x55a   : >> { %v4664_v5 = vsel %vm7389_vm6, %v4601_v47, %v4663_v25  ;;  %v4667_v61 = vsel %vm7394_vm7, %v4602_v43, %v4666_v37  ;;  %v4493_v48 = vadd.f32 %v4477_v59, %v8067_v21  ;;  %v4688_v13 = vadd.f32 (%p1718_p4), %v4687_v32, %v4681_v26 }
 0x55b   : >> { %4665 = vst [vmem:[#allocation2 + $0x38] sm:$0xf] %v4664_v5 }
 0x55c   : >> { %4668 = vst [vmem:[#allocation2 + $0x3c] sm:$0x1] %v4667_v61  ;;  %v4506_v3 = vadd.f32 %v8060_v6, %v4493_v48  ;;  %v6819_v6 = vld [vmem:[%s8167_s3 + $0x38] sm:$0xff] (%p1718_p4) }
 0x55d   : > { %4763 = vmatpush.bf16.msra.mxu0 (%p1718_p4), %v6819_v6 }
 0x55e   : >> { %v4522_v30 = vadd.f32 %v4514_v29, %v4506_v3 }
 0x560   : >> { %v4530_v55 = vmax.f32 %v4522_v30, 0.0 }
 0x561   : > { %4764 = vmatpush.bf16.msra.mxu0 (%p1718_p4), %v6818_v19 }
 0x562   : >> { %4538 = vst [vmem:[#allocation3 + $0x38] sm:$0xff] %v4530_v55  ;;  %v4546_v22 = vpack.c.bf16 %v4530_v55, %v4530_v55 }
 0x564   : >> { %v4604_v33 = vshrl.u32 %v4546_v22, 16  ;;  %v4607_v18 = vshll.u32 %v4546_v22, 16 }
 0x565   : > { %4765 = vmatpush.bf16.msra.mxu0 (%p1718_p4), %v6817_v14 }
 0x566   : >> { %v4606_v53 = vrot.slane %v4604_v33, 7 }
 0x568   : >> { %v4609_v12 = vor.u32 %v4607_v18, %v4606_v53  ;;  %v4610_v52 = vrot.slane %v4606_v53, 4  ;;  %1720 = sbr.rel (!%p1718_p4) target bundleno = 480 (0x1e0), region = 91 }
 0x569   : > { %v4682_v39 = vld [vmem:[#allocation3 + $0x38] sm:$0xff] (%p1718_p4)  ;;  %4766 = vmatpush.bf16.msra.mxu0 (%p1718_p4), %v6816_v10 }
 0x56a   : >> { %v4670_v20 = vsel %vm7389_vm6, %v4609_v12, %v4669_v41  ;;  %v4673_v21 = vsel %vm7394_vm7, %v4610_v52, %v4672_v23  ;;  %v4689_v54 = vadd.f32 (%p1718_p4), %v4688_v13, %v4682_v39 }
 0x56b   : >> { %4671 = vst [vmem:[#allocation2 + $0x40] sm:$0xf] %v4670_v20 }
 0x56c   : >> { %4674 = vst [vmem:[#allocation2 + $0x44] sm:$0x1] %v4673_v21  ;;  %v4690_v27 = vrot.slane (%p1718_p4), %v4689_v54, 4 }
 0x56d   : > { %4767 = vmatpush.bf16.msra.mxu0 %v6815_v16 }
 0x56e   : > { %v4691_v28 = vadd.f32 %v4690_v27, %v4689_v54 }
 0x570   : > { %v4692_v44 = vrot.slane %v4691_v28, 2 }
 0x571   : > { %4768 = vmatpush.bf16.msra.mxu0 %v6814_v15 }
 0x572   : > { %v4693_v51 = vadd.f32 %v4692_v44, %v4691_v28 }
 0x574   : > { %v4694_v1 = vrot.slane %v4693_v51, 1 }
 0x575   : > { %4769 = vmatpush.bf16.msra.mxu0 %v6813_v9 }
 0x576   : > { %v4695_v36 = vadd.f32 %v4694_v1, %v4693_v51 }
 0x578   : > { %v4696_v45 = vmul.f32 0.015625, %v4695_v36 }
 0x579   : > { %4770 = vmatpush.bf16.msra.mxu0 %v6812_v46 }
 0x57a   : > { %v4697_v8 = vpack.c.bf16 %v4696_v45, %v4696_v45 }
 0x57c   : > { %4771 = vmatmul.bf16.vlgmr.msra.gmra.mxu0 %v4697_v8 }
 0x5f9   : > { %v4772_v24 = vpop.f32.mrf.mxu0 }
 0x5fa   : > { %v4773_v50 = vadd.f32 %v4772_v24, %v4714_v38 }
 0x5fc   : > { %6881 = vtanh.f32 %v4773_v50  ;;  %v4779_v58 = vsel %vm4778_vm8, %v4773_v50, -1e+30 }
 0x5fd   : > { %v4781_v62 = vsel %vm1668_vm4, %v4779_v58, -inf }
 0x5fe   : > { %4782 = vmax.xlane.f32.xlu0 %v4781_v62 }
 0x601   : > { %v4774_v56 = vpop.f32.mrf.mxu0 }
 0x602   : > { %v6882_v49 = vpop.eup %6881 }
 0x603   : > { %v4807_v40 = vsel %vm4806_vm9, %v6882_v49, 0.0 }
 0x671   : > { %v4783_v35 = vpop.xlane.xlu0 %4782 }
 0x672   : > { %v4784_v47 = vsub.f32 %v4779_v58, %v4783_v35 }
 0x674   : > { %v4785_v43 = vmul.f32 1.442695, %v4784_v47 }
 0x676   : > { %6883 = vpow2.f32 %v4785_v43 }
 0x67c   : > { %v6884_v25 = vpop.eup %6883 }
 0x67d   : > { %v4787_v37 = vsel %vm1668_vm4, %v6884_v25, 0.0 }
 0x67e   : > { %4788 = vadd.xlane.f32.xlu0 %v4787_v37 }
 0x6f1   : > { %v4789_v59 = vpop.xlane.xlu0 %4788 }
 0x6f2   : > { %6885 = vrcp.f32 %v4789_v59  ;;  %v4801_v29 = vand.u32 2147483648, %v4789_v59  ;;  %v4799_v30 = vand.u32 2147483647, %v4789_v59  ;;  %vm4795_vm11 = vweird.f32 %v4789_v59 }
 0x6f4   : > { %v4802_v22 = vor.u32 1.1754944e-38, %v4801_v29  ;;  %vm4800_vm13 = vcmp.eq.f32.partialorder %v4799_v30, 8.507059e+37 }
 0x6f8   : > { %v6886_v5 = vpop.eup %6885 }
 0x6f9   : > { %v4791_v61 = vmul.f32 %v6886_v5, %v4789_v59  ;;  %vm4796_vm10 = vweird.f32 %v6886_v5 }
 0x6fa   : > { %vm4797_vm12 = vmor %vm4795_vm11, %vm4796_vm10 }
 0x6fb   : > { %v4792_v48 = vsub.f32 1.0, %v4791_v61 }
 0x6fd   : > { %v4793_v3 = vmul.f32 %v6886_v5, %v4792_v48 }
 0x6ff   : > { %v4794_v55 = vadd.f32 %v6886_v5, %v4793_v3 }
 0x701   : > { %v4798_v33 = vsel %vm4797_vm12, %v6886_v5, %v4794_v55 }
 0x702   : > { %v4803_v53 = vsel %vm4800_vm13, %v4802_v22, %v4798_v33 }
 0x703   : > { %v4804_v18 = vmul.f32 %v6884_v25, %v4803_v53 }
 0x705   : > { %v4808_v12 = vsel %vm4778_vm8, %v4804_v18, %v4807_v40 }
 0x706   : > { %4809 = vst [vmem:[%s220_s26] sm:$0x1] %v4808_v12 }
 0x707 PF: > { %s15_s18 = sadd.s32 1, %s6897_s18  }
 0x708   : > { %p12_p5 = scmp.ge.s32.totalorder %s15_s18, 4  }
 0x70a   :  { %14 = sbr.rel (!%p12_p5) target bundleno = 1 (0x1), region = 102 }

</bundles_post_ra>
